<compile_context>
chip_gen: v7x
topology: tpu7x:2x2x1
jax: 0.10.0
libtpu: 0.0.40
codegen_flags: <defaults>
</compile_context>

<pallas_src>
import functools

import jax
import jax.numpy as jnp
from jax import lax
from jax.experimental import pallas as pl
from jax.experimental.pallas import tpu as pltpu

BF16 = jnp.bfloat16
F32 = jnp.float32


def _out_size(h, k, s):
    return (h - k) // s + 1


# ----------------------------------------------------------------------------
# Kernel 1: conv1 (8x8, stride 4) + bias + ReLU.
# The wrapper space-to-depths the input by 4, so conv1 becomes a 2x2 stride-1
# conv over a (S1, S1, 16*Cin) tensor -> 4 shifted batched matmuls on the MXU.
# ----------------------------------------------------------------------------
def _conv1_kernel(x1_ref, w_ref, b_ref, o_ref, *, oh):
    cout = w_ref.shape[-1]
    acc = jnp.zeros((oh, oh, cout), F32)
    for ii in range(2):
        for jj in range(2):
            patch = x1_ref[pl.ds(ii, oh), pl.ds(jj, oh), :].astype(BF16)   # (oh,oh,16*Cin)
            w = w_ref[ii * 2 + jj]                                         # (16*Cin, Cout) bf16
            wb = jnp.broadcast_to(w[None], (oh,) + w.shape)
            acc = acc + jnp.einsum("hwc,hco->hwo", patch, wb,
                                   preferred_element_type=F32)
    acc = jnp.maximum(acc + b_ref[...][None], 0.0)
    o_ref[...] = acc.astype(o_ref.dtype)


# ----------------------------------------------------------------------------
# Kernel 2: conv2 + conv3 + fc1 + ReLU + fc2, fully fused, VMEM-resident.
# conv2's input was space-to-depth'ed by 2 in the wrapper -> 2x2 stride-1 conv;
# conv3 is natively 3x3 stride-1.  act2/act3 live in VMEM scratch; fc2 is a
# small epilogue matmul on the VMEM-resident hidden vector.
# ----------------------------------------------------------------------------
def _tail_kernel(x2_ref, w2_ref, b2_ref, w3_ref, b3_ref,
                 wf1_ref, bf1_ref, wf2_ref, bf2_ref, q_ref,
                 act2_s, act3_s, *, oh2, oh3):
    c2out = w2_ref.shape[-1]
    c3out = w3_ref.shape[-1]
    hidden = wf1_ref.shape[-1]

    # ---- conv2 (as 2x2 / stride-1 over the stride-2 space-to-depth input)
    acc = jnp.zeros((oh2, oh2, c2out), F32)
    for ii in range(2):
        for jj in range(2):
            patch = x2_ref[pl.ds(ii, oh2), pl.ds(jj, oh2), :].astype(BF16)
            w = w2_ref[ii * 2 + jj]
            acc = acc + jnp.einsum("hwc,hco->hwo", patch,
                                   jnp.broadcast_to(w[None], (oh2,) + w.shape),
                                   preferred_element_type=F32)
    act2_s[...] = jnp.maximum(acc + b2_ref[...][None], 0.0)

    # ---- conv3 (3x3 / stride-1), reading act2 from VMEM scratch
    acc = jnp.zeros((oh3, oh3, c3out), F32)
    for i in range(3):
        for j in range(3):
            patch = act2_s[pl.ds(i, oh3), pl.ds(j, oh3), :].astype(BF16)
            w = w3_ref[i * 3 + j]
            acc = acc + jnp.einsum("hwc,hco->hwo", patch,
                                   jnp.broadcast_to(w[None], (oh3,) + w.shape),
                                   preferred_element_type=F32)
    act3_s[...] = jnp.maximum(acc + b3_ref[...][None], 0.0)

    # ---- fc1 (+ReLU) with fc2 folded in as an epilogue (no extra launch)
    h = jnp.zeros((1, hidden), F32)
    for p in range(oh3 * oh3):
        row = act3_s[p // oh3, pl.ds(p % oh3, 1), :].astype(BF16)          # (1, C3)
        h = h + jnp.dot(row, wf1_ref[p], preferred_element_type=F32)
    h = jnp.maximum(h + bf1_ref[...], 0.0)
    q = jnp.dot(h.astype(BF16), wf2_ref[...], preferred_element_type=F32)
    q_ref[...] = q + bf2_ref[...]


# ----------------------------------------------------------------------------
# One-time weight repacking (space-to-depth layouts, NCHW-flatten order folded
# into fc1, bf16 cast).  Runs once, outside the hot path.
# ----------------------------------------------------------------------------
def prepare_params(params, spatial):
    oh1 = _out_size(spatial, 8, 4)
    oh2 = _out_size(oh1, 4, 2)
    oh3 = _out_size(oh2, 3, 1)

    # conv1 (O1, Cin, 8, 8): split k8 into (2 macro, 4 micro); micro (di,dj,cin)
    # becomes the space-to-depth channel, macro (ii,jj) the 2x2 kernel.
    w1 = params["conv1_w"]
    o1, cin = w1.shape[0], w1.shape[1]
    w1 = w1.reshape(o1, cin, 2, 4, 2, 4)                   # (o, c, ii, di, jj, dj)
    w1 = jnp.transpose(w1, (2, 4, 3, 5, 1, 0))             # (ii, jj, di, dj, c, o)
    w1p = w1.reshape(4, 16 * cin, o1).astype(BF16)         # chan = di*4C + dj*C + c

    # conv2 (O2, O1, 4, 4): split k4 into (2 macro, 2 micro).
    w2 = params["conv2_w"]
    o2 = w2.shape[0]
    w2 = w2.reshape(o2, o1, 2, 2, 2, 2)                    # (o, c, ii, p, jj, q)
    w2 = jnp.transpose(w2, (2, 4, 3, 5, 1, 0))             # (ii, jj, p, q, c, o)
    w2p = w2.reshape(4, 4 * o1, o2).astype(BF16)           # chan = p*2C + q*C + c

    # conv3 (O3, O2, 3, 3): plain (k, Cin, Cout) repack.
    w3 = params["conv3_w"]
    o3 = w3.shape[0]
    w3p = jnp.transpose(w3, (2, 3, 1, 0)).reshape(9, o2, o3).astype(BF16)

    # fc1 rows are in PyTorch's NCHW flatten order (c*H*W + h*W + w); permute
    # them once so the kernel can consume the NHWC conv3 output directly.
    wf1 = params["fc1_w"]
    hidden = wf1.shape[1]
    wf1 = wf1.reshape(o3, oh3, oh3, hidden)                # (c, h, w, n)
    wf1p = jnp.transpose(wf1, (1, 2, 0, 3)).reshape(oh3 * oh3, o3, hidden).astype(BF16)

    return {
        "w1": w1p, "b1": params["conv1_b"].reshape(1, -1).astype(F32),
        "w2": w2p, "b2": params["conv2_b"].reshape(1, -1).astype(F32),
        "w3": w3p, "b3": params["conv3_b"].reshape(1, -1).astype(F32),
        "wf1": wf1p, "bf1": params["fc1_b"].reshape(1, -1).astype(F32),
        "wf2": params["fc2_w"].astype(BF16),
        "bf2": params["fc2_b"].reshape(1, -1).astype(F32),
    }


# ----------------------------------------------------------------------------
# Full forward: two pallas_calls + two cheap layout permutations.
# ----------------------------------------------------------------------------
def atari_critic_forward(prep, x_nchw, a):
    # `a` is accepted for API parity with the PyTorch module but unused:
    # the discrete critic returns Q(s, .) for every action.
    del a
    b, cin, hh, ww = x_nchw.shape
    assert hh == ww and hh % 4 == 0, "Atari stack expects square, /4 input"
    oh1 = _out_size(hh, 8, 4)
    oh2 = _out_size(oh1, 4, 2)
    oh3 = _out_size(oh2, 3, 1)
    s1 = hh // 4
    s2 = oh2 + 1

    # -- single-pass layout prep of the raw input (no duplication):
    #    NCHW -> NHWC -> stride-4 space-to-depth, so conv1 becomes 2x2/s1.
    x_nhwc = jnp.transpose(x_nchw, (0, 2, 3, 1))
    x1 = x_nhwc.reshape(b, s1, 4, s1, 4, cin)
    x1 = jnp.transpose(x1, (0, 1, 3, 2, 4, 5)).reshape(b, s1, s1, 16 * cin)

    o1 = prep["w1"].shape[-1]
    act1 = pl.pallas_call(
        functools.partial(_conv1_kernel, oh=oh1),
        out_shape=jax.ShapeDtypeStruct((b, oh1, oh1, o1), F32),
        grid=(b,),
        in_specs=[
            pl.BlockSpec((None, s1, s1, 16 * cin), lambda i: (i, 0, 0, 0)),
            pl.BlockSpec(prep["w1"].shape, lambda i: (0, 0, 0)),
            pl.BlockSpec(prep["b1"].shape, lambda i: (0, 0)),
        ],
        out_specs=pl.BlockSpec((None, oh1, oh1, o1), lambda i: (i, 0, 0, 0)),
        compiler_params=pltpu.CompilerParams(dimension_semantics=("parallel",)),
    )(x1, prep["w1"], prep["b1"])

    # -- tiny repack of act1 for conv2's stride 2 (~28 KB/sample, read once):
    #    crop to the 2*s2 rows/cols conv2 touches, space-to-depth by 2.
    e = 2 * s2
    a1 = act1[:, :e, :e, :].reshape(b, s2, 2, s2, 2, o1)
    x2 = jnp.transpose(a1, (0, 1, 3, 2, 4, 5)).reshape(b, s2, s2, 4 * o1)

    num_actions = prep["wf2"].shape[-1]
    q = pl.pallas_call(
        functools.partial(_tail_kernel, oh2=oh2, oh3=oh3),
        out_shape=jax.ShapeDtypeStruct((b, 1, num_actions), F32),
        grid=(b,),
        in_specs=[
            pl.BlockSpec((None, s2, s2, 4 * o1), lambda i: (i, 0, 0, 0)),
            pl.BlockSpec(prep["w2"].shape, lambda i: (0, 0, 0)),
            pl.BlockSpec(prep["b2"].shape, lambda i: (0, 0)),
            pl.BlockSpec(prep["w3"].shape, lambda i: (0, 0, 0)),
            pl.BlockSpec(prep["b3"].shape, lambda i: (0, 0)),
            pl.BlockSpec(prep["wf1"].shape, lambda i: (0, 0, 0)),
            pl.BlockSpec(prep["bf1"].shape, lambda i: (0, 0)),
            pl.BlockSpec(prep["wf2"].shape, lambda i: (0, 0)),
            pl.BlockSpec(prep["bf2"].shape, lambda i: (0, 0)),
        ],
        out_specs=pl.BlockSpec((None, 1, num_actions), lambda i: (i, 0, 0)),
        scratch_shapes=[
            pltpu.VMEM((oh2, oh2, prep["w2"].shape[-1]), F32),
            pltpu.VMEM((oh3, oh3, prep["w3"].shape[-1]), F32),
        ],
        compiler_params=pltpu.CompilerParams(dimension_semantics=("parallel",)),
    )(x2, prep["w2"], prep["b2"], prep["w3"], prep["b3"],
      prep["wf1"], prep["bf1"], prep["wf2"], prep["bf2"])

    return q.reshape(b, num_actions)


# ----------------------------------------------------------------------------
# Pure-JAX references.
# ----------------------------------------------------------------------------
def reference_forward_f32(params, x_nchw):
    def conv(x, w, b, s):
        y = lax.conv_general_dilated(
            x, w, (s, s), "VALID", dimension_numbers=("NCHW", "OIHW", "NCHW"))
        return jax.nn.relu(y + b[None, :, None, None])

    x = conv(x_nchw, params["conv1_w"], params["conv1_b"], 4)
    x = conv(x, params["conv2_w"], params["conv2_b"], 2)
    x = conv(x, params["conv3_w"], params["conv3_b"], 1)
    x = x.reshape(x.shape[0], -1)
    x = jax.nn.relu(x @ params["fc1_w"] + params["fc1_b"])
    return x @ params["fc2_w"] + params["fc2_b"]


def reference_forward_bf16(params, x_nchw):
    """Mirrors the kernel's dtype policy exactly: bf16 matmul operands,
    f32 accumulation, f32 bias/ReLU epilogues."""
    def conv(x, w, b, s):
        y = lax.conv_general_dilated(
            x.astype(BF16), w.astype(BF16), (s, s), "VALID",
            dimension_numbers=("NCHW", "OIHW", "NCHW"),
            preferred_element_type=F32)
        return jnp.maximum(y + b[None, :, None, None], 0.0)

    x = conv(x_nchw, params["conv1_w"], params["conv1_b"], 4)
    x = conv(x, params["conv2_w"], params["conv2_b"], 2)
    x = conv(x, params["conv3_w"], params["conv3_b"], 1)
    f = x.reshape(x.shape[0], -1)
    h = jnp.maximum(
        jnp.dot(f.astype(BF16), params["fc1_w"].astype(BF16),
                preferred_element_type=F32) + params["fc1_b"], 0.0)
    return jnp.dot(h.astype(BF16), params["fc2_w"].astype(BF16),
                   preferred_element_type=F32) + params["fc2_b"]


def init_params(key, in_channels, hidden, num_actions, conv_output_dim):
    ks = jax.random.split(key, 10)
    scale = 0.05

    def w(k, shape):
        return scale * jax.random.normal(k, shape, F32)

    return {
        "conv1_w": w(ks[0], (32, in_channels, 8, 8)),
        "conv1_b": w(ks[1], (32,)),
        "conv2_w": w(ks[2], (64, 32, 4, 4)),
        "conv2_b": w(ks[3], (64,)),
        "conv3_w": w(ks[4], (64, 64, 3, 3)),
        "conv3_b": w(ks[5], (64,)),
        "fc1_w": w(ks[6], (conv_output_dim, hidden)),
        "fc1_b": w(ks[7], (hidden,)),
        "fc2_w": w(ks[8], (hidden, num_actions)),
        "fc2_b": w(ks[9], (num_actions,)),
    }


if __name__ == "__main__":
    # 64x64x4 frames:  64 -> conv1(k8,s4) -> 15 -> conv2(k4,s2) -> 6 -> conv3(k3,s1) -> 4
    batch, in_channels, spatial = 2, 4, 64
    num_actions, hidden = 6, 128
    conv_output_dim = 64 * 4 * 4     # AtariConv.output_dim for 64x64 input

    key = jax.random.PRNGKey(0)
    k_x, k_a, k_p = jax.random.split(key, 3)
    x = jax.random.normal(k_x, (batch, in_channels, spatial, spatial), F32)
    a = jax.random.randint(k_a, (batch,), 0, num_actions)   # unused by forward
    params = init_params(k_p, in_channels, hidden, num_actions, conv_output_dim)

    prep = prepare_params(params, spatial)                   # one-time, off the hot path
    fwd = jax.jit(atari_critic_forward)
    q = jax.block_until_ready(fwd(prep, x, a))
    assert q.shape == (batch, num_actions)

    # Tight check vs. a reference with the identical dtype policy
    # (bf16 operands, f32 accumulation), and a loose sanity check vs. pure f32.
    q_bf16_ref = reference_forward_bf16(params, x)
    q_f32_ref = reference_forward_f32(params, x)
    err_bf16 = float(jnp.max(jnp.abs(q - q_bf16_ref)))
    err_f32 = float(jnp.max(jnp.abs(q - q_f32_ref)))
    assert err_bf16 < 2e-3, f"mismatch vs bf16-matmul reference: {err_bf16}"
    assert err_f32 < 1e-1, f"mismatch vs f32 reference: {err_f32}"

    print("KERNEL_OK")
</pallas_src>

<mosaic_0001>
module attributes {stable_mosaic.version = 11 : i64} {
  func.func @_conv1_kernel(%arg0: i32, %arg1: memref<1x16x16x64xf32, #tpu.memory_space<vmem>>, %arg2: memref<4x64x32xbf16, #tpu.memory_space<vmem>>, %arg3: memref<1x32xf32, #tpu.memory_space<vmem>>, %arg4: memref<1x15x15x32xf32, #tpu.memory_space<vmem>>) attributes {dimension_semantics = [#tpu.dimension_semantics<parallel>], iteration_bounds = array<i64: 2>, scalar_prefetch = 0 : i64, scratch_operands = 0 : i64, tpu.core_type = #tpu.core_type<tc>, window_params = [{transform_indices = @transform_0, window_bounds = array<i64: 1, 16, 16, 64>}, {pipeline_mode = #tpu.pipeline_mode<synchronous>, transform_indices = @transform_1, window_bounds = array<i64: 4, 64, 32>}, {pipeline_mode = #tpu.pipeline_mode<synchronous>, transform_indices = @transform_2, window_bounds = array<i64: 1, 32>}, {transform_indices = @transform_3, window_bounds = array<i64: 1, 15, 15, 32>}]} {
    %cst = arith.constant 0.000000e+00 : f32
    %0 = vector.broadcast %cst : f32 to vector<15x15x32xf32>
    %c0 = arith.constant 0 : index
    %c0_0 = arith.constant 0 : index
    %c0_1 = arith.constant 0 : index
    %c0_2 = arith.constant 0 : index
    %1 = vector.load %arg1[%c0, %c0_0, %c0_1, %c0_2] : memref<1x16x16x64xf32, #tpu.memory_space<vmem>>, vector<1x15x15x64xf32>
    %2 = vector.shape_cast %1 : vector<1x15x15x64xf32> to vector<15x15x64xf32>
    %3 = arith.truncf %2 : vector<15x15x64xf32> to vector<15x15x64xbf16>
    %c0_3 = arith.constant 0 : index
    %c0_4 = arith.constant 0 : index
    %c0_5 = arith.constant 0 : index
    %4 = vector.load %arg2[%c0_3, %c0_4, %c0_5] : memref<4x64x32xbf16, #tpu.memory_space<vmem>>, vector<1x64x32xbf16>
    %5 = vector.shape_cast %4 : vector<1x64x32xbf16> to vector<64x32xbf16>
    %6 = vector.shape_cast %5 : vector<64x32xbf16> to vector<1x64x32xbf16>
    %7 = vector.shape_cast %6 : vector<1x64x32xbf16> to vector<1x64x32xbf16>
    %8 = vector.broadcast %7 : vector<1x64x32xbf16> to vector<15x64x32xbf16>
    "tpu.trace_start"() <{level = 10 : i32, message = "hwc,hco->hwo"}> : () -> ()
    %cst_6 = arith.constant dense<0.000000e+00> : vector<15x15x32xf32>
    %9 = tpu.matmul %3, %8, %cst_6 {dimension_numbers = #tpu.dot_dimension_numbers<[2], [1], [1], [2], [0, 0, 0, 1, 1, 2], [0], [0]>} : vector<15x15x64xbf16>, vector<15x64x32xbf16>, vector<15x15x32xf32> -> vector<15x15x32xf32>
    "tpu.trace_stop"() : () -> ()
    %10 = arith.addf %0, %9 : vector<15x15x32xf32>
    %c0_7 = arith.constant 0 : index
    %c0_8 = arith.constant 0 : index
    %c1 = arith.constant 1 : index
    %c0_9 = arith.constant 0 : index
    %11 = vector.load %arg1[%c0_7, %c0_8, %c1, %c0_9] : memref<1x16x16x64xf32, #tpu.memory_space<vmem>>, vector<1x15x15x64xf32>
    %12 = vector.shape_cast %11 : vector<1x15x15x64xf32> to vector<15x15x64xf32>
    %13 = arith.truncf %12 : vector<15x15x64xf32> to vector<15x15x64xbf16>
    %c1_10 = arith.constant 1 : index
    %c0_11 = arith.constant 0 : index
    %c0_12 = arith.constant 0 : index
    %14 = vector.load %arg2[%c1_10, %c0_11, %c0_12] : memref<4x64x32xbf16, #tpu.memory_space<vmem>>, vector<1x64x32xbf16>
    %15 = vector.shape_cast %14 : vector<1x64x32xbf16> to vector<64x32xbf16>
    %16 = vector.shape_cast %15 : vector<64x32xbf16> to vector<1x64x32xbf16>
    %17 = vector.shape_cast %16 : vector<1x64x32xbf16> to vector<1x64x32xbf16>
    %18 = vector.broadcast %17 : vector<1x64x32xbf16> to vector<15x64x32xbf16>
    "tpu.trace_start"() <{level = 10 : i32, message = "hwc,hco->hwo"}> : () -> ()
    %cst_13 = arith.constant dense<0.000000e+00> : vector<15x15x32xf32>
    %19 = tpu.matmul %13, %18, %cst_13 {dimension_numbers = #tpu.dot_dimension_numbers<[2], [1], [1], [2], [0, 0, 0, 1, 1, 2], [0], [0]>} : vector<15x15x64xbf16>, vector<15x64x32xbf16>, vector<15x15x32xf32> -> vector<15x15x32xf32>
    "tpu.trace_stop"() : () -> ()
    %20 = arith.addf %10, %19 : vector<15x15x32xf32>
    %c0_14 = arith.constant 0 : index
    %c1_15 = arith.constant 1 : index
    %c0_16 = arith.constant 0 : index
    %c0_17 = arith.constant 0 : index
    %21 = vector.load %arg1[%c0_14, %c1_15, %c0_16, %c0_17] : memref<1x16x16x64xf32, #tpu.memory_space<vmem>>, vector<1x15x15x64xf32>
    %22 = vector.shape_cast %21 : vector<1x15x15x64xf32> to vector<15x15x64xf32>
    %23 = arith.truncf %22 : vector<15x15x64xf32> to vector<15x15x64xbf16>
    %c2 = arith.constant 2 : index
    %c0_18 = arith.constant 0 : index
    %c0_19 = arith.constant 0 : index
    %24 = vector.load %arg2[%c2, %c0_18, %c0_19] : memref<4x64x32xbf16, #tpu.memory_space<vmem>>, vector<1x64x32xbf16>
    %25 = vector.shape_cast %24 : vector<1x64x32xbf16> to vector<64x32xbf16>
    %26 = vector.shape_cast %25 : vector<64x32xbf16> to vector<1x64x32xbf16>
    %27 = vector.shape_cast %26 : vector<1x64x32xbf16> to vector<1x64x32xbf16>
    %28 = vector.broadcast %27 : vector<1x64x32xbf16> to vector<15x64x32xbf16>
    "tpu.trace_start"() <{level = 10 : i32, message = "hwc,hco->hwo"}> : () -> ()
    %cst_20 = arith.constant dense<0.000000e+00> : vector<15x15x32xf32>
    %29 = tpu.matmul %23, %28, %cst_20 {dimension_numbers = #tpu.dot_dimension_numbers<[2], [1], [1], [2], [0, 0, 0, 1, 1, 2], [0], [0]>} : vector<15x15x64xbf16>, vector<15x64x32xbf16>, vector<15x15x32xf32> -> vector<15x15x32xf32>
    "tpu.trace_stop"() : () -> ()
    %30 = arith.addf %20, %29 : vector<15x15x32xf32>
    %c0_21 = arith.constant 0 : index
    %c1_22 = arith.constant 1 : index
    %c1_23 = arith.constant 1 : index
    %c0_24 = arith.constant 0 : index
    %31 = vector.load %arg1[%c0_21, %c1_22, %c1_23, %c0_24] : memref<1x16x16x64xf32, #tpu.memory_space<vmem>>, vector<1x15x15x64xf32>
    %32 = vector.shape_cast %31 : vector<1x15x15x64xf32> to vector<15x15x64xf32>
    %33 = arith.truncf %32 : vector<15x15x64xf32> to vector<15x15x64xbf16>
    %c3 = arith.constant 3 : index
    %c0_25 = arith.constant 0 : index
    %c0_26 = arith.constant 0 : index
    %34 = vector.load %arg2[%c3, %c0_25, %c0_26] : memref<4x64x32xbf16, #tpu.memory_space<vmem>>, vector<1x64x32xbf16>
    %35 = vector.shape_cast %34 : vector<1x64x32xbf16> to vector<64x32xbf16>
    %36 = vector.shape_cast %35 : vector<64x32xbf16> to vector<1x64x32xbf16>
    %37 = vector.shape_cast %36 : vector<1x64x32xbf16> to vector<1x64x32xbf16>
    %38 = vector.broadcast %37 : vector<1x64x32xbf16> to vector<15x64x32xbf16>
    "tpu.trace_start"() <{level = 10 : i32, message = "hwc,hco->hwo"}> : () -> ()
    %cst_27 = arith.constant dense<0.000000e+00> : vector<15x15x32xf32>
    %39 = tpu.matmul %33, %38, %cst_27 {dimension_numbers = #tpu.dot_dimension_numbers<[2], [1], [1], [2], [0, 0, 0, 1, 1, 2], [0], [0]>} : vector<15x15x64xbf16>, vector<15x64x32xbf16>, vector<15x15x32xf32> -> vector<15x15x32xf32>
    "tpu.trace_stop"() : () -> ()
    %40 = arith.addf %30, %39 : vector<15x15x32xf32>
    %c0_28 = arith.constant 0 : index
    %c0_29 = arith.constant 0 : index
    %41 = vector.load %arg3[%c0_28, %c0_29] : memref<1x32xf32, #tpu.memory_space<vmem>>, vector<1x32xf32>
    %42 = vector.shape_cast %41 : vector<1x32xf32> to vector<1x1x32xf32>
    %43 = vector.broadcast %42 : vector<1x1x32xf32> to vector<15x15x32xf32>
    %44 = arith.addf %40, %43 : vector<15x15x32xf32>
    %cst_30 = arith.constant 0.000000e+00 : f32
    %45 = vector.broadcast %cst_30 : f32 to vector<15x15x32xf32>
    %46 = arith.maximumf %44, %45 : vector<15x15x32xf32>
    %c0_31 = arith.constant 0 : index
    %c0_32 = arith.constant 0 : index
    %c0_33 = arith.constant 0 : index
    %c0_34 = arith.constant 0 : index
    %47 = vector.load %arg4[%c0_31, %c0_32, %c0_33, %c0_34] : memref<1x15x15x32xf32, #tpu.memory_space<vmem>>, vector<1x15x15x32xf32>
    %48 = vector.shape_cast %47 : vector<1x15x15x32xf32> to vector<15x15x32xf32>
    %49 = vector.shape_cast %46 : vector<15x15x32xf32> to vector<1x15x15x32xf32>
    tpu.vector_store %arg4[%c0_31, %c0_32, %c0_33, %c0_34], %49 {strides = array<i32>} : memref<1x15x15x32xf32, #tpu.memory_space<vmem>>, vector<1x15x15x32xf32>,
    return
  }
  func.func @transform_0(%arg0: i32) -> (i32, i32, i32, i32) {
    %c0_i32 = arith.constant 0 : i32
    %c0_i32_0 = arith.constant 0 : i32
    %c0_i32_1 = arith.constant 0 : i32
    %c0_i32_2 = arith.constant 0 : i32
    return %arg0, %c0_i32, %c0_i32_0, %c0_i32_1 : i32, i32, i32, i32
  }
  func.func @transform_1(%arg0: i32) -> (i32, i32, i32) {
    %c0_i32 = arith.constant 0 : i32
    %c0_i32_0 = arith.constant 0 : i32
    %c0_i32_1 = arith.constant 0 : i32
    %c0_i32_2 = arith.constant 0 : i32
    return %c0_i32, %c0_i32_0, %c0_i32_1 : i32, i32, i32
  }
  func.func @transform_2(%arg0: i32) -> (i32, i32) {
    %c0_i32 = arith.constant 0 : i32
    %c0_i32_0 = arith.constant 0 : i32
    %c0_i32_1 = arith.constant 0 : i32
    return %c0_i32, %c0_i32_0 : i32, i32
  }
  func.func @transform_3(%arg0: i32) -> (i32, i32, i32, i32) {
    %c0_i32 = arith.constant 0 : i32
    %c0_i32_0 = arith.constant 0 : i32
    %c0_i32_1 = arith.constant 0 : i32
    %c0_i32_2 = arith.constant 0 : i32
    return %arg0, %c0_i32, %c0_i32_0, %c0_i32_1 : i32, i32, i32, i32
  }
}

module attributes {stable_mosaic.version = 11 : i64} {
  func.func @_tail_kernel(%arg0: i32, %arg1: memref<1x7x7x128xf32, #tpu.memory_space<vmem>>, %arg2: memref<4x128x64xbf16, #tpu.memory_space<vmem>>, %arg3: memref<1x64xf32, #tpu.memory_space<vmem>>, %arg4: memref<9x64x64xbf16, #tpu.memory_space<vmem>>, %arg5: memref<1x64xf32, #tpu.memory_space<vmem>>, %arg6: memref<16x64x128xbf16, #tpu.memory_space<vmem>>, %arg7: memref<1x128xf32, #tpu.memory_space<vmem>>, %arg8: memref<128x6xbf16, #tpu.memory_space<vmem>>, %arg9: memref<1x6xf32, #tpu.memory_space<vmem>>, %arg10: memref<1x1x6xf32, #tpu.memory_space<vmem>>, %arg11: memref<6x6x64xf32, #tpu.memory_space<vmem>>, %arg12: memref<4x4x64xf32, #tpu.memory_space<vmem>>) attributes {dimension_semantics = [#tpu.dimension_semantics<parallel>], iteration_bounds = array<i64: 2>, scalar_prefetch = 0 : i64, scratch_operands = 2 : i64, tpu.core_type = #tpu.core_type<tc>, window_params = [{transform_indices = @transform_0, window_bounds = array<i64: 1, 7, 7, 128>}, {pipeline_mode = #tpu.pipeline_mode<synchronous>, transform_indices = @transform_1, window_bounds = array<i64: 4, 128, 64>}, {pipeline_mode = #tpu.pipeline_mode<synchronous>, transform_indices = @transform_2, window_bounds = array<i64: 1, 64>}, {pipeline_mode = #tpu.pipeline_mode<synchronous>, transform_indices = @transform_3, window_bounds = array<i64: 9, 64, 64>}, {pipeline_mode = #tpu.pipeline_mode<synchronous>, transform_indices = @transform_4, window_bounds = array<i64: 1, 64>}, {pipeline_mode = #tpu.pipeline_mode<synchronous>, transform_indices = @transform_5, window_bounds = array<i64: 16, 64, 128>}, {pipeline_mode = #tpu.pipeline_mode<synchronous>, transform_indices = @transform_6, window_bounds = array<i64: 1, 128>}, {pipeline_mode = #tpu.pipeline_mode<synchronous>, transform_indices = @transform_7, window_bounds = array<i64: 128, 6>}, {pipeline_mode = #tpu.pipeline_mode<synchronous>, transform_indices = @transform_8, window_bounds = array<i64: 1, 6>}, {transform_indices = @transform_9, window_bounds = array<i64: 1, 1, 6>}]} {
    %cst = arith.constant 0.000000e+00 : f32
    %0 = vector.broadcast %cst : f32 to vector<6x6x64xf32>
    %c0 = arith.constant 0 : index
    %c0_0 = arith.constant 0 : index
    %c0_1 = arith.constant 0 : index
    %c0_2 = arith.constant 0 : index
    %1 = vector.load %arg1[%c0, %c0_0, %c0_1, %c0_2] : memref<1x7x7x128xf32, #tpu.memory_space<vmem>>, vector<1x6x6x128xf32>
    %2 = vector.shape_cast %1 : vector<1x6x6x128xf32> to vector<6x6x128xf32>
    %3 = arith.truncf %2 : vector<6x6x128xf32> to vector<6x6x128xbf16>
    %c0_3 = arith.constant 0 : index
    %c0_4 = arith.constant 0 : index
    %c0_5 = arith.constant 0 : index
    %4 = vector.load %arg2[%c0_3, %c0_4, %c0_5] : memref<4x128x64xbf16, #tpu.memory_space<vmem>>, vector<1x128x64xbf16>
    %5 = vector.shape_cast %4 : vector<1x128x64xbf16> to vector<128x64xbf16>
    %6 = vector.shape_cast %5 : vector<128x64xbf16> to vector<1x128x64xbf16>
    %7 = vector.shape_cast %6 : vector<1x128x64xbf16> to vector<1x128x64xbf16>
    %8 = vector.broadcast %7 : vector<1x128x64xbf16> to vector<6x128x64xbf16>
    "tpu.trace_start"() <{level = 10 : i32, message = "hwc,hco->hwo"}> : () -> ()
    %cst_6 = arith.constant dense<0.000000e+00> : vector<6x6x64xf32>
    %9 = tpu.matmul %3, %8, %cst_6 {dimension_numbers = #tpu.dot_dimension_numbers<[2], [1], [1], [2], [0, 0, 0, 1, 1, 2], [0], [0]>} : vector<6x6x128xbf16>, vector<6x128x64xbf16>, vector<6x6x64xf32> -> vector<6x6x64xf32>
    "tpu.trace_stop"() : () -> ()
    %10 = arith.addf %0, %9 : vector<6x6x64xf32>
    %c0_7 = arith.constant 0 : index
    %c0_8 = arith.constant 0 : index
    %c1 = arith.constant 1 : index
    %c0_9 = arith.constant 0 : index
    %11 = vector.load %arg1[%c0_7, %c0_8, %c1, %c0_9] : memref<1x7x7x128xf32, #tpu.memory_space<vmem>>, vector<1x6x6x128xf32>
    %12 = vector.shape_cast %11 : vector<1x6x6x128xf32> to vector<6x6x128xf32>
    %13 = arith.truncf %12 : vector<6x6x128xf32> to vector<6x6x128xbf16>
    %c1_10 = arith.constant 1 : index
    %c0_11 = arith.constant 0 : index
    %c0_12 = arith.constant 0 : index
    %14 = vector.load %arg2[%c1_10, %c0_11, %c0_12] : memref<4x128x64xbf16, #tpu.memory_space<vmem>>, vector<1x128x64xbf16>
    %15 = vector.shape_cast %14 : vector<1x128x64xbf16> to vector<128x64xbf16>
    %16 = vector.shape_cast %15 : vector<128x64xbf16> to vector<1x128x64xbf16>
    %17 = vector.shape_cast %16 : vector<1x128x64xbf16> to vector<1x128x64xbf16>
    %18 = vector.broadcast %17 : vector<1x128x64xbf16> to vector<6x128x64xbf16>
    "tpu.trace_start"() <{level = 10 : i32, message = "hwc,hco->hwo"}> : () -> ()
    %cst_13 = arith.constant dense<0.000000e+00> : vector<6x6x64xf32>
    %19 = tpu.matmul %13, %18, %cst_13 {dimension_numbers = #tpu.dot_dimension_numbers<[2], [1], [1], [2], [0, 0, 0, 1, 1, 2], [0], [0]>} : vector<6x6x128xbf16>, vector<6x128x64xbf16>, vector<6x6x64xf32> -> vector<6x6x64xf32>
    "tpu.trace_stop"() : () -> ()
    %20 = arith.addf %10, %19 : vector<6x6x64xf32>
    %c0_14 = arith.constant 0 : index
    %c1_15 = arith.constant 1 : index
    %c0_16 = arith.constant 0 : index
    %c0_17 = arith.constant 0 : index
    %21 = vector.load %arg1[%c0_14, %c1_15, %c0_16, %c0_17] : memref<1x7x7x128xf32, #tpu.memory_space<vmem>>, vector<1x6x6x128xf32>
    %22 = vector.shape_cast %21 : vector<1x6x6x128xf32> to vector<6x6x128xf32>
    %23 = arith.truncf %22 : vector<6x6x128xf32> to vector<6x6x128xbf16>
    %c2 = arith.constant 2 : index
    %c0_18 = arith.constant 0 : index
    %c0_19 = arith.constant 0 : index
    %24 = vector.load %arg2[%c2, %c0_18, %c0_19] : memref<4x128x64xbf16, #tpu.memory_space<vmem>>, vector<1x128x64xbf16>
    %25 = vector.shape_cast %24 : vector<1x128x64xbf16> to vector<128x64xbf16>
    %26 = vector.shape_cast %25 : vector<128x64xbf16> to vector<1x128x64xbf16>
    %27 = vector.shape_cast %26 : vector<1x128x64xbf16> to vector<1x128x64xbf16>
    %28 = vector.broadcast %27 : vector<1x128x64xbf16> to vector<6x128x64xbf16>
    "tpu.trace_start"() <{level = 10 : i32, message = "hwc,hco->hwo"}> : () -> ()
    %cst_20 = arith.constant dense<0.000000e+00> : vector<6x6x64xf32>
    %29 = tpu.matmul %23, %28, %cst_20 {dimension_numbers = #tpu.dot_dimension_numbers<[2], [1], [1], [2], [0, 0, 0, 1, 1, 2], [0], [0]>} : vector<6x6x128xbf16>, vector<6x128x64xbf16>, vector<6x6x64xf32> -> vector<6x6x64xf32>
    "tpu.trace_stop"() : () -> ()
    %30 = arith.addf %20, %29 : vector<6x6x64xf32>
    %c0_21 = arith.constant 0 : index
    %c1_22 = arith.constant 1 : index
    %c1_23 = arith.constant 1 : index
    %c0_24 = arith.constant 0 : index
    %31 = vector.load %arg1[%c0_21, %c1_22, %c1_23, %c0_24] : memref<1x7x7x128xf32, #tpu.memory_space<vmem>>, vector<1x6x6x128xf32>
    %32 = vector.shape_cast %31 : vector<1x6x6x128xf32> to vector<6x6x128xf32>
    %33 = arith.truncf %32 : vector<6x6x128xf32> to vector<6x6x128xbf16>
    %c3 = arith.constant 3 : index
    %c0_25 = arith.constant 0 : index
    %c0_26 = arith.constant 0 : index
    %34 = vector.load %arg2[%c3, %c0_25, %c0_26] : memref<4x128x64xbf16, #tpu.memory_space<vmem>>, vector<1x128x64xbf16>
    %35 = vector.shape_cast %34 : vector<1x128x64xbf16> to vector<128x64xbf16>
    %36 = vector.shape_cast %35 : vector<128x64xbf16> to vector<1x128x64xbf16>
    %37 = vector.shape_cast %36 : vector<1x128x64xbf16> to vector<1x128x64xbf16>
    %38 = vector.broadcast %37 : vector<1x128x64xbf16> to vector<6x128x64xbf16>
    "tpu.trace_start"() <{level = 10 : i32, message = "hwc,hco->hwo"}> : () -> ()
    %cst_27 = arith.constant dense<0.000000e+00> : vector<6x6x64xf32>
    %39 = tpu.matmul %33, %38, %cst_27 {dimension_numbers = #tpu.dot_dimension_numbers<[2], [1], [1], [2], [0, 0, 0, 1, 1, 2], [0], [0]>} : vector<6x6x128xbf16>, vector<6x128x64xbf16>, vector<6x6x64xf32> -> vector<6x6x64xf32>
    "tpu.trace_stop"() : () -> ()
    %40 = arith.addf %30, %39 : vector<6x6x64xf32>
    %c0_28 = arith.constant 0 : index
    %c0_29 = arith.constant 0 : index
    %41 = vector.load %arg3[%c0_28, %c0_29] : memref<1x64xf32, #tpu.memory_space<vmem>>, vector<1x64xf32>
    %42 = vector.shape_cast %41 : vector<1x64xf32> to vector<1x1x64xf32>
    %43 = vector.broadcast %42 : vector<1x1x64xf32> to vector<6x6x64xf32>
    %44 = arith.addf %40, %43 : vector<6x6x64xf32>
    %cst_30 = arith.constant 0.000000e+00 : f32
    %45 = vector.broadcast %cst_30 : f32 to vector<6x6x64xf32>
    %46 = arith.maximumf %44, %45 : vector<6x6x64xf32>
    %c0_31 = arith.constant 0 : index
    %c0_32 = arith.constant 0 : index
    %c0_33 = arith.constant 0 : index
    %47 = vector.load %arg11[%c0_31, %c0_32, %c0_33] : memref<6x6x64xf32, #tpu.memory_space<vmem>>, vector<6x6x64xf32>
    tpu.vector_store %arg11[%c0_31, %c0_32, %c0_33], %46 {strides = array<i32>} : memref<6x6x64xf32, #tpu.memory_space<vmem>>, vector<6x6x64xf32>,
    %cst_34 = arith.constant 0.000000e+00 : f32
    %48 = vector.broadcast %cst_34 : f32 to vector<4x4x64xf32>
    %c0_35 = arith.constant 0 : index
    %c0_36 = arith.constant 0 : index
    %c0_37 = arith.constant 0 : index
    %49 = vector.load %arg11[%c0_35, %c0_36, %c0_37] : memref<6x6x64xf32, #tpu.memory_space<vmem>>, vector<4x4x64xf32>
    %50 = arith.truncf %49 : vector<4x4x64xf32> to vector<4x4x64xbf16>
    %c0_38 = arith.constant 0 : index
    %c0_39 = arith.constant 0 : index
    %c0_40 = arith.constant 0 : index
    %51 = vector.load %arg4[%c0_38, %c0_39, %c0_40] : memref<9x64x64xbf16, #tpu.memory_space<vmem>>, vector<1x64x64xbf16>
    %52 = vector.shape_cast %51 : vector<1x64x64xbf16> to vector<64x64xbf16>
    %53 = vector.shape_cast %52 : vector<64x64xbf16> to vector<1x64x64xbf16>
    %54 = vector.shape_cast %53 : vector<1x64x64xbf16> to vector<1x64x64xbf16>
    %55 = vector.broadcast %54 : vector<1x64x64xbf16> to vector<4x64x64xbf16>
    "tpu.trace_start"() <{level = 10 : i32, message = "hwc,hco->hwo"}> : () -> ()
    %cst_41 = arith.constant dense<0.000000e+00> : vector<4x4x64xf32>
    %56 = tpu.matmul %50, %55, %cst_41 {dimension_numbers = #tpu.dot_dimension_numbers<[2], [1], [1], [2], [0, 0, 0, 1, 1, 2], [0], [0]>} : vector<4x4x64xbf16>, vector<4x64x64xbf16>, vector<4x4x64xf32> -> vector<4x4x64xf32>
    "tpu.trace_stop"() : () -> ()
    %57 = arith.addf %48, %56 : vector<4x4x64xf32>
    %c0_42 = arith.constant 0 : index
    %c1_43 = arith.constant 1 : index
    %c0_44 = arith.constant 0 : index
    %58 = vector.load %arg11[%c0_42, %c1_43, %c0_44] : memref<6x6x64xf32, #tpu.memory_space<vmem>>, vector<4x4x64xf32>
    %59 = arith.truncf %58 : vector<4x4x64xf32> to vector<4x4x64xbf16>
    %c1_45 = arith.constant 1 : index
    %c0_46 = arith.constant 0 : index
    %c0_47 = arith.constant 0 : index
    %60 = vector.load %arg4[%c1_45, %c0_46, %c0_47] : memref<9x64x64xbf16, #tpu.memory_space<vmem>>, vector<1x64x64xbf16>
    %61 = vector.shape_cast %60 : vector<1x64x64xbf16> to vector<64x64xbf16>
    %62 = vector.shape_cast %61 : vector<64x64xbf16> to vector<1x64x64xbf16>
    %63 = vector.shape_cast %62 : vector<1x64x64xbf16> to vector<1x64x64xbf16>
    %64 = vector.broadcast %63 : vector<1x64x64xbf16> to vector<4x64x64xbf16>
    "tpu.trace_start"() <{level = 10 : i32, message = "hwc,hco->hwo"}> : () -> ()
    %cst_48 = arith.constant dense<0.000000e+00> : vector<4x4x64xf32>
    %65 = tpu.matmul %59, %64, %cst_48 {dimension_numbers = #tpu.dot_dimension_numbers<[2], [1], [1], [2], [0, 0, 0, 1, 1, 2], [0], [0]>} : vector<4x4x64xbf16>, vector<4x64x64xbf16>, vector<4x4x64xf32> -> vector<4x4x64xf32>
    "tpu.trace_stop"() : () -> ()
    %66 = arith.addf %57, %65 : vector<4x4x64xf32>
    %c0_49 = arith.constant 0 : index
    %c2_50 = arith.constant 2 : index
    %c0_51 = arith.constant 0 : index
    %67 = vector.load %arg11[%c0_49, %c2_50, %c0_51] : memref<6x6x64xf32, #tpu.memory_space<vmem>>, vector<4x4x64xf32>
    %68 = arith.truncf %67 : vector<4x4x64xf32> to vector<4x4x64xbf16>
    %c2_52 = arith.constant 2 : index
    %c0_53 = arith.constant 0 : index
    %c0_54 = arith.constant 0 : index
    %69 = vector.load %arg4[%c2_52, %c0_53, %c0_54] : memref<9x64x64xbf16, #tpu.memory_space<vmem>>, vector<1x64x64xbf16>
    %70 = vector.shape_cast %69 : vector<1x64x64xbf16> to vector<64x64xbf16>
    %71 = vector.shape_cast %70 : vector<64x64xbf16> to vector<1x64x64xbf16>
    %72 = vector.shape_cast %71 : vector<1x64x64xbf16> to vector<1x64x64xbf16>
    %73 = vector.broadcast %72 : vector<1x64x64xbf16> to vector<4x64x64xbf16>
    "tpu.trace_start"() <{level = 10 : i32, message = "hwc,hco->hwo"}> : () -> ()
    %cst_55 = arith.constant dense<0.000000e+00> : vector<4x4x64xf32>
    %74 = tpu.matmul %68, %73, %cst_55 {dimension_numbers = #tpu.dot_dimension_numbers<[2], [1], [1], [2], [0, 0, 0, 1, 1, 2], [0], [0]>} : vector<4x4x64xbf16>, vector<4x64x64xbf16>, vector<4x4x64xf32> -> vector<4x4x64xf32>
    "tpu.trace_stop"() : () -> ()
    %75 = arith.addf %66, %74 : vector<4x4x64xf32>
    %c1_56 = arith.constant 1 : index
    %c0_57 = arith.constant 0 : index
    %c0_58 = arith.constant 0 : index
    %76 = vector.load %arg11[%c1_56, %c0_57, %c0_58] : memref<6x6x64xf32, #tpu.memory_space<vmem>>, vector<4x4x64xf32>
    %77 = arith.truncf %76 : vector<4x4x64xf32> to vector<4x4x64xbf16>
    %c3_59 = arith.constant 3 : index
    %c0_60 = arith.constant 0 : index
    %c0_61 = arith.constant 0 : index
    %78 = vector.load %arg4[%c3_59, %c0_60, %c0_61] : memref<9x64x64xbf16, #tpu.memory_space<vmem>>, vector<1x64x64xbf16>
    %79 = vector.shape_cast %78 : vector<1x64x64xbf16> to vector<64x64xbf16>
    %80 = vector.shape_cast %79 : vector<64x64xbf16> to vector<1x64x64xbf16>
    %81 = vector.shape_cast %80 : vector<1x64x64xbf16> to vector<1x64x64xbf16>
    %82 = vector.broadcast %81 : vector<1x64x64xbf16> to vector<4x64x64xbf16>
    "tpu.trace_start"() <{level = 10 : i32, message = "hwc,hco->hwo"}> : () -> ()
    %cst_62 = arith.constant dense<0.000000e+00> : vector<4x4x64xf32>
    %83 = tpu.matmul %77, %82, %cst_62 {dimension_numbers = #tpu.dot_dimension_numbers<[2], [1], [1], [2], [0, 0, 0, 1, 1, 2], [0], [0]>} : vector<4x4x64xbf16>, vector<4x64x64xbf16>, vector<4x4x64xf32> -> vector<4x4x64xf32>
    "tpu.trace_stop"() : () -> ()
    %84 = arith.addf %75, %83 : vector<4x4x64xf32>
    %c1_63 = arith.constant 1 : index
    %c1_64 = arith.constant 1 : index
    %c0_65 = arith.constant 0 : index
    %85 = vector.load %arg11[%c1_63, %c1_64, %c0_65] : memref<6x6x64xf32, #tpu.memory_space<vmem>>, vector<4x4x64xf32>
    %86 = arith.truncf %85 : vector<4x4x64xf32> to vector<4x4x64xbf16>
    %c4 = arith.constant 4 : index
    %c0_66 = arith.constant 0 : index
    %c0_67 = arith.constant 0 : index
    %87 = vector.load %arg4[%c4, %c0_66, %c0_67] : memref<9x64x64xbf16, #tpu.memory_space<vmem>>, vector<1x64x64xbf16>
    %88 = vector.shape_cast %87 : vector<1x64x64xbf16> to vector<64x64xbf16>
    %89 = vector.shape_cast %88 : vector<64x64xbf16> to vector<1x64x64xbf16>
    %90 = vector.shape_cast %89 : vector<1x64x64xbf16> to vector<1x64x64xbf16>
    %91 = vector.broadcast %90 : vector<1x64x64xbf16> to vector<4x64x64xbf16>
    "tpu.trace_start"() <{level = 10 : i32, message = "hwc,hco->hwo"}> : () -> ()
    %cst_68 = arith.constant dense<0.000000e+00> : vector<4x4x64xf32>
    %92 = tpu.matmul %86, %91, %cst_68 {dimension_numbers = #tpu.dot_dimension_numbers<[2], [1], [1], [2], [0, 0, 0, 1, 1, 2], [0], [0]>} : vector<4x4x64xbf16>, vector<4x64x64xbf16>, vector<4x4x64xf32> -> vector<4x4x64xf32>
    "tpu.trace_stop"() : () -> ()
    %93 = arith.addf %84, %92 : vector<4x4x64xf32>
    %c1_69 = arith.constant 1 : index
    %c2_70 = arith.constant 2 : index
    %c0_71 = arith.constant 0 : index
    %94 = vector.load %arg11[%c1_69, %c2_70, %c0_71] : memref<6x6x64xf32, #tpu.memory_space<vmem>>, vector<4x4x64xf32>
    %95 = arith.truncf %94 : vector<4x4x64xf32> to vector<4x4x64xbf16>
    %c5 = arith.constant 5 : index
    %c0_72 = arith.constant 0 : index
    %c0_73 = arith.constant 0 : index
    %96 = vector.load %arg4[%c5, %c0_72, %c0_73] : memref<9x64x64xbf16, #tpu.memory_space<vmem>>, vector<1x64x64xbf16>
    %97 = vector.shape_cast %96 : vector<1x64x64xbf16> to vector<64x64xbf16>
    %98 = vector.shape_cast %97 : vector<64x64xbf16> to vector<1x64x64xbf16>
    %99 = vector.shape_cast %98 : vector<1x64x64xbf16> to vector<1x64x64xbf16>
    %100 = vector.broadcast %99 : vector<1x64x64xbf16> to vector<4x64x64xbf16>
    "tpu.trace_start"() <{level = 10 : i32, message = "hwc,hco->hwo"}> : () -> ()
    %cst_74 = arith.constant dense<0.000000e+00> : vector<4x4x64xf32>
    %101 = tpu.matmul %95, %100, %cst_74 {dimension_numbers = #tpu.dot_dimension_numbers<[2], [1], [1], [2], [0, 0, 0, 1, 1, 2], [0], [0]>} : vector<4x4x64xbf16>, vector<4x64x64xbf16>, vector<4x4x64xf32> -> vector<4x4x64xf32>
    "tpu.trace_stop"() : () -> ()
    %102 = arith.addf %93, %101 : vector<4x4x64xf32>
    %c2_75 = arith.constant 2 : index
    %c0_76 = arith.constant 0 : index
    %c0_77 = arith.constant 0 : index
    %103 = vector.load %arg11[%c2_75, %c0_76, %c0_77] : memref<6x6x64xf32, #tpu.memory_space<vmem>>, vector<4x4x64xf32>
    %104 = arith.truncf %103 : vector<4x4x64xf32> to vector<4x4x64xbf16>
    %c6 = arith.constant 6 : index
    %c0_78 = arith.constant 0 : index
    %c0_79 = arith.constant 0 : index
    %105 = vector.load %arg4[%c6, %c0_78, %c0_79] : memref<9x64x64xbf16, #tpu.memory_space<vmem>>, vector<1x64x64xbf16>
    %106 = vector.shape_cast %105 : vector<1x64x64xbf16> to vector<64x64xbf16>
    %107 = vector.shape_cast %106 : vector<64x64xbf16> to vector<1x64x64xbf16>
    %108 = vector.shape_cast %107 : vector<1x64x64xbf16> to vector<1x64x64xbf16>
    %109 = vector.broadcast %108 : vector<1x64x64xbf16> to vector<4x64x64xbf16>
    "tpu.trace_start"() <{level = 10 : i32, message = "hwc,hco->hwo"}> : () -> ()
    %cst_80 = arith.constant dense<0.000000e+00> : vector<4x4x64xf32>
    %110 = tpu.matmul %104, %109, %cst_80 {dimension_numbers = #tpu.dot_dimension_numbers<[2], [1], [1], [2], [0, 0, 0, 1, 1, 2], [0], [0]>} : vector<4x4x64xbf16>, vector<4x64x64xbf16>, vector<4x4x64xf32> -> vector<4x4x64xf32>
    "tpu.trace_stop"() : () -> ()
    %111 = arith.addf %102, %110 : vector<4x4x64xf32>
    %c2_81 = arith.constant 2 : index
    %c1_82 = arith.constant 1 : index
    %c0_83 = arith.constant 0 : index
    %112 = vector.load %arg11[%c2_81, %c1_82, %c0_83] : memref<6x6x64xf32, #tpu.memory_space<vmem>>, vector<4x4x64xf32>
    %113 = arith.truncf %112 : vector<4x4x64xf32> to vector<4x4x64xbf16>
    %c7 = arith.constant 7 : index
    %c0_84 = arith.constant 0 : index
    %c0_85 = arith.constant 0 : index
    %114 = vector.load %arg4[%c7, %c0_84, %c0_85] : memref<9x64x64xbf16, #tpu.memory_space<vmem>>, vector<1x64x64xbf16>
    %115 = vector.shape_cast %114 : vector<1x64x64xbf16> to vector<64x64xbf16>
    %116 = vector.shape_cast %115 : vector<64x64xbf16> to vector<1x64x64xbf16>
    %117 = vector.shape_cast %116 : vector<1x64x64xbf16> to vector<1x64x64xbf16>
    %118 = vector.broadcast %117 : vector<1x64x64xbf16> to vector<4x64x64xbf16>
    "tpu.trace_start"() <{level = 10 : i32, message = "hwc,hco->hwo"}> : () -> ()
    %cst_86 = arith.constant dense<0.000000e+00> : vector<4x4x64xf32>
    %119 = tpu.matmul %113, %118, %cst_86 {dimension_numbers = #tpu.dot_dimension_numbers<[2], [1], [1], [2], [0, 0, 0, 1, 1, 2], [0], [0]>} : vector<4x4x64xbf16>, vector<4x64x64xbf16>, vector<4x4x64xf32> -> vector<4x4x64xf32>
    "tpu.trace_stop"() : () -> ()
    %120 = arith.addf %111, %119 : vector<4x4x64xf32>
    %c2_87 = arith.constant 2 : index
    %c2_88 = arith.constant 2 : index
    %c0_89 = arith.constant 0 : index
    %121 = vector.load %arg11[%c2_87, %c2_88, %c0_89] : memref<6x6x64xf32, #tpu.memory_space<vmem>>, vector<4x4x64xf32>
    %122 = arith.truncf %121 : vector<4x4x64xf32> to vector<4x4x64xbf16>
    %c8 = arith.constant 8 : index
    %c0_90 = arith.constant 0 : index
    %c0_91 = arith.constant 0 : index
    %123 = vector.load %arg4[%c8, %c0_90, %c0_91] : memref<9x64x64xbf16, #tpu.memory_space<vmem>>, vector<1x64x64xbf16>
    %124 = vector.shape_cast %123 : vector<1x64x64xbf16> to vector<64x64xbf16>
    %125 = vector.shape_cast %124 : vector<64x64xbf16> to vector<1x64x64xbf16>
    %126 = vector.shape_cast %125 : vector<1x64x64xbf16> to vector<1x64x64xbf16>
    %127 = vector.broadcast %126 : vector<1x64x64xbf16> to vector<4x64x64xbf16>
    "tpu.trace_start"() <{level = 10 : i32, message = "hwc,hco->hwo"}> : () -> ()
    %cst_92 = arith.constant dense<0.000000e+00> : vector<4x4x64xf32>
    %128 = tpu.matmul %122, %127, %cst_92 {dimension_numbers = #tpu.dot_dimension_numbers<[2], [1], [1], [2], [0, 0, 0, 1, 1, 2], [0], [0]>} : vector<4x4x64xbf16>, vector<4x64x64xbf16>, vector<4x4x64xf32> -> vector<4x4x64xf32>
    "tpu.trace_stop"() : () -> ()
    %129 = arith.addf %120, %128 : vector<4x4x64xf32>
    %c0_93 = arith.constant 0 : index
    %c0_94 = arith.constant 0 : index
    %130 = vector.load %arg5[%c0_93, %c0_94] : memref<1x64xf32, #tpu.memory_space<vmem>>, vector<1x64xf32>
    %131 = vector.shape_cast %130 : vector<1x64xf32> to vector<1x1x64xf32>
    %132 = vector.broadcast %131 : vector<1x1x64xf32> to vector<4x4x64xf32>
    %133 = arith.addf %129, %132 : vector<4x4x64xf32>
    %cst_95 = arith.constant 0.000000e+00 : f32
    %134 = vector.broadcast %cst_95 : f32 to vector<4x4x64xf32>
    %135 = arith.maximumf %133, %134 : vector<4x4x64xf32>
    %c0_96 = arith.constant 0 : index
    %c0_97 = arith.constant 0 : index
    %c0_98 = arith.constant 0 : index
    %136 = vector.load %arg12[%c0_96, %c0_97, %c0_98] : memref<4x4x64xf32, #tpu.memory_space<vmem>>, vector<4x4x64xf32>
    tpu.vector_store %arg12[%c0_96, %c0_97, %c0_98], %135 {strides = array<i32>} : memref<4x4x64xf32, #tpu.memory_space<vmem>>, vector<4x4x64xf32>,
    %cst_99 = arith.constant 0.000000e+00 : f32
    %137 = vector.broadcast %cst_99 : f32 to vector<1x128xf32>
    %c0_100 = arith.constant 0 : index
    %c0_101 = arith.constant 0 : index
    %c0_102 = arith.constant 0 : index
    %138 = vector.load %arg12[%c0_100, %c0_101, %c0_102] : memref<4x4x64xf32, #tpu.memory_space<vmem>>, vector<1x1x64xf32>
    %139 = vector.shape_cast %138 : vector<1x1x64xf32> to vector<1x64xf32>
    %140 = arith.truncf %139 : vector<1x64xf32> to vector<1x64xbf16>
    %c0_103 = arith.constant 0 : index
    %c0_104 = arith.constant 0 : index
    %c0_105 = arith.constant 0 : index
    %141 = vector.load %arg6[%c0_103, %c0_104, %c0_105] : memref<16x64x128xbf16, #tpu.memory_space<vmem>>, vector<1x64x128xbf16>
    %142 = vector.shape_cast %141 : vector<1x64x128xbf16> to vector<64x128xbf16>
    %cst_106 = arith.constant dense<0.000000e+00> : vector<1x128xf32>
    %143 = tpu.matmul %140, %142, %cst_106 {dimension_numbers = #tpu.dot_dimension_numbers<[1], [0], [0], [1], [0, 0, 1, 1], [], []>} : vector<1x64xbf16>, vector<64x128xbf16>, vector<1x128xf32> -> vector<1x128xf32>
    %144 = arith.addf %137, %143 : vector<1x128xf32>
    %c0_107 = arith.constant 0 : index
    %c1_108 = arith.constant 1 : index
    %c0_109 = arith.constant 0 : index
    %145 = vector.load %arg12[%c0_107, %c1_108, %c0_109] : memref<4x4x64xf32, #tpu.memory_space<vmem>>, vector<1x1x64xf32>
    %146 = vector.shape_cast %145 : vector<1x1x64xf32> to vector<1x64xf32>
    %147 = arith.truncf %146 : vector<1x64xf32> to vector<1x64xbf16>
    %c1_110 = arith.constant 1 : index
    %c0_111 = arith.constant 0 : index
    %c0_112 = arith.constant 0 : index
    %148 = vector.load %arg6[%c1_110, %c0_111, %c0_112] : memref<16x64x128xbf16, #tpu.memory_space<vmem>>, vector<1x64x128xbf16>
    %149 = vector.shape_cast %148 : vector<1x64x128xbf16> to vector<64x128xbf16>
    %cst_113 = arith.constant dense<0.000000e+00> : vector<1x128xf32>
    %150 = tpu.matmul %147, %149, %cst_113 {dimension_numbers = #tpu.dot_dimension_numbers<[1], [0], [0], [1], [0, 0, 1, 1], [], []>} : vector<1x64xbf16>, vector<64x128xbf16>, vector<1x128xf32> -> vector<1x128xf32>
    %151 = arith.addf %144, %150 : vector<1x128xf32>
    %c0_114 = arith.constant 0 : index
    %c2_115 = arith.constant 2 : index
    %c0_116 = arith.constant 0 : index
    %152 = vector.load %arg12[%c0_114, %c2_115, %c0_116] : memref<4x4x64xf32, #tpu.memory_space<vmem>>, vector<1x1x64xf32>
    %153 = vector.shape_cast %152 : vector<1x1x64xf32> to vector<1x64xf32>
    %154 = arith.truncf %153 : vector<1x64xf32> to vector<1x64xbf16>
    %c2_117 = arith.constant 2 : index
    %c0_118 = arith.constant 0 : index
    %c0_119 = arith.constant 0 : index
    %155 = vector.load %arg6[%c2_117, %c0_118, %c0_119] : memref<16x64x128xbf16, #tpu.memory_space<vmem>>, vector<1x64x128xbf16>
    %156 = vector.shape_cast %155 : vector<1x64x128xbf16> to vector<64x128xbf16>
    %cst_120 = arith.constant dense<0.000000e+00> : vector<1x128xf32>
    %157 = tpu.matmul %154, %156, %cst_120 {dimension_numbers = #tpu.dot_dimension_numbers<[1], [0], [0], [1], [0, 0, 1, 1], [], []>} : vector<1x64xbf16>, vector<64x128xbf16>, vector<1x128xf32> -> vector<1x128xf32>
    %158 = arith.addf %151, %157 : vector<1x128xf32>
    %c0_121 = arith.constant 0 : index
    %c3_122 = arith.constant 3 : index
    %c0_123 = arith.constant 0 : index
    %159 = vector.load %arg12[%c0_121, %c3_122, %c0_123] : memref<4x4x64xf32, #tpu.memory_space<vmem>>, vector<1x1x64xf32>
    %160 = vector.shape_cast %159 : vector<1x1x64xf32> to vector<1x64xf32>
    %161 = arith.truncf %160 : vector<1x64xf32> to vector<1x64xbf16>
    %c3_124 = arith.constant 3 : index
    %c0_125 = arith.constant 0 : index
    %c0_126 = arith.constant 0 : index
    %162 = vector.load %arg6[%c3_124, %c0_125, %c0_126] : memref<16x64x128xbf16, #tpu.memory_space<vmem>>, vector<1x64x128xbf16>
    %163 = vector.shape_cast %162 : vector<1x64x128xbf16> to vector<64x128xbf16>
    %cst_127 = arith.constant dense<0.000000e+00> : vector<1x128xf32>
    %164 = tpu.matmul %161, %163, %cst_127 {dimension_numbers = #tpu.dot_dimension_numbers<[1], [0], [0], [1], [0, 0, 1, 1], [], []>} : vector<1x64xbf16>, vector<64x128xbf16>, vector<1x128xf32> -> vector<1x128xf32>
    %165 = arith.addf %158, %164 : vector<1x128xf32>
    %c1_128 = arith.constant 1 : index
    %c0_129 = arith.constant 0 : index
    %c0_130 = arith.constant 0 : index
    %166 = vector.load %arg12[%c1_128, %c0_129, %c0_130] : memref<4x4x64xf32, #tpu.memory_space<vmem>>, vector<1x1x64xf32>
    %167 = vector.shape_cast %166 : vector<1x1x64xf32> to vector<1x64xf32>
    %168 = arith.truncf %167 : vector<1x64xf32> to vector<1x64xbf16>
    %c4_131 = arith.constant 4 : index
    %c0_132 = arith.constant 0 : index
    %c0_133 = arith.constant 0 : index
    %169 = vector.load %arg6[%c4_131, %c0_132, %c0_133] : memref<16x64x128xbf16, #tpu.memory_space<vmem>>, vector<1x64x128xbf16>
    %170 = vector.shape_cast %169 : vector<1x64x128xbf16> to vector<64x128xbf16>
    %cst_134 = arith.constant dense<0.000000e+00> : vector<1x128xf32>
    %171 = tpu.matmul %168, %170, %cst_134 {dimension_numbers = #tpu.dot_dimension_numbers<[1], [0], [0], [1], [0, 0, 1, 1], [], []>} : vector<1x64xbf16>, vector<64x128xbf16>, vector<1x128xf32> -> vector<1x128xf32>
    %172 = arith.addf %165, %171 : vector<1x128xf32>
    %c1_135 = arith.constant 1 : index
    %c1_136 = arith.constant 1 : index
    %c0_137 = arith.constant 0 : index
    %173 = vector.load %arg12[%c1_135, %c1_136, %c0_137] : memref<4x4x64xf32, #tpu.memory_space<vmem>>, vector<1x1x64xf32>
    %174 = vector.shape_cast %173 : vector<1x1x64xf32> to vector<1x64xf32>
    %175 = arith.truncf %174 : vector<1x64xf32> to vector<1x64xbf16>
    %c5_138 = arith.constant 5 : index
    %c0_139 = arith.constant 0 : index
    %c0_140 = arith.constant 0 : index
    %176 = vector.load %arg6[%c5_138, %c0_139, %c0_140] : memref<16x64x128xbf16, #tpu.memory_space<vmem>>, vector<1x64x128xbf16>
    %177 = vector.shape_cast %176 : vector<1x64x128xbf16> to vector<64x128xbf16>
    %cst_141 = arith.constant dense<0.000000e+00> : vector<1x128xf32>
    %178 = tpu.matmul %175, %177, %cst_141 {dimension_numbers = #tpu.dot_dimension_numbers<[1], [0], [0], [1], [0, 0, 1, 1], [], []>} : vector<1x64xbf16>, vector<64x128xbf16>, vector<1x128xf32> -> vector<1x128xf32>
    %179 = arith.addf %172, %178 : vector<1x128xf32>
    %c1_142 = arith.constant 1 : index
    %c2_143 = arith.constant 2 : index
    %c0_144 = arith.constant 0 : index
    %180 = vector.load %arg12[%c1_142, %c2_143, %c0_144] : memref<4x4x64xf32, #tpu.memory_space<vmem>>, vector<1x1x64xf32>
    %181 = vector.shape_cast %180 : vector<1x1x64xf32> to vector<1x64xf32>
    %182 = arith.truncf %181 : vector<1x64xf32> to vector<1x64xbf16>
    %c6_145 = arith.constant 6 : index
    %c0_146 = arith.constant 0 : index
    %c0_147 = arith.constant 0 : index
    %183 = vector.load %arg6[%c6_145, %c0_146, %c0_147] : memref<16x64x128xbf16, #tpu.memory_space<vmem>>, vector<1x64x128xbf16>
    %184 = vector.shape_cast %183 : vector<1x64x128xbf16> to vector<64x128xbf16>
    %cst_148 = arith.constant dense<0.000000e+00> : vector<1x128xf32>
    %185 = tpu.matmul %182, %184, %cst_148 {dimension_numbers = #tpu.dot_dimension_numbers<[1], [0], [0], [1], [0, 0, 1, 1], [], []>} : vector<1x64xbf16>, vector<64x128xbf16>, vector<1x128xf32> -> vector<1x128xf32>
    %186 = arith.addf %179, %185 : vector<1x128xf32>
    %c1_149 = arith.constant 1 : index
    %c3_150 = arith.constant 3 : index
    %c0_151 = arith.constant 0 : index
    %187 = vector.load %arg12[%c1_149, %c3_150, %c0_151] : memref<4x4x64xf32, #tpu.memory_space<vmem>>, vector<1x1x64xf32>
    %188 = vector.shape_cast %187 : vector<1x1x64xf32> to vector<1x64xf32>
    %189 = arith.truncf %188 : vector<1x64xf32> to vector<1x64xbf16>
    %c7_152 = arith.constant 7 : index
    %c0_153 = arith.constant 0 : index
    %c0_154 = arith.constant 0 : index
    %190 = vector.load %arg6[%c7_152, %c0_153, %c0_154] : memref<16x64x128xbf16, #tpu.memory_space<vmem>>, vector<1x64x128xbf16>
    %191 = vector.shape_cast %190 : vector<1x64x128xbf16> to vector<64x128xbf16>
    %cst_155 = arith.constant dense<0.000000e+00> : vector<1x128xf32>
    %192 = tpu.matmul %189, %191, %cst_155 {dimension_numbers = #tpu.dot_dimension_numbers<[1], [0], [0], [1], [0, 0, 1, 1], [], []>} : vector<1x64xbf16>, vector<64x128xbf16>, vector<1x128xf32> -> vector<1x128xf32>
    %193 = arith.addf %186, %192 : vector<1x128xf32>
    %c2_156 = arith.constant 2 : index
    %c0_157 = arith.constant 0 : index
    %c0_158 = arith.constant 0 : index
    %194 = vector.load %arg12[%c2_156, %c0_157, %c0_158] : memref<4x4x64xf32, #tpu.memory_space<vmem>>, vector<1x1x64xf32>
    %195 = vector.shape_cast %194 : vector<1x1x64xf32> to vector<1x64xf32>
    %196 = arith.truncf %195 : vector<1x64xf32> to vector<1x64xbf16>
    %c8_159 = arith.constant 8 : index
    %c0_160 = arith.constant 0 : index
    %c0_161 = arith.constant 0 : index
    %197 = vector.load %arg6[%c8_159, %c0_160, %c0_161] : memref<16x64x128xbf16, #tpu.memory_space<vmem>>, vector<1x64x128xbf16>
    %198 = vector.shape_cast %197 : vector<1x64x128xbf16> to vector<64x128xbf16>
    %cst_162 = arith.constant dense<0.000000e+00> : vector<1x128xf32>
    %199 = tpu.matmul %196, %198, %cst_162 {dimension_numbers = #tpu.dot_dimension_numbers<[1], [0], [0], [1], [0, 0, 1, 1], [], []>} : vector<1x64xbf16>, vector<64x128xbf16>, vector<1x128xf32> -> vector<1x128xf32>
    %200 = arith.addf %193, %199 : vector<1x128xf32>
    %c2_163 = arith.constant 2 : index
    %c1_164 = arith.constant 1 : index
    %c0_165 = arith.constant 0 : index
    %201 = vector.load %arg12[%c2_163, %c1_164, %c0_165] : memref<4x4x64xf32, #tpu.memory_space<vmem>>, vector<1x1x64xf32>
    %202 = vector.shape_cast %201 : vector<1x1x64xf32> to vector<1x64xf32>
    %203 = arith.truncf %202 : vector<1x64xf32> to vector<1x64xbf16>
    %c9 = arith.constant 9 : index
    %c0_166 = arith.constant 0 : index
    %c0_167 = arith.constant 0 : index
    %204 = vector.load %arg6[%c9, %c0_166, %c0_167] : memref<16x64x128xbf16, #tpu.memory_space<vmem>>, vector<1x64x128xbf16>
    %205 = vector.shape_cast %204 : vector<1x64x128xbf16> to vector<64x128xbf16>
    %cst_168 = arith.constant dense<0.000000e+00> : vector<1x128xf32>
    %206 = tpu.matmul %203, %205, %cst_168 {dimension_numbers = #tpu.dot_dimension_numbers<[1], [0], [0], [1], [0, 0, 1, 1], [], []>} : vector<1x64xbf16>, vector<64x128xbf16>, vector<1x128xf32> -> vector<1x128xf32>
    %207 = arith.addf %200, %206 : vector<1x128xf32>
    %c2_169 = arith.constant 2 : index
    %c2_170 = arith.constant 2 : index
    %c0_171 = arith.constant 0 : index
    %208 = vector.load %arg12[%c2_169, %c2_170, %c0_171] : memref<4x4x64xf32, #tpu.memory_space<vmem>>, vector<1x1x64xf32>
    %209 = vector.shape_cast %208 : vector<1x1x64xf32> to vector<1x64xf32>
    %210 = arith.truncf %209 : vector<1x64xf32> to vector<1x64xbf16>
    %c10 = arith.constant 10 : index
    %c0_172 = arith.constant 0 : index
    %c0_173 = arith.constant 0 : index
    %211 = vector.load %arg6[%c10, %c0_172, %c0_173] : memref<16x64x128xbf16, #tpu.memory_space<vmem>>, vector<1x64x128xbf16>
    %212 = vector.shape_cast %211 : vector<1x64x128xbf16> to vector<64x128xbf16>
    %cst_174 = arith.constant dense<0.000000e+00> : vector<1x128xf32>
    %213 = tpu.matmul %210, %212, %cst_174 {dimension_numbers = #tpu.dot_dimension_numbers<[1], [0], [0], [1], [0, 0, 1, 1], [], []>} : vector<1x64xbf16>, vector<64x128xbf16>, vector<1x128xf32> -> vector<1x128xf32>
    %214 = arith.addf %207, %213 : vector<1x128xf32>
    %c2_175 = arith.constant 2 : index
    %c3_176 = arith.constant 3 : index
    %c0_177 = arith.constant 0 : index
    %215 = vector.load %arg12[%c2_175, %c3_176, %c0_177] : memref<4x4x64xf32, #tpu.memory_space<vmem>>, vector<1x1x64xf32>
    %216 = vector.shape_cast %215 : vector<1x1x64xf32> to vector<1x64xf32>
    %217 = arith.truncf %216 : vector<1x64xf32> to vector<1x64xbf16>
    %c11 = arith.constant 11 : index
    %c0_178 = arith.constant 0 : index
    %c0_179 = arith.constant 0 : index
    %218 = vector.load %arg6[%c11, %c0_178, %c0_179] : memref<16x64x128xbf16, #tpu.memory_space<vmem>>, vector<1x64x128xbf16>
    %219 = vector.shape_cast %218 : vector<1x64x128xbf16> to vector<64x128xbf16>
    %cst_180 = arith.constant dense<0.000000e+00> : vector<1x128xf32>
    %220 = tpu.matmul %217, %219, %cst_180 {dimension_numbers = #tpu.dot_dimension_numbers<[1], [0], [0], [1], [0, 0, 1, 1], [], []>} : vector<1x64xbf16>, vector<64x128xbf16>, vector<1x128xf32> -> vector<1x128xf32>
    %221 = arith.addf %214, %220 : vector<1x128xf32>
    %c3_181 = arith.constant 3 : index
    %c0_182 = arith.constant 0 : index
    %c0_183 = arith.constant 0 : index
    %222 = vector.load %arg12[%c3_181, %c0_182, %c0_183] : memref<4x4x64xf32, #tpu.memory_space<vmem>>, vector<1x1x64xf32>
    %223 = vector.shape_cast %222 : vector<1x1x64xf32> to vector<1x64xf32>
    %224 = arith.truncf %223 : vector<1x64xf32> to vector<1x64xbf16>
    %c12 = arith.constant 12 : index
    %c0_184 = arith.constant 0 : index
    %c0_185 = arith.constant 0 : index
    %225 = vector.load %arg6[%c12, %c0_184, %c0_185] : memref<16x64x128xbf16, #tpu.memory_space<vmem>>, vector<1x64x128xbf16>
    %226 = vector.shape_cast %225 : vector<1x64x128xbf16> to vector<64x128xbf16>
    %cst_186 = arith.constant dense<0.000000e+00> : vector<1x128xf32>
    %227 = tpu.matmul %224, %226, %cst_186 {dimension_numbers = #tpu.dot_dimension_numbers<[1], [0], [0], [1], [0, 0, 1, 1], [], []>} : vector<1x64xbf16>, vector<64x128xbf16>, vector<1x128xf32> -> vector<1x128xf32>
    %228 = arith.addf %221, %227 : vector<1x128xf32>
    %c3_187 = arith.constant 3 : index
    %c1_188 = arith.constant 1 : index
    %c0_189 = arith.constant 0 : index
    %229 = vector.load %arg12[%c3_187, %c1_188, %c0_189] : memref<4x4x64xf32, #tpu.memory_space<vmem>>, vector<1x1x64xf32>
    %230 = vector.shape_cast %229 : vector<1x1x64xf32> to vector<1x64xf32>
    %231 = arith.truncf %230 : vector<1x64xf32> to vector<1x64xbf16>
    %c13 = arith.constant 13 : index
    %c0_190 = arith.constant 0 : index
    %c0_191 = arith.constant 0 : index
    %232 = vector.load %arg6[%c13, %c0_190, %c0_191] : memref<16x64x128xbf16, #tpu.memory_space<vmem>>, vector<1x64x128xbf16>
    %233 = vector.shape_cast %232 : vector<1x64x128xbf16> to vector<64x128xbf16>
    %cst_192 = arith.constant dense<0.000000e+00> : vector<1x128xf32>
    %234 = tpu.matmul %231, %233, %cst_192 {dimension_numbers = #tpu.dot_dimension_numbers<[1], [0], [0], [1], [0, 0, 1, 1], [], []>} : vector<1x64xbf16>, vector<64x128xbf16>, vector<1x128xf32> -> vector<1x128xf32>
    %235 = arith.addf %228, %234 : vector<1x128xf32>
    %c3_193 = arith.constant 3 : index
    %c2_194 = arith.constant 2 : index
    %c0_195 = arith.constant 0 : index
    %236 = vector.load %arg12[%c3_193, %c2_194, %c0_195] : memref<4x4x64xf32, #tpu.memory_space<vmem>>, vector<1x1x64xf32>
    %237 = vector.shape_cast %236 : vector<1x1x64xf32> to vector<1x64xf32>
    %238 = arith.truncf %237 : vector<1x64xf32> to vector<1x64xbf16>
    %c14 = arith.constant 14 : index
    %c0_196 = arith.constant 0 : index
    %c0_197 = arith.constant 0 : index
    %239 = vector.load %arg6[%c14, %c0_196, %c0_197] : memref<16x64x128xbf16, #tpu.memory_space<vmem>>, vector<1x64x128xbf16>
    %240 = vector.shape_cast %239 : vector<1x64x128xbf16> to vector<64x128xbf16>
    %cst_198 = arith.constant dense<0.000000e+00> : vector<1x128xf32>
    %241 = tpu.matmul %238, %240, %cst_198 {dimension_numbers = #tpu.dot_dimension_numbers<[1], [0], [0], [1], [0, 0, 1, 1], [], []>} : vector<1x64xbf16>, vector<64x128xbf16>, vector<1x128xf32> -> vector<1x128xf32>
    %242 = arith.addf %235, %241 : vector<1x128xf32>
    %c3_199 = arith.constant 3 : index
    %c3_200 = arith.constant 3 : index
    %c0_201 = arith.constant 0 : index
    %243 = vector.load %arg12[%c3_199, %c3_200, %c0_201] : memref<4x4x64xf32, #tpu.memory_space<vmem>>, vector<1x1x64xf32>
    %244 = vector.shape_cast %243 : vector<1x1x64xf32> to vector<1x64xf32>
    %245 = arith.truncf %244 : vector<1x64xf32> to vector<1x64xbf16>
    %c15 = arith.constant 15 : index
    %c0_202 = arith.constant 0 : index
    %c0_203 = arith.constant 0 : index
    %246 = vector.load %arg6[%c15, %c0_202, %c0_203] : memref<16x64x128xbf16, #tpu.memory_space<vmem>>, vector<1x64x128xbf16>
    %247 = vector.shape_cast %246 : vector<1x64x128xbf16> to vector<64x128xbf16>
    %cst_204 = arith.constant dense<0.000000e+00> : vector<1x128xf32>
    %248 = tpu.matmul %245, %247, %cst_204 {dimension_numbers = #tpu.dot_dimension_numbers<[1], [0], [0], [1], [0, 0, 1, 1], [], []>} : vector<1x64xbf16>, vector<64x128xbf16>, vector<1x128xf32> -> vector<1x128xf32>
    %249 = arith.addf %242, %248 : vector<1x128xf32>
    %c0_205 = arith.constant 0 : index
    %c0_206 = arith.constant 0 : index
    %250 = vector.load %arg7[%c0_205, %c0_206] : memref<1x128xf32, #tpu.memory_space<vmem>>, vector<1x128xf32>
    %251 = arith.addf %249, %250 : vector<1x128xf32>
    %cst_207 = arith.constant 0.000000e+00 : f32
    %252 = vector.broadcast %cst_207 : f32 to vector<1x128xf32>
    %253 = arith.maximumf %251, %252 : vector<1x128xf32>
    %254 = arith.truncf %253 : vector<1x128xf32> to vector<1x128xbf16>
    %c0_208 = arith.constant 0 : index
    %c0_209 = arith.constant 0 : index
    %255 = vector.load %arg8[%c0_208, %c0_209] : memref<128x6xbf16, #tpu.memory_space<vmem>>, vector<128x6xbf16>
    %cst_210 = arith.constant dense<0.000000e+00> : vector<1x6xf32>
    %256 = tpu.matmul %254, %255, %cst_210 {dimension_numbers = #tpu.dot_dimension_numbers<[1], [0], [0], [1], [0, 0, 1, 1], [], []>} : vector<1x128xbf16>, vector<128x6xbf16>, vector<1x6xf32> -> vector<1x6xf32>
    %c0_211 = arith.constant 0 : index
    %c0_212 = arith.constant 0 : index
    %257 = vector.load %arg9[%c0_211, %c0_212] : memref<1x6xf32, #tpu.memory_space<vmem>>, vector<1x6xf32>
    %258 = arith.addf %256, %257 : vector<1x6xf32>
    %c0_213 = arith.constant 0 : index
    %c0_214 = arith.constant 0 : index
    %c0_215 = arith.constant 0 : index
    %259 = vector.load %arg10[%c0_213, %c0_214, %c0_215] : memref<1x1x6xf32, #tpu.memory_space<vmem>>, vector<1x1x6xf32>
    %260 = vector.shape_cast %259 : vector<1x1x6xf32> to vector<1x6xf32>
    %261 = vector.shape_cast %258 : vector<1x6xf32> to vector<1x1x6xf32>
    tpu.vector_store %arg10[%c0_213, %c0_214, %c0_215], %261 {strides = array<i32>} : memref<1x1x6xf32, #tpu.memory_space<vmem>>, vector<1x1x6xf32>,
    return
  }
  func.func @transform_0(%arg0: i32) -> (i32, i32, i32, i32) {
    %c0_i32 = arith.constant 0 : i32
    %c0_i32_0 = arith.constant 0 : i32
    %c0_i32_1 = arith.constant 0 : i32
    %c0_i32_2 = arith.constant 0 : i32
    return %arg0, %c0_i32, %c0_i32_0, %c0_i32_1 : i32, i32, i32, i32
  }
  func.func @transform_1(%arg0: i32) -> (i32, i32, i32) {
    %c0_i32 = arith.constant 0 : i32
    %c0_i32_0 = arith.constant 0 : i32
    %c0_i32_1 = arith.constant 0 : i32
    %c0_i32_2 = arith.constant 0 : i32
    return %c0_i32, %c0_i32_0, %c0_i32_1 : i32, i32, i32
  }
  func.func @transform_2(%arg0: i32) -> (i32, i32) {
    %c0_i32 = arith.constant 0 : i32
    %c0_i32_0 = arith.constant 0 : i32
    %c0_i32_1 = arith.constant 0 : i32
    return %c0_i32, %c0_i32_0 : i32, i32
  }
  func.func @transform_3(%arg0: i32) -> (i32, i32, i32) {
    %c0_i32 = arith.constant 0 : i32
    %c0_i32_0 = arith.constant 0 : i32
    %c0_i32_1 = arith.constant 0 : i32
    %c0_i32_2 = arith.constant 0 : i32
    return %c0_i32, %c0_i32_0, %c0_i32_1 : i32, i32, i32
  }
  func.func @transform_4(%arg0: i32) -> (i32, i32) {
    %c0_i32 = arith.constant 0 : i32
    %c0_i32_0 = arith.constant 0 : i32
    %c0_i32_1 = arith.constant 0 : i32
    return %c0_i32, %c0_i32_0 : i32, i32
  }
  func.func @transform_5(%arg0: i32) -> (i32, i32, i32) {
    %c0_i32 = arith.constant 0 : i32
    %c0_i32_0 = arith.constant 0 : i32
    %c0_i32_1 = arith.constant 0 : i32
    %c0_i32_2 = arith.constant 0 : i32
    return %c0_i32, %c0_i32_0, %c0_i32_1 : i32, i32, i32
  }
  func.func @transform_6(%arg0: i32) -> (i32, i32) {
    %c0_i32 = arith.constant 0 : i32
    %c0_i32_0 = arith.constant 0 : i32
    %c0_i32_1 = arith.constant 0 : i32
    return %c0_i32, %c0_i32_0 : i32, i32
  }
  func.func @transform_7(%arg0: i32) -> (i32, i32) {
    %c0_i32 = arith.constant 0 : i32
    %c0_i32_0 = arith.constant 0 : i32
    %c0_i32_1 = arith.constant 0 : i32
    return %c0_i32, %c0_i32_0 : i32, i32
  }
  func.func @transform_8(%arg0: i32) -> (i32, i32) {
    %c0_i32 = arith.constant 0 : i32
    %c0_i32_0 = arith.constant 0 : i32
    %c0_i32_1 = arith.constant 0 : i32
    return %c0_i32, %c0_i32_0 : i32, i32
  }
  func.func @transform_9(%arg0: i32) -> (i32, i32, i32) {
    %c0_i32 = arith.constant 0 : i32
    %c0_i32_0 = arith.constant 0 : i32
    %c0_i32_1 = arith.constant 0 : i32
    return %arg0, %c0_i32, %c0_i32_0 : i32, i32, i32
  }
}

</mosaic_0001>

<bundles_post_ra>
// kernel: atari_critic_forward.2
= control target key start
LH: loop header
LB: loop body
LE: loop exit
PB: predicated region body
PF: predicated region fallthrough
CT: control target
= control target key end

     0   :  { %s4588_s12 = smov 0   ;;  %s5880_s0 = inlined_call_operand.vmem [shape: f32[2,16,16,64], index: 0, kind: input, shape index: {}]   ;;  %s5881_s1 = inlined_call_operand.vmem [shape: bf16[4,64,32], index: 1, kind: input, shape index: {}]   ;;  %s5882_s2 = inlined_call_operand.vmem [shape: f32[1,32], index: 2, kind: input, shape index: {}]   ;;  %s5883_s3 = inlined_call_operand.vmem [shape: f32[2,15,15,32], index: 3, kind: output, shape index: {}]  }
   0x1 LB: > { %s3339_s13 = sadd.s32 4294967295, %s4564_s12   ;;  %p3343_p0 = scmp.ge.s32.totalorder %s4564_s12, 1  ;;  %s4564_s12 = sphi %s4588_s12, %s13_s12  }
   0x2   : > { %p137_p1 = scmp.lt.s32.totalorder %s4564_s12, 3 }
   0x4   : > { %p138_p2 = pnand %p3343_p0, %p137_p1 }
   0x5   : > { %v4599_v0 = vld [vmem:[%s5881_s1 + $0x20] sm:$0xff] (!%p138_p2)   ;;  %v4566_v1 = vmov (!%p138_p2), 0.0   ;;  %v4608_v2 = vld [vmem:[%s5881_s1 + $0x28] sm:$0xff] (!%p138_p2)   ;;  %p161_p3 = scmp.lt.s32.totalorder (!%p138_p2), %s3339_s13, 1  ;;  %vm4567_vm0 = vmmov (!%p138_p2), 0   ;;  %v4623_v3 = vld [vmem:[%s5881_s1 + $0x30] sm:$0xff] (!%p138_p2)  }
   0x6   : > { %141 = sbr.rel (%p138_p2) target bundleno = 707 (0x2c3), region = 32  ;;  %3811 = vmatprep.subr.bf16.mxu0 (!%p138_p2), %v4566_v1  ;;  %3823 = vmatprep.subr.bf16.mxu1 (!%p138_p2), %v4566_v1  ;;  %v4636_v4 = vld [vmem:[%s5881_s1 + $0x38] sm:$0xff] (!%p138_p2)   ;;  %vm303_vm1 = vcmask (!%p138_p2), 523264   ;;  %v4807_v47 = vld [vmem:[%s5881_s1] sm:$0xff] (!%p138_p2)   ;;  %v4818_v48 = vld [vmem:[%s5881_s1 + $0x8] sm:$0xff] (!%p138_p2)   ;;  %vm3252_vm2 = vcmask (!%p138_p2), 261120  }
   0x7   : > { %3812 = vmatpush3.bf16.msra.mxu0 (!%p138_p2), %v4599_v0  ;;  %3824 = vmatpush3.bf16.msra.mxu1 (!%p138_p2), %v4599_v0  ;;  %v4831_v49 = vld [vmem:[%s5881_s1 + $0x10] sm:$0xff] (!%p138_p2)   ;;  %v4838_v50 = vld [vmem:[%s5881_s1 + $0x18] sm:$0xff] (!%p138_p2)   ;;  %vm3254_vm3 = vcmask (!%p138_p2), 260096  }
   0x8   : > { %3813 = vmatprep.subr.bf16.mxu0 (!%p138_p2), %v4566_v1  ;;  %3825 = vmatprep.subr.bf16.mxu1 (!%p138_p2), %v4566_v1 }
   0x9   : > { %3819 = vmatprep.mubr.msk.bf16.mxu0 (!%p138_p2), %vm4567_vm0, %v4566_v1  ;;  %3831 = vmatprep.mubr.msk.bf16.mxu1 (!%p138_p2), %vm4567_vm0, %v4566_v1 }
   0xb   : > { %3814 = vmatpush3.bf16.msra.mxu0 (!%p138_p2), %v4608_v2  ;;  %3826 = vmatpush3.bf16.msra.mxu1 (!%p138_p2), %v4608_v2 }
   0xc   : > { %3815 = vmatprep.subr.bf16.mxu0 (!%p138_p2), %v4566_v1  ;;  %3827 = vmatprep.subr.bf16.mxu1 (!%p138_p2), %v4566_v1 }
   0xd   : > { %s5885_s13 = smov (!%p161_p3, %s3339_s13), 1 }
   0xe   : > { %s3510_s20 = sshll.u32 %s5885_s13, 8 }
   0xf   : > { %s4631_s23 = scalar_lea.vmem %s5880_s0, %s3510_s20  ;;  %3816 = vmatpush3.bf16.msra.mxu0 %v4623_v3  ;;  %3828 = vmatpush3.bf16.msra.mxu1 %v4623_v3 }
  0x10   : > { %v225_v5 = vld [vmem:[%s4631_s23 + $0x1] sm:$0xff]  ;;  %v226_v6 = vld [vmem:[%s4631_s23 + $0x9] sm:$0x7f]  ;;  %v227_v7 = vld [vmem:[%s4631_s23 + $0x11] sm:$0xff]  ;;  %3817 = vmatprep.subr.bf16.mxu0 %v4566_v1  ;;  %3829 = vmatprep.subr.bf16.mxu1 %v4566_v1 }
  0x11   : > { %v228_v8 = vld [vmem:[%s4631_s23 + $0x19] sm:$0x7f]  ;;  %v255_v9 = vpack.c.bf16 %v226_v6, %v225_v5  ;;  %v229_v11 = vld [vmem:[%s4631_s23 + $0x21] sm:$0xff]  ;;  %v230_v12 = vld [vmem:[%s4631_s23 + $0x29] sm:$0x7f] }
  0x12   : > { %v256_v10 = vpack.c.bf16 %v228_v8, %v227_v7  ;;  %v231_v13 = vld [vmem:[%s4631_s23 + $0x31] sm:$0xff]  ;;  %v232_v14 = vld [vmem:[%s4631_s23 + $0x39] sm:$0x7f]  ;;  %v257_v15 = vpack.c.bf16 %v230_v12, %v229_v11  ;;  %v233_v17 = vld [vmem:[%s4631_s23 + $0x41] sm:$0xff] }
  0x13   : > { %3818 = vmatpush3.bf16.msra.mxu0 %v4636_v4  ;;  %3830 = vmatpush3.bf16.msra.mxu1 %v4636_v4  ;;  %v258_v16 = vpack.c.bf16 %v232_v14, %v231_v13  ;;  %v234_v18 = vld [vmem:[%s4631_s23 + $0x49] sm:$0x7f]  ;;  %v235_v19 = vld [vmem:[%s4631_s23 + $0x51] sm:$0xff]  ;;  %v236_v20 = vld [vmem:[%s4631_s23 + $0x59] sm:$0x7f] }
  0x14   : > { %3835 = vmatprep.subr.bf16.mxu0 %v4566_v1  ;;  %3847 = vmatprep.subr.bf16.mxu1 %v4566_v1  ;;  %v259_v21 = vpack.c.bf16 %v234_v18, %v233_v17  ;;  %v260_v22 = vpack.c.bf16 %v236_v20, %v235_v19  ;;  %v237_v23 = vld [vmem:[%s4631_s23 + $0x61] sm:$0xff]  ;;  %v238_v24 = vld [vmem:[%s4631_s23 + $0x69] sm:$0x7f]  ;;  %v239_v25 = vld [vmem:[%s4631_s23 + $0x71] sm:$0xff] }
  0x15   : > { %v240_v26 = vld [vmem:[%s4631_s23 + $0x79] sm:$0x7f]  ;;  %v261_v27 = vpack.c.bf16 %v238_v24, %v237_v23  ;;  %v241_v29 = vld [vmem:[%s4631_s23 + $0x81] sm:$0xff]  ;;  %v242_v30 = vld [vmem:[%s4631_s23 + $0x89] sm:$0x7f] }
  0x16   : > { %3820 = vmatmul.mubr.msk.bf16.vlgmr.msra.gmra.mrb[0].mxu0 %vm303_vm1, %v255_v9  ;;  %3832 = vmatmul.mubr.msk.bf16.vlgmr.msra.gmra.mrb[0].mxu1 %vm303_vm1, %v256_v10  ;;  %v262_v28 = vpack.c.bf16 %v240_v26, %v239_v25  ;;  %v243_v31 = vld [vmem:[%s4631_s23 + $0x91] sm:$0xff]  ;;  %v244_v32 = vld [vmem:[%s4631_s23 + $0x99] sm:$0x7f]  ;;  %v263_v33 = vpack.c.bf16 %v242_v30, %v241_v29  ;;  %v245_v35 = vld [vmem:[%s4631_s23 + $0xa1] sm:$0xff] }
  0x17   : > { %3836 = vmatpush3.bf16.msra.mxu0 %v4599_v0  ;;  %3848 = vmatpush3.bf16.msra.mxu1 %v4599_v0  ;;  %v264_v34 = vpack.c.bf16 %v244_v32, %v243_v31  ;;  %v246_v36 = vld [vmem:[%s4631_s23 + $0xa9] sm:$0x7f]  ;;  %v247_v37 = vld [vmem:[%s4631_s23 + $0xb1] sm:$0xff]  ;;  %v248_v38 = vld [vmem:[%s4631_s23 + $0xb9] sm:$0x7f] }
  0x18   : > { %3837 = vmatprep.subr.bf16.mxu0 %v4566_v1  ;;  %3849 = vmatprep.subr.bf16.mxu1 %v4566_v1  ;;  %v265_v39 = vpack.c.bf16 %v246_v36, %v245_v35  ;;  %v266_v40 = vpack.c.bf16 %v248_v38, %v247_v37  ;;  %v249_v41 = vld [vmem:[%s4631_s23 + $0xc1] sm:$0xff]  ;;  %v250_v42 = vld [vmem:[%s4631_s23 + $0xc9] sm:$0x7f]  ;;  %v251_v43 = vld [vmem:[%s4631_s23 + $0xd1] sm:$0xff] }
  0x19   : > { %3843 = vmatprep.mubr.msk.bf16.mxu0 %vm4567_vm0, %v4566_v1  ;;  %3855 = vmatprep.mubr.msk.bf16.mxu1 %vm4567_vm0, %v4566_v1  ;;  %v252_v44 = vld [vmem:[%s4631_s23 + $0xd9] sm:$0x7f]  ;;  %v267_v45 = vpack.c.bf16 %v250_v42, %v249_v41  ;;  %v253_v51 = vld [vmem:[%s4631_s23 + $0xe1] sm:$0xff]  ;;  %v254_v52 = vld [vmem:[%s4631_s23 + $0xe9] sm:$0x7f] }
  0x1a   : > { %v268_v46 = vpack.c.bf16 %v252_v44, %v251_v43  ;;  %v172_v53 = vld [vmem:[%s4631_s23] sm:$0xff]  ;;  %v173_v54 = vld [vmem:[%s4631_s23 + $0x8] sm:$0x7f]  ;;  %v269_v55 = vpack.c.bf16 %v254_v52, %v253_v51  ;;  %v4867_v57 = vld [vmem:[%s4631_s23 + $0x10] sm:$0xff] }
  0x1b   : > { %3838 = vmatpush3.bf16.msra.mxu0 %v4608_v2  ;;  %3850 = vmatpush3.bf16.msra.mxu1 %v4608_v2  ;;  %v202_v56 = vpack.c.bf16 %v173_v54, %v172_v53  ;;  %v175_v58 = vld [vmem:[%s4631_s23 + $0x18] sm:$0x7f]  ;;  %v4873_v59 = vld [vmem:[%s4631_s23 + $0x20] sm:$0xff]  ;;  %v177_v60 = vld [vmem:[%s4631_s23 + $0x28] sm:$0x7f] }
  0x1c   : > { %3839 = vmatprep.subr.bf16.mxu0 %v4566_v1  ;;  %3851 = vmatprep.subr.bf16.mxu1 %v4566_v1  ;;  %v203_v61 = vpack.c.bf16 %v175_v58, %v4867_v57  ;;  %v204_v62 = vpack.c.bf16 %v177_v60, %v4873_v59  ;;  %v4899_v63 = vld [vmem:[%s4631_s23 + $0x30] sm:$0xff]  ;;  %v183_v7 = vld [vmem:[%s4631_s23 + $0x58] sm:$0x7f]  ;;  %v4937_v8 = vld [vmem:[%s4631_s23 + $0x60] sm:$0xff] }
  0x1d   : > { %v4931_v6 = vld [vmem:[%s4631_s23 + $0x50] sm:$0xff]  ;;  %v185_v9 = vld [vmem:[%s4631_s23 + $0x68] sm:$0x7f]  ;;  %v187_v13 = vld [vmem:[%s4631_s23 + $0x78] sm:$0x7f] }
  0x1e   : > { %v207_v10 = vpack.c.bf16 %v183_v7, %v4931_v6  ;;  %v208_v11 = vpack.c.bf16 %v185_v9, %v4937_v8  ;;  %v4963_v12 = vld [vmem:[%s4631_s23 + $0x70] sm:$0xff]  ;;  %v4969_v14 = vld [vmem:[%s4631_s23 + $0x80] sm:$0xff]  ;;  %v191_v19 = vld [vmem:[%s4631_s23 + $0x98] sm:$0x7f] }
  0x1f   : > { %3840 = vmatpush3.bf16.msra.mxu0 %v4623_v3  ;;  %3852 = vmatpush3.bf16.msra.mxu1 %v4623_v3  ;;  %v4995_v18 = vld [vmem:[%s4631_s23 + $0x90] sm:$0xff]  ;;  %v5001_v20 = vld [vmem:[%s4631_s23 + $0xa0] sm:$0xff]  ;;  %v195_v25 = vld [vmem:[%s4631_s23 + $0xb8] sm:$0x7f] }
  0x20   : > { %3841 = vmatprep.subr.bf16.mxu0 %v4566_v1  ;;  %3853 = vmatprep.subr.bf16.mxu1 %v4566_v1  ;;  %v5027_v24 = vld [vmem:[%s4631_s23 + $0xb0] sm:$0xff]  ;;  %v5033_v26 = vld [vmem:[%s4631_s23 + $0xc0] sm:$0xff]  ;;  %v201_v41 = vld [vmem:[%s4631_s23 + $0xe8] sm:$0x7f] }
  0x21   : > { %v5067_v38 = vld [vmem:[%s4631_s23 + $0xd0] sm:$0xff]  ;;  %v5085_v44 = vld [vmem:[%s5881_s1 + $0x40] sm:$0xff]   ;;  %v3396_v58 = vld [vmem:[%s4631_s23 + $0x28] sm:$0x7f] }
  0x22   : > { %v5117_v52 = vld [vmem:[%s5881_s1 + $0x50] sm:$0xff]   ;;  %v3398_v9 = vld [vmem:[%s4631_s23 + $0x38] sm:$0x7f] }
  0x23   : > { %3842 = vmatpush3.bf16.msra.mxu0 %v4636_v4  ;;  %3854 = vmatpush3.bf16.msra.mxu1 %v4636_v4 }
  0x24   : > { %3859 = vmatprep.subr.bf16.mxu0 %v4566_v1  ;;  %3871 = vmatprep.subr.bf16.mxu1 %v4566_v1 }
  0x26   : > { %3844 = vmatmul.mubr.msk.bf16.vlgmr.msra.gmra.mrb[4].mxu0 %vm303_vm1, %v257_v15  ;;  %3856 = vmatmul.mubr.msk.bf16.vlgmr.msra.gmra.mrb[4].mxu1 %vm303_vm1, %v258_v16  ;;  %v189_v15 = vld [vmem:[%s4631_s23 + $0x88] sm:$0x7f]  ;;  %v209_v16 = vpack.c.bf16 %v187_v13, %v4963_v12 }
  0x27   : > { %3860 = vmatpush3.bf16.msra.mxu0 %v4599_v0  ;;  %3872 = vmatpush3.bf16.msra.mxu1 %v4599_v0  ;;  %v210_v17 = vpack.c.bf16 %v189_v15, %v4969_v14 }
  0x28   : > { %3861 = vmatprep.subr.bf16.mxu0 %v4566_v1  ;;  %3873 = vmatprep.subr.bf16.mxu1 %v4566_v1 }
  0x29   : > { %3867 = vmatprep.mubr.msk.bf16.mxu0 %vm4567_vm0, %v4566_v1  ;;  %3879 = vmatprep.mubr.msk.bf16.mxu1 %vm4567_vm0, %v4566_v1 }
  0x2b   : > { %3862 = vmatpush3.bf16.msra.mxu0 %v4608_v2  ;;  %3874 = vmatpush3.bf16.msra.mxu1 %v4608_v2 }
  0x2c   : > { %3863 = vmatprep.subr.bf16.mxu0 %v4566_v1  ;;  %3875 = vmatprep.subr.bf16.mxu1 %v4566_v1 }
  0x2f   : > { %3864 = vmatpush3.bf16.msra.mxu0 %v4623_v3  ;;  %3876 = vmatpush3.bf16.msra.mxu1 %v4623_v3 }
  0x30   : > { %3865 = vmatprep.subr.bf16.mxu0 %v4566_v1  ;;  %3877 = vmatprep.subr.bf16.mxu1 %v4566_v1 }
  0x33   : > { %3866 = vmatpush3.bf16.msra.mxu0 %v4636_v4  ;;  %3878 = vmatpush3.bf16.msra.mxu1 %v4636_v4 }
  0x34   : > { %3883 = vmatprep.subr.bf16.mxu0 %v4566_v1  ;;  %3895 = vmatprep.subr.bf16.mxu1 %v4566_v1 }
  0x36   : > { %3868 = vmatmul.mubr.msk.bf16.vlgmr.msra.gmra.mrb[8].mxu0 %vm303_vm1, %v259_v21  ;;  %3880 = vmatmul.mubr.msk.bf16.vlgmr.msra.gmra.mrb[8].mxu1 %vm303_vm1, %v260_v22  ;;  %v193_v21 = vld [vmem:[%s4631_s23 + $0xa8] sm:$0x7f]  ;;  %v211_v22 = vpack.c.bf16 %v191_v19, %v4995_v18 }
  0x37   : > { %3884 = vmatpush3.bf16.msra.mxu0 %v4599_v0  ;;  %3896 = vmatpush3.bf16.msra.mxu1 %v4599_v0  ;;  %v212_v23 = vpack.c.bf16 %v193_v21, %v5001_v20 }
  0x38   : > { %3885 = vmatprep.subr.bf16.mxu0 %v4566_v1  ;;  %3897 = vmatprep.subr.bf16.mxu1 %v4566_v1 }
  0x39   : > { %3891 = vmatprep.mubr.msk.bf16.mxu0 %vm4567_vm0, %v4566_v1  ;;  %3903 = vmatprep.mubr.msk.bf16.mxu1 %vm4567_vm0, %v4566_v1 }
  0x3b   : > { %3886 = vmatpush3.bf16.msra.mxu0 %v4608_v2  ;;  %3898 = vmatpush3.bf16.msra.mxu1 %v4608_v2 }
  0x3c   : > { %3887 = vmatprep.subr.bf16.mxu0 %v4566_v1  ;;  %3899 = vmatprep.subr.bf16.mxu1 %v4566_v1 }
  0x3f   : > { %3888 = vmatpush3.bf16.msra.mxu0 %v4623_v3  ;;  %3900 = vmatpush3.bf16.msra.mxu1 %v4623_v3 }
  0x40   : > { %3889 = vmatprep.subr.bf16.mxu0 %v4566_v1  ;;  %3901 = vmatprep.subr.bf16.mxu1 %v4566_v1 }
  0x43   : > { %3890 = vmatpush3.bf16.msra.mxu0 %v4636_v4  ;;  %3902 = vmatpush3.bf16.msra.mxu1 %v4636_v4 }
  0x44   : > { %3907 = vmatprep.subr.bf16.mxu0 %v4566_v1  ;;  %3919 = vmatprep.subr.bf16.mxu1 %v4566_v1 }
  0x46   : > { %3892 = vmatmul.mubr.msk.bf16.vlgmr.msra.gmra.mrb[12].mxu0 %vm303_vm1, %v261_v27  ;;  %3904 = vmatmul.mubr.msk.bf16.vlgmr.msra.gmra.mrb[12].mxu1 %vm303_vm1, %v262_v28  ;;  %v197_v27 = vld [vmem:[%s4631_s23 + $0xc8] sm:$0x7f]  ;;  %v213_v28 = vpack.c.bf16 %v195_v25, %v5027_v24 }
  0x47   : > { %3908 = vmatpush3.bf16.msra.mxu0 %v4599_v0  ;;  %3920 = vmatpush3.bf16.msra.mxu1 %v4599_v0  ;;  %v214_v29 = vpack.c.bf16 %v197_v27, %v5033_v26  ;;  %v3404_v25 = vld [vmem:[%s4631_s23 + $0x68] sm:$0x7f] }
  0x48   : > { %3909 = vmatprep.subr.bf16.mxu0 %v4566_v1  ;;  %3921 = vmatprep.subr.bf16.mxu1 %v4566_v1 }
  0x49   : > { %3915 = vmatprep.mubr.msk.bf16.mxu0 %vm4567_vm0, %v4566_v1  ;;  %3927 = vmatprep.mubr.msk.bf16.mxu1 %vm4567_vm0, %v4566_v1 }
  0x4b   : > { %3910 = vmatpush3.bf16.msra.mxu0 %v4608_v2  ;;  %3922 = vmatpush3.bf16.msra.mxu1 %v4608_v2 }
  0x4c   : > { %3911 = vmatprep.subr.bf16.mxu0 %v4566_v1  ;;  %3923 = vmatprep.subr.bf16.mxu1 %v4566_v1 }
  0x4f   : > { %3912 = vmatpush3.bf16.msra.mxu0 %v4623_v3  ;;  %3924 = vmatpush3.bf16.msra.mxu1 %v4623_v3 }
  0x50   : > { %3913 = vmatprep.subr.bf16.mxu0 %v4566_v1  ;;  %3925 = vmatprep.subr.bf16.mxu1 %v4566_v1 }
  0x53   : > { %3914 = vmatpush3.bf16.msra.mxu0 %v4636_v4  ;;  %3926 = vmatpush3.bf16.msra.mxu1 %v4636_v4 }
  0x54   : > { %3931 = vmatprep.subr.bf16.mxu0 %v4566_v1  ;;  %3943 = vmatprep.subr.bf16.mxu1 %v4566_v1 }
  0x56   : > { %3916 = vmatmul.mubr.msk.bf16.vlgmr.msra.gmra.mrb[16].mxu0 %vm303_vm1, %v263_v33  ;;  %3928 = vmatmul.mubr.msk.bf16.vlgmr.msra.gmra.mrb[16].mxu1 %vm303_vm1, %v264_v34 }
  0x57   : > { %3932 = vmatpush3.bf16.msra.mxu0 %v4599_v0  ;;  %3944 = vmatpush3.bf16.msra.mxu1 %v4599_v0 }
  0x58   : > { %3933 = vmatprep.subr.bf16.mxu0 %v4566_v1  ;;  %3945 = vmatprep.subr.bf16.mxu1 %v4566_v1 }
  0x59   : > { %3939 = vmatprep.mubr.msk.bf16.mxu0 %vm4567_vm0, %v4566_v1  ;;  %3951 = vmatprep.mubr.msk.bf16.mxu1 %vm4567_vm0, %v4566_v1 }
  0x5b   : > { %3934 = vmatpush3.bf16.msra.mxu0 %v4608_v2  ;;  %3946 = vmatpush3.bf16.msra.mxu1 %v4608_v2 }
  0x5c   : > { %3935 = vmatprep.subr.bf16.mxu0 %v4566_v1  ;;  %3947 = vmatprep.subr.bf16.mxu1 %v4566_v1 }
  0x5f   : > { %3936 = vmatpush3.bf16.msra.mxu0 %v4623_v3  ;;  %3948 = vmatpush3.bf16.msra.mxu1 %v4623_v3 }
  0x60   : > { %3937 = vmatprep.subr.bf16.mxu0 %v4566_v1  ;;  %3949 = vmatprep.subr.bf16.mxu1 %v4566_v1 }
  0x63   : > { %3938 = vmatpush3.bf16.msra.mxu0 %v4636_v4  ;;  %3950 = vmatpush3.bf16.msra.mxu1 %v4636_v4 }
  0x64   : > { %3955 = vmatprep.subr.bf16.mxu0 %v4566_v1  ;;  %3967 = vmatprep.subr.bf16.mxu1 %v4566_v1 }
  0x66   : > { %3940 = vmatmul.mubr.msk.bf16.vlgmr.msra.gmra.mrb[20].mxu0 %vm303_vm1, %v265_v39  ;;  %3952 = vmatmul.mubr.msk.bf16.vlgmr.msra.gmra.mrb[20].mxu1 %vm303_vm1, %v266_v40  ;;  %v199_v39 = vld [vmem:[%s4631_s23 + $0xd8] sm:$0x7f]  ;;  %v5073_v40 = vld [vmem:[%s4631_s23 + $0xe0] sm:$0xff] }
  0x67   : > { %3956 = vmatpush3.bf16.msra.mxu0 %v4599_v0  ;;  %3968 = vmatpush3.bf16.msra.mxu1 %v4599_v0  ;;  %v215_v42 = vpack.c.bf16 %v199_v39, %v5067_v38  ;;  %v216_v43 = vpack.c.bf16 %v201_v41, %v5073_v40  ;;  %v3406_v41 = vld [vmem:[%s4631_s23 + $0x78] sm:$0x7f] }
  0x68   : > { %3957 = vmatprep.subr.bf16.mxu0 %v4566_v1  ;;  %3969 = vmatprep.subr.bf16.mxu1 %v4566_v1 }
  0x69   : > { %3963 = vmatprep.mubr.msk.bf16.mxu0 %vm4567_vm0, %v4566_v1  ;;  %3975 = vmatprep.mubr.msk.bf16.mxu1 %vm4567_vm0, %v4566_v1 }
  0x6b   : > { %3958 = vmatpush3.bf16.msra.mxu0 %v4608_v2  ;;  %3970 = vmatpush3.bf16.msra.mxu1 %v4608_v2 }
  0x6c   : > { %3959 = vmatprep.subr.bf16.mxu0 %v4566_v1  ;;  %3971 = vmatprep.subr.bf16.mxu1 %v4566_v1 }
  0x6f   : > { %3960 = vmatpush3.bf16.msra.mxu0 %v4623_v3  ;;  %3972 = vmatpush3.bf16.msra.mxu1 %v4623_v3 }
  0x70   : > { %3961 = vmatprep.subr.bf16.mxu0 %v4566_v1  ;;  %3973 = vmatprep.subr.bf16.mxu1 %v4566_v1 }
  0x73   : > { %3962 = vmatpush3.bf16.msra.mxu0 %v4636_v4  ;;  %3974 = vmatpush3.bf16.msra.mxu1 %v4636_v4 }
  0x74   : > { %3979 = vmatprep.subr.bf16.mxu0 %v4566_v1  ;;  %3991 = vmatprep.subr.bf16.mxu1 %v4566_v1 }
  0x76   : > { %3964 = vmatmul.mubr.msk.bf16.vlgmr.msra.gmra.mrb[24].mxu0 %vm303_vm1, %v267_v45  ;;  %3976 = vmatmul.mubr.msk.bf16.vlgmr.msra.gmra.mrb[24].mxu1 %vm303_vm1, %v268_v46  ;;  %v5096_v45 = vld [vmem:[%s5881_s1 + $0x48] sm:$0xff]  }
  0x77   : > { %3980 = vmatpush3.bf16.msra.mxu0 %v4599_v0  ;;  %3992 = vmatpush3.bf16.msra.mxu1 %v4807_v47  ;;  %v179_v0 = vld [vmem:[%s4631_s23 + $0x38] sm:$0x7f] }
  0x78   : > { %3981 = vmatprep.subr.bf16.mxu0 %v4566_v1  ;;  %3993 = vmatprep.subr.bf16.mxu1 %v4566_v1 }
  0x79   : > { %3987 = vmatprep.mubr.msk.bf16.mxu0 %vm4567_vm0, %v4566_v1  ;;  %3999 = vmatprep.mubr.msk.bf16.mxu1 %vm4567_vm0, %v4566_v1 }
  0x7b   : > { %3982 = vmatpush3.bf16.msra.mxu0 %v4608_v2  ;;  %3994 = vmatpush3.bf16.msra.mxu1 %v4818_v48  ;;  %v4905_v2 = vld [vmem:[%s4631_s23 + $0x40] sm:$0xff] }
  0x7c   : > { %3983 = vmatprep.subr.bf16.mxu0 %v4566_v1  ;;  %3995 = vmatprep.subr.bf16.mxu1 %v4566_v1 }
  0x7f   : > { %3984 = vmatpush3.bf16.msra.mxu0 %v4623_v3  ;;  %3996 = vmatpush3.bf16.msra.mxu1 %v4831_v49  ;;  %v181_v3 = vld [vmem:[%s4631_s23 + $0x48] sm:$0x7f] }
  0x80   : > { %3985 = vmatprep.subr.bf16.mxu0 %v4566_v1  ;;  %3997 = vmatprep.subr.bf16.mxu1 %v4566_v1  ;;  %v206_v5 = vpack.c.bf16 %v181_v3, %v4905_v2 }
  0x83   : > { %3986 = vmatpush3.bf16.msra.mxu0 %v4636_v4  ;;  %3998 = vmatpush3.bf16.msra.mxu1 %v4838_v50  ;;  %v205_v4 = vpack.c.bf16 %v179_v0, %v4899_v63 }
  0x84   : > { %4003 = vmatprep.subr.bf16.mxu0 %v4566_v1  ;;  %4015 = vmatprep.subr.bf16.mxu1 %v4566_v1 }
  0x86   : > { %3988 = vmatmul.mubr.msk.bf16.vlgmr.msra.gmra.mrb[28].mxu0 %vm303_vm1, %v269_v55  ;;  %4000 = vmatmul.mubr.msk.bf16.vlgmr.msra.gmra.mrb[28].mxu1 %vm303_vm1, %v202_v56  ;;  %v5126_v55 = vld [vmem:[%s5881_s1 + $0x58] sm:$0xff]  }
  0x87   : > { %4004 = vmatpush3.bf16.msra.mxu0 %v4807_v47  ;;  %4016 = vmatpush3.bf16.msra.mxu1 %v4807_v47  ;;  %v3394_v56 = vld [vmem:[%s4631_s23 + $0x18] sm:$0x7f] }
  0x88   : > { %4005 = vmatprep.subr.bf16.mxu0 %v4566_v1  ;;  %4017 = vmatprep.subr.bf16.mxu1 %v4566_v1  ;;  %v1679_v60 = vpack.c.bf16 %v3394_v56, %v4867_v57 }
  0x89   : > { %4011 = vmatprep.mubr.msk.bf16.mxu0 %vm4567_vm0, %v4566_v1  ;;  %4023 = vmatprep.mubr.msk.bf16.mxu1 %vm4567_vm0, %v4566_v1 }
  0x8b   : > { %4006 = vmatpush3.bf16.msra.mxu0 %v4818_v48  ;;  %4018 = vmatpush3.bf16.msra.mxu1 %v4818_v48 }
  0x8c   : > { %4007 = vmatprep.subr.bf16.mxu0 %v4566_v1  ;;  %4019 = vmatprep.subr.bf16.mxu1 %v4566_v1 }
  0x8f   : > { %4008 = vmatpush3.bf16.msra.mxu0 %v4831_v49  ;;  %4020 = vmatpush3.bf16.msra.mxu1 %v4831_v49 }
  0x90   : > { %4009 = vmatprep.subr.bf16.mxu0 %v4566_v1  ;;  %4021 = vmatprep.subr.bf16.mxu1 %v4566_v1 }
  0x93   : > { %4010 = vmatpush3.bf16.msra.mxu0 %v4838_v50  ;;  %4022 = vmatpush3.bf16.msra.mxu1 %v4838_v50 }
  0x94   : > { %4027 = vmatprep.subr.bf16.mxu0 %v4566_v1  ;;  %4039 = vmatprep.subr.bf16.mxu1 %v4566_v1 }
  0x96   : > { %4012 = vmatmul.mubr.msk.bf16.vlgmr.msra.gmra.mrb[32].mxu0 %vm303_vm1, %v203_v61  ;;  %4024 = vmatmul.mubr.msk.bf16.vlgmr.msra.gmra.mrb[32].mxu1 %vm303_vm1, %v204_v62  ;;  %v1680_v61 = vpack.c.bf16 %v3396_v58, %v4873_v59 }
  0x97   : > { %4028 = vmatpush3.bf16.msra.mxu0 %v4807_v47  ;;  %4040 = vmatpush3.bf16.msra.mxu1 %v4807_v47 }
  0x98   : > { %4029 = vmatprep.subr.bf16.mxu0 %v4566_v1  ;;  %4041 = vmatprep.subr.bf16.mxu1 %v4566_v1 }
  0x99   : > { %4035 = vmatprep.mubr.msk.bf16.mxu0 %vm4567_vm0, %v4566_v1  ;;  %4047 = vmatprep.mubr.msk.bf16.mxu1 %vm4567_vm0, %v4566_v1 }
  0x9b   : > { %4030 = vmatpush3.bf16.msra.mxu0 %v4818_v48  ;;  %4042 = vmatpush3.bf16.msra.mxu1 %v4818_v48 }
  0x9c   : > { %4031 = vmatprep.subr.bf16.mxu0 %v4566_v1  ;;  %4043 = vmatprep.subr.bf16.mxu1 %v4566_v1 }
  0x9f   : > { %4032 = vmatpush3.bf16.msra.mxu0 %v4831_v49  ;;  %4044 = vmatpush3.bf16.msra.mxu1 %v4831_v49 }
  0xa0   : > { %4033 = vmatprep.subr.bf16.mxu0 %v4566_v1  ;;  %4045 = vmatprep.subr.bf16.mxu1 %v4566_v1 }
  0xa3   : > { %4034 = vmatpush3.bf16.msra.mxu0 %v4838_v50  ;;  %4046 = vmatpush3.bf16.msra.mxu1 %v4838_v50 }
  0xa4   : > { %4051 = vmatprep.subr.bf16.mxu0 %v4566_v1  ;;  %4063 = vmatprep.subr.bf16.mxu1 %v4566_v1 }
  0xa6   : > { %4036 = vmatmul.mubr.msk.bf16.vlgmr.msra.gmra.mrb[36].mxu0 %vm303_vm1, %v205_v4  ;;  %4048 = vmatmul.mubr.msk.bf16.vlgmr.msra.gmra.mrb[36].mxu1 %vm303_vm1, %v206_v5 }
  0xa7   : > { %4052 = vmatpush3.bf16.msra.mxu0 %v4807_v47  ;;  %4064 = vmatpush3.bf16.msra.mxu1 %v4807_v47 }
  0xa8   : > { %4053 = vmatprep.subr.bf16.mxu0 %v4566_v1  ;;  %4065 = vmatprep.subr.bf16.mxu1 %v4566_v1 }
  0xa9   : > { %4059 = vmatprep.mubr.msk.bf16.mxu0 %vm4567_vm0, %v4566_v1  ;;  %4071 = vmatprep.mubr.msk.bf16.mxu1 %vm4567_vm0, %v4566_v1 }
  0xab   : > { %4054 = vmatpush3.bf16.msra.mxu0 %v4818_v48  ;;  %4066 = vmatpush3.bf16.msra.mxu1 %v4818_v48 }
  0xac   : > { %4055 = vmatprep.subr.bf16.mxu0 %v4566_v1  ;;  %4067 = vmatprep.subr.bf16.mxu1 %v4566_v1 }
  0xaf   : > { %4056 = vmatpush3.bf16.msra.mxu0 %v4831_v49  ;;  %4068 = vmatpush3.bf16.msra.mxu1 %v4831_v49 }
  0xb0   : > { %4057 = vmatprep.subr.bf16.mxu0 %v4566_v1  ;;  %4069 = vmatprep.subr.bf16.mxu1 %v4566_v1 }
  0xb3   : > { %4058 = vmatpush3.bf16.msra.mxu0 %v4838_v50  ;;  %4070 = vmatpush3.bf16.msra.mxu1 %v4838_v50 }
  0xb4   : > { %4075 = vmatprep.subr.bf16.mxu0 %v4566_v1  ;;  %4087 = vmatprep.subr.bf16.mxu1 %v4566_v1 }
  0xb6   : > { %4060 = vmatmul.mubr.msk.bf16.vlgmr.msra.gmra.mrb[40].mxu0 %vm303_vm1, %v207_v10  ;;  %4072 = vmatmul.mubr.msk.bf16.vlgmr.msra.gmra.mrb[40].mxu1 %vm303_vm1, %v208_v11  ;;  %v3400_v10 = vld [vmem:[%s4631_s23 + $0x48] sm:$0x7f]  ;;  %v1681_v11 = vpack.c.bf16 %v3398_v9, %v4899_v63 }
  0xb7   : > { %4076 = vmatpush3.bf16.msra.mxu0 %v4807_v47  ;;  %4088 = vmatpush3.bf16.msra.mxu1 %v4807_v47  ;;  %v1682_v13 = vpack.c.bf16 %v3400_v10, %v4905_v2 }
  0xb8   : > { %4077 = vmatprep.subr.bf16.mxu0 %v4566_v1  ;;  %4089 = vmatprep.subr.bf16.mxu1 %v4566_v1 }
  0xb9   : > { %4083 = vmatprep.mubr.msk.bf16.mxu0 %vm4567_vm0, %v4566_v1  ;;  %4095 = vmatprep.mubr.msk.bf16.mxu1 %vm4567_vm0, %v4566_v1 }
  0xbb   : > { %4078 = vmatpush3.bf16.msra.mxu0 %v4818_v48  ;;  %4090 = vmatpush3.bf16.msra.mxu1 %v4818_v48 }
  0xbc   : > { %4079 = vmatprep.subr.bf16.mxu0 %v4566_v1  ;;  %4091 = vmatprep.subr.bf16.mxu1 %v4566_v1 }
  0xbf   : > { %4080 = vmatpush3.bf16.msra.mxu0 %v4831_v49  ;;  %4092 = vmatpush3.bf16.msra.mxu1 %v4831_v49 }
  0xc0   : > { %4081 = vmatprep.subr.bf16.mxu0 %v4566_v1  ;;  %4093 = vmatprep.subr.bf16.mxu1 %v4566_v1 }
  0xc3   : > { %4082 = vmatpush3.bf16.msra.mxu0 %v4838_v50  ;;  %4094 = vmatpush3.bf16.msra.mxu1 %v4838_v50 }
  0xc4   : > { %4099 = vmatprep.subr.bf16.mxu0 %v4566_v1  ;;  %4111 = vmatprep.subr.bf16.mxu1 %v4566_v1 }
  0xc6   : > { %4084 = vmatmul.mubr.msk.bf16.vlgmr.msra.gmra.mrb[44].mxu0 %vm303_vm1, %v209_v16  ;;  %4096 = vmatmul.mubr.msk.bf16.vlgmr.msra.gmra.mrb[44].mxu1 %vm303_vm1, %v210_v17 }
  0xc7   : > { %4100 = vmatpush3.bf16.msra.mxu0 %v4807_v47  ;;  %4112 = vmatpush3.bf16.msra.mxu1 %v4807_v47 }
  0xc8   : > { %4101 = vmatprep.subr.bf16.mxu0 %v4566_v1  ;;  %4113 = vmatprep.subr.bf16.mxu1 %v4566_v1 }
  0xc9   : > { %4107 = vmatprep.mubr.msk.bf16.mxu0 %vm4567_vm0, %v4566_v1  ;;  %4119 = vmatprep.mubr.msk.bf16.mxu1 %vm4567_vm0, %v4566_v1 }
  0xcb   : > { %4102 = vmatpush3.bf16.msra.mxu0 %v4818_v48  ;;  %4114 = vmatpush3.bf16.msra.mxu1 %v4818_v48 }
  0xcc   : > { %4103 = vmatprep.subr.bf16.mxu0 %v4566_v1  ;;  %4115 = vmatprep.subr.bf16.mxu1 %v4566_v1 }
  0xcf   : > { %4104 = vmatpush3.bf16.msra.mxu0 %v4831_v49  ;;  %4116 = vmatpush3.bf16.msra.mxu1 %v4831_v49 }
  0xd0   : > { %4105 = vmatprep.subr.bf16.mxu0 %v4566_v1  ;;  %4117 = vmatprep.subr.bf16.mxu1 %v4566_v1 }
  0xd3   : > { %4106 = vmatpush3.bf16.msra.mxu0 %v4838_v50  ;;  %4118 = vmatpush3.bf16.msra.mxu1 %v4838_v50 }
  0xd4   : > { %4123 = vmatprep.subr.bf16.mxu0 %v4566_v1  ;;  %4135 = vmatprep.subr.bf16.mxu1 %v4566_v1 }
  0xd6   : > { %4108 = vmatmul.mubr.msk.bf16.vlgmr.msra.gmra.mrb[48].mxu0 %vm303_vm1, %v211_v22  ;;  %4120 = vmatmul.mubr.msk.bf16.vlgmr.msra.gmra.mrb[48].mxu1 %vm303_vm1, %v212_v23  ;;  %v3402_v23 = vld [vmem:[%s4631_s23 + $0x58] sm:$0x7f] }
  0xd7   : > { %4124 = vmatpush3.bf16.msra.mxu0 %v4807_v47  ;;  %4136 = vmatpush3.bf16.msra.mxu1 %v4807_v47  ;;  %v1683_v27 = vpack.c.bf16 %v3402_v23, %v4931_v6 }
  0xd8   : > { %4125 = vmatprep.subr.bf16.mxu0 %v4566_v1  ;;  %4137 = vmatprep.subr.bf16.mxu1 %v4566_v1 }
  0xd9   : > { %4131 = vmatprep.mubr.msk.bf16.mxu0 %vm4567_vm0, %v4566_v1  ;;  %4143 = vmatprep.mubr.msk.bf16.mxu1 %vm4567_vm0, %v4566_v1 }
  0xdb   : > { %4126 = vmatpush3.bf16.msra.mxu0 %v4818_v48  ;;  %4138 = vmatpush3.bf16.msra.mxu1 %v4818_v48 }
  0xdc   : > { %4127 = vmatprep.subr.bf16.mxu0 %v4566_v1  ;;  %4139 = vmatprep.subr.bf16.mxu1 %v4566_v1 }
  0xdf   : > { %4128 = vmatpush3.bf16.msra.mxu0 %v4831_v49  ;;  %4140 = vmatpush3.bf16.msra.mxu1 %v4831_v49 }
  0xe0   : > { %4129 = vmatprep.subr.bf16.mxu0 %v4566_v1  ;;  %4141 = vmatprep.subr.bf16.mxu1 %v4566_v1 }
  0xe3   : > { %4130 = vmatpush3.bf16.msra.mxu0 %v4838_v50  ;;  %4142 = vmatpush3.bf16.msra.mxu1 %v4838_v50 }
  0xe4   : > { %4147 = vmatprep.subr.bf16.mxu0 %v4566_v1  ;;  %4159 = vmatprep.subr.bf16.mxu1 %v4566_v1 }
  0xe6   : > { %4132 = vmatmul.mubr.msk.bf16.vlgmr.msra.gmra.mrb[52].mxu0 %vm303_vm1, %v213_v28  ;;  %4144 = vmatmul.mubr.msk.bf16.vlgmr.msra.gmra.mrb[52].mxu1 %vm303_vm1, %v214_v29  ;;  %v1684_v28 = vpack.c.bf16 %v3404_v25, %v4937_v8 }
  0xe7   : > { %4148 = vmatpush3.bf16.msra.mxu0 %v4807_v47  ;;  %4160 = vmatpush3.bf16.msra.mxu1 %v4807_v47 }
  0xe8   : > { %4149 = vmatprep.subr.bf16.mxu0 %v4566_v1  ;;  %4161 = vmatprep.subr.bf16.mxu1 %v4566_v1 }
  0xe9   : > { %v5050_v30 = vpop.f32.mrb[0].mxu0  ;;  %v5052_v31 = vpop.f32.mrb[0].mxu1  ;;  %4155 = vmatprep.mubr.msk.bf16.mxu0 %vm4567_vm0, %v4566_v1  ;;  %4167 = vmatprep.mubr.msk.bf16.mxu1 %vm4567_vm0, %v4566_v1 }
  0xea   : > { %v3821_v32 = vpop.f32.mrb[1].mxu0  ;;  %v3833_v33 = vpop.f32.mrb[1].mxu1 }
  0xeb   : > { %v5058_v34 = vpop.f32.mrb[2].mxu0  ;;  %v5060_v35 = vpop.f32.mrb[2].mxu1  ;;  %4150 = vmatpush3.bf16.msra.mxu0 %v4818_v48  ;;  %4162 = vmatpush3.bf16.msra.mxu1 %v4818_v48 }
  0xec   : > { %v3822_v36 = vpop.f32.mrb[3].mxu0  ;;  %v3834_v37 = vpop.f32.mrb[3].mxu1  ;;  %4151 = vmatprep.subr.bf16.mxu0 %v4566_v1  ;;  %4163 = vmatprep.subr.bf16.mxu1 %v4566_v1 }
  0xef   : > { %4152 = vmatpush3.bf16.msra.mxu0 %v4831_v49  ;;  %4164 = vmatpush3.bf16.msra.mxu1 %v4831_v49 }
  0xf0   : > { %4153 = vmatprep.subr.bf16.mxu0 %v4566_v1  ;;  %4165 = vmatprep.subr.bf16.mxu1 %v4566_v1 }
  0xf3   : > { %4154 = vmatpush3.bf16.msra.mxu0 %v4838_v50  ;;  %4166 = vmatpush3.bf16.msra.mxu1 %v4838_v50 }
  0xf4   : > { %4171 = vmatprep.subr.bf16.mxu0 %v4566_v1  ;;  %4183 = vmatprep.subr.bf16.mxu1 %v4566_v1 }
  0xf6   : > { %4156 = vmatmul.mubr.msk.bf16.vlgmr.msra.gmra.mrb[56].mxu0 %vm303_vm1, %v215_v42  ;;  %4168 = vmatmul.mubr.msk.bf16.vlgmr.msra.gmra.mrb[56].mxu1 %vm303_vm1, %v216_v43  ;;  %v3408_v42 = vld [vmem:[%s4631_s23 + $0x88] sm:$0x7f]  ;;  %v1685_v43 = vpack.c.bf16 %v3406_v41, %v4963_v12 }
  0xf7   : > { %4172 = vmatpush3.bf16.msra.mxu0 %v5085_v44  ;;  %4184 = vmatpush3.bf16.msra.mxu1 %v5085_v44 }
  0xf8   : > { %4173 = vmatprep.subr.bf16.mxu0 %v4566_v1  ;;  %4185 = vmatprep.subr.bf16.mxu1 %v4566_v1 }
  0xf9   : > { %v5100_v46 = vpop.f32.mrb[4].mxu0  ;;  %v5102_v47 = vpop.f32.mrb[4].mxu1  ;;  %4179 = vmatprep.mubr.msk.bf16.mxu0 %vm4567_vm0, %v4566_v1  ;;  %4191 = vmatprep.mubr.msk.bf16.mxu1 %vm4567_vm0, %v4566_v1 }
  0xfa   : > { %v3845_v48 = vpop.f32.mrb[5].mxu0  ;;  %v3857_v49 = vpop.f32.mrb[5].mxu1 }
  0xfb   : > { %v5108_v50 = vpop.f32.mrb[6].mxu0  ;;  %v5110_v51 = vpop.f32.mrb[6].mxu1  ;;  %4174 = vmatpush3.bf16.msra.mxu0 %v5096_v45  ;;  %4186 = vmatpush3.bf16.msra.mxu1 %v5096_v45  ;;  %v1686_v48 = vpack.c.bf16 %v3408_v42, %v4969_v14  ;;  %v3420_v42 = vld [vmem:[%s4631_s23 + $0xe8] sm:$0x7f] }
  0xfc   : > { %v3846_v53 = vpop.f32.mrb[7].mxu0  ;;  %v3858_v54 = vpop.f32.mrb[7].mxu1  ;;  %4175 = vmatprep.subr.bf16.mxu0 %v4566_v1  ;;  %4187 = vmatprep.subr.bf16.mxu1 %v4566_v1 }
  0xff   : > { %4176 = vmatpush3.bf16.msra.mxu0 %v5117_v52  ;;  %4188 = vmatpush3.bf16.msra.mxu1 %v5117_v52 }
 0x100   : > { %4177 = vmatprep.subr.bf16.mxu0 %v4566_v1  ;;  %4189 = vmatprep.subr.bf16.mxu1 %v4566_v1 }
 0x103   : > { %4178 = vmatpush3.bf16.msra.mxu0 %v5126_v55  ;;  %4190 = vmatpush3.bf16.msra.mxu1 %v5126_v55 }
 0x104   : > { %4195 = vmatprep.subr.bf16.mxu0 %v4566_v1  ;;  %4207 = vmatprep.subr.bf16.mxu1 %v4566_v1 }
 0x106   : > { %4180 = vmatmul.mubr.msk.bf16.vlgmr.msra.gmra.mrb[60].mxu0 %vm303_vm1, %v1679_v60  ;;  %4192 = vmatmul.mubr.msk.bf16.vlgmr.msra.gmra.mrb[60].mxu1 %vm303_vm1, %v1680_v61  ;;  %v3410_v61 = vld [vmem:[%s4631_s23 + $0x98] sm:$0x7f] }
 0x107   : > { %4196 = vmatpush3.bf16.msra.mxu0 %v5085_v44  ;;  %4208 = vmatpush3.bf16.msra.mxu1 %v5085_v44 }
 0x108   : > { %4197 = vmatprep.subr.bf16.mxu0 %v4566_v1  ;;  %4209 = vmatprep.subr.bf16.mxu1 %v4566_v1 }
 0x109   : > { %v5144_v57 = vpop.f32.mrb[8].mxu0  ;;  %v5146_v59 = vpop.f32.mrb[8].mxu1  ;;  %4203 = vmatprep.mubr.msk.bf16.mxu0 %vm4567_vm0, %v4566_v1  ;;  %4215 = vmatprep.mubr.msk.bf16.mxu1 %vm4567_vm0, %v4566_v1 }
 0x10a   : > { %v3869_v62 = vpop.f32.mrb[9].mxu0  ;;  %v3881_v0 = vpop.f32.mrb[9].mxu1 }
 0x10b   : > { %v5152_v3 = vpop.f32.mrb[10].mxu0  ;;  %v5154_v4 = vpop.f32.mrb[10].mxu1  ;;  %4198 = vmatpush3.bf16.msra.mxu0 %v5096_v45  ;;  %4210 = vmatpush3.bf16.msra.mxu1 %v5096_v45  ;;  %v3412_v62 = vld [vmem:[%s4631_s23 + $0xa8] sm:$0x7f]  ;;  %v1687_v0 = vpack.c.bf16 %v3410_v61, %v4995_v18 }
 0x10c   : > { %v3870_v5 = vpop.f32.mrb[11].mxu0  ;;  %v3882_v7 = vpop.f32.mrb[11].mxu1  ;;  %4199 = vmatprep.subr.bf16.mxu0 %v4566_v1  ;;  %4211 = vmatprep.subr.bf16.mxu1 %v4566_v1 }
 0x10d   : > { %v1688_v5 = vpack.c.bf16 %v3412_v62, %v5001_v20 }
 0x10f   : > { %4200 = vmatpush3.bf16.msra.mxu0 %v5117_v52  ;;  %4212 = vmatpush3.bf16.msra.mxu1 %v5117_v52 }
 0x110   : > { %4201 = vmatprep.subr.bf16.mxu0 %v4566_v1  ;;  %4213 = vmatprep.subr.bf16.mxu1 %v4566_v1 }
 0x113   : > { %4202 = vmatpush3.bf16.msra.mxu0 %v5126_v55  ;;  %4214 = vmatpush3.bf16.msra.mxu1 %v5126_v55 }
 0x114   : > { %4219 = vmatprep.subr.bf16.mxu0 %v4566_v1  ;;  %4231 = vmatprep.subr.bf16.mxu1 %v4566_v1 }
 0x116   : > { %4204 = vmatmul.mubr.msk.bf16.vlgmr.msra.gmra.mrb[64].mxu0 %vm303_vm1, %v1681_v11  ;;  %4216 = vmatmul.mubr.msk.bf16.vlgmr.msra.gmra.mrb[64].mxu1 %vm303_vm1, %v1682_v13 }
 0x117   : > { %4220 = vmatpush3.bf16.msra.mxu0 %v5085_v44  ;;  %4232 = vmatpush3.bf16.msra.mxu1 %v5085_v44 }
 0x118   : > { %4221 = vmatprep.subr.bf16.mxu0 %v4566_v1  ;;  %4233 = vmatprep.subr.bf16.mxu1 %v4566_v1 }
 0x119   : > { %v5178_v63 = vpop.f32.mrb[12].mxu0  ;;  %v5180_v2 = vpop.f32.mrb[12].mxu1  ;;  %4227 = vmatprep.mubr.msk.bf16.mxu0 %vm4567_vm0, %v4566_v1  ;;  %4239 = vmatprep.mubr.msk.bf16.mxu1 %vm4567_vm0, %v4566_v1 }
 0x11a   : > { %v3893_v15 = vpop.f32.mrb[13].mxu0  ;;  %v3905_v16 = vpop.f32.mrb[13].mxu1 }
 0x11b   : > { %v5186_v17 = vpop.f32.mrb[14].mxu0  ;;  %v5188_v19 = vpop.f32.mrb[14].mxu1  ;;  %4222 = vmatpush3.bf16.msra.mxu0 %v5096_v45  ;;  %4234 = vmatpush3.bf16.msra.mxu1 %v5096_v45  ;;  %v3414_v16 = vld [vmem:[%s4631_s23 + $0xb8] sm:$0x7f] }
 0x11c   : > { %v3894_v21 = vpop.f32.mrb[15].mxu0  ;;  %v3906_v22 = vpop.f32.mrb[15].mxu1  ;;  %4223 = vmatprep.subr.bf16.mxu0 %v4566_v1  ;;  %4235 = vmatprep.subr.bf16.mxu1 %v4566_v1 }
 0x11d   : > { %v3416_v21 = vld [vmem:[%s4631_s23 + $0xc8] sm:$0x7f]  ;;  %v1689_v22 = vpack.c.bf16 %v3414_v16, %v5027_v24 }
 0x11e   : > { %v1690_v23 = vpack.c.bf16 %v3416_v21, %v5033_v26 }
 0x11f   : > { %4224 = vmatpush3.bf16.msra.mxu0 %v5117_v52  ;;  %4236 = vmatpush3.bf16.msra.mxu1 %v5117_v52 }
 0x120   : > { %4225 = vmatprep.subr.bf16.mxu0 %v4566_v1  ;;  %4237 = vmatprep.subr.bf16.mxu1 %v4566_v1 }
 0x123   : > { %4226 = vmatpush3.bf16.msra.mxu0 %v5126_v55  ;;  %4238 = vmatpush3.bf16.msra.mxu1 %v5126_v55 }
 0x124   : > { %4243 = vmatprep.subr.bf16.mxu0 %v4566_v1  ;;  %4255 = vmatprep.subr.bf16.mxu1 %v4566_v1 }
 0x126   : > { %4228 = vmatmul.mubr.msk.bf16.vlgmr.msra.gmra.mrb[68].mxu0 %vm303_vm1, %v1683_v27  ;;  %4240 = vmatmul.mubr.msk.bf16.vlgmr.msra.gmra.mrb[68].mxu1 %vm303_vm1, %v1684_v28 }
 0x127   : > { %4244 = vmatpush3.bf16.msra.mxu0 %v5085_v44  ;;  %4256 = vmatpush3.bf16.msra.mxu1 %v5085_v44 }
 0x128   : > { %4245 = vmatprep.subr.bf16.mxu0 %v4566_v1  ;;  %4257 = vmatprep.subr.bf16.mxu1 %v4566_v1 }
 0x129   : > { %v5212_v6 = vpop.f32.mrb[16].mxu0  ;;  %v5214_v8 = vpop.f32.mrb[16].mxu1  ;;  %4251 = vmatprep.mubr.msk.bf16.mxu0 %vm4567_vm0, %v4566_v1  ;;  %4263 = vmatprep.mubr.msk.bf16.mxu1 %vm4567_vm0, %v4566_v1 }
 0x12a   : > { %v3917_v29 = vpop.f32.mrb[17].mxu0  ;;  %v3929_v32 = vpop.f32.mrb[17].mxu1 }
 0x12b   : > { %v5220_v33 = vpop.f32.mrb[18].mxu0  ;;  %v5222_v36 = vpop.f32.mrb[18].mxu1  ;;  %4246 = vmatpush3.bf16.msra.mxu0 %v5096_v45  ;;  %4258 = vmatpush3.bf16.msra.mxu1 %v5096_v45 }
 0x12c   : > { %v3918_v37 = vpop.f32.mrb[19].mxu0  ;;  %v3930_v39 = vpop.f32.mrb[19].mxu1  ;;  %4247 = vmatprep.subr.bf16.mxu0 %v4566_v1  ;;  %4259 = vmatprep.subr.bf16.mxu1 %v4566_v1 }
 0x12f   : > { %4248 = vmatpush3.bf16.msra.mxu0 %v5117_v52  ;;  %4260 = vmatpush3.bf16.msra.mxu1 %v5117_v52 }
 0x130   : > { %4249 = vmatprep.subr.bf16.mxu0 %v4566_v1  ;;  %4261 = vmatprep.subr.bf16.mxu1 %v4566_v1 }
 0x133   : > { %4250 = vmatpush3.bf16.msra.mxu0 %v5126_v55  ;;  %4262 = vmatpush3.bf16.msra.mxu1 %v5126_v55 }
 0x134   : > { %4267 = vmatprep.subr.bf16.mxu0 %v4566_v1  ;;  %4279 = vmatprep.subr.bf16.mxu1 %v4566_v1 }
 0x136   : > { %4252 = vmatmul.mubr.msk.bf16.vlgmr.msra.gmra.mrb[72].mxu0 %vm303_vm1, %v1685_v43  ;;  %4264 = vmatmul.mubr.msk.bf16.vlgmr.msra.gmra.mrb[72].mxu1 %vm303_vm1, %v1686_v48  ;;  %v5345_v48 = vld [vmem:[%s5881_s1 + $0x60] sm:$0xff]  }
 0x137   : > { %4268 = vmatpush3.bf16.msra.mxu0 %v5085_v44  ;;  %4280 = vmatpush3.bf16.msra.mxu1 %v5085_v44 }
 0x138   : > { %4269 = vmatprep.subr.bf16.mxu0 %v4566_v1  ;;  %4281 = vmatprep.subr.bf16.mxu1 %v4566_v1 }
 0x139   : > { %v5246_v12 = vpop.f32.mrb[20].mxu0  ;;  %v5248_v14 = vpop.f32.mrb[20].mxu1  ;;  %4275 = vmatprep.mubr.msk.bf16.mxu0 %vm4567_vm0, %v4566_v1  ;;  %4287 = vmatprep.mubr.msk.bf16.mxu1 %vm4567_vm0, %v4566_v1 }
 0x13a   : > { %v3941_v49 = vpop.f32.mrb[21].mxu0  ;;  %v3953_v53 = vpop.f32.mrb[21].mxu1 }
 0x13b   : > { %v5254_v54 = vpop.f32.mrb[22].mxu0  ;;  %v5256_v56 = vpop.f32.mrb[22].mxu1  ;;  %4270 = vmatpush3.bf16.msra.mxu0 %v5096_v45  ;;  %4282 = vmatpush3.bf16.msra.mxu1 %v5096_v45 }
 0x13c   : > { %v3942_v58 = vpop.f32.mrb[23].mxu0  ;;  %v3954_v60 = vpop.f32.mrb[23].mxu1  ;;  %4271 = vmatprep.subr.bf16.mxu0 %v4566_v1  ;;  %4283 = vmatprep.subr.bf16.mxu1 %v4566_v1 }
 0x13f   : > { %4272 = vmatpush3.bf16.msra.mxu0 %v5117_v52  ;;  %4284 = vmatpush3.bf16.msra.mxu1 %v5117_v52 }
 0x140   : > { %4273 = vmatprep.subr.bf16.mxu0 %v4566_v1  ;;  %4285 = vmatprep.subr.bf16.mxu1 %v4566_v1 }
 0x143   : > { %4274 = vmatpush3.bf16.msra.mxu0 %v5126_v55  ;;  %4286 = vmatpush3.bf16.msra.mxu1 %v5126_v55 }
 0x144   : > { %4291 = vmatprep.subr.bf16.mxu0 %v4566_v1  ;;  %4303 = vmatprep.subr.bf16.mxu1 %v4566_v1 }
 0x146   : > { %4276 = vmatmul.mubr.msk.bf16.vlgmr.msra.gmra.mrb[76].mxu0 %vm303_vm1, %v1687_v0  ;;  %4288 = vmatmul.mubr.msk.bf16.vlgmr.msra.gmra.mrb[76].mxu1 %vm303_vm1, %v1688_v5 }
 0x147   : > { %4292 = vmatpush3.bf16.msra.mxu0 %v5085_v44  ;;  %4304 = vmatpush3.bf16.msra.mxu1 %v5085_v44 }
 0x148   : > { %4293 = vmatprep.subr.bf16.mxu0 %v4566_v1  ;;  %4305 = vmatprep.subr.bf16.mxu1 %v4566_v1 }
 0x149   : > { %v5280_v18 = vpop.f32.mrb[24].mxu0  ;;  %v5282_v20 = vpop.f32.mrb[24].mxu1  ;;  %4299 = vmatprep.mubr.msk.bf16.mxu0 %vm4567_vm0, %v4566_v1  ;;  %4311 = vmatprep.mubr.msk.bf16.mxu1 %vm4567_vm0, %v4566_v1 }
 0x14a   : > { %v3965_v7 = vpop.f32.mrb[25].mxu0  ;;  %v3977_v9 = vpop.f32.mrb[25].mxu1 }
 0x14b   : > { %v5288_v10 = vpop.f32.mrb[26].mxu0  ;;  %v5290_v11 = vpop.f32.mrb[26].mxu1  ;;  %4294 = vmatpush3.bf16.msra.mxu0 %v5096_v45  ;;  %4306 = vmatpush3.bf16.msra.mxu1 %v5096_v45  ;;  %v3421_v9 = vld [vmem:[%s4631_s23 + $0xf0] sm:$0xff] }
 0x14c   : > { %v3966_v13 = vpop.f32.mrb[27].mxu0  ;;  %v3978_v15 = vpop.f32.mrb[27].mxu1  ;;  %4295 = vmatprep.subr.bf16.mxu0 %v4566_v1  ;;  %4307 = vmatprep.subr.bf16.mxu1 %v4566_v1 }
 0x14d   : > { %v3450_v13 = vld [vmem:[%s4631_s23 + $0x11] sm:$0xff] }
 0x14f   : > { %4296 = vmatpush3.bf16.msra.mxu0 %v5117_v52  ;;  %4308 = vmatpush3.bf16.msra.mxu1 %v5117_v52 }
 0x150   : > { %4297 = vmatprep.subr.bf16.mxu0 %v4566_v1  ;;  %4309 = vmatprep.subr.bf16.mxu1 %v4566_v1 }
 0x153   : > { %4298 = vmatpush3.bf16.msra.mxu0 %v5126_v55  ;;  %4310 = vmatpush3.bf16.msra.mxu1 %v5126_v55 }
 0x154   : > { %4315 = vmatprep.subr.bf16.mxu0 %v4566_v1  ;;  %4327 = vmatprep.subr.bf16.mxu1 %v4566_v1 }
 0x156   : > { %4300 = vmatmul.mubr.msk.bf16.vlgmr.msra.gmra.mrb[80].mxu0 %vm303_vm1, %v1689_v22  ;;  %4312 = vmatmul.mubr.msk.bf16.vlgmr.msra.gmra.mrb[80].mxu1 %vm303_vm1, %v1690_v23 }
 0x157   : > { %4316 = vmatpush3.bf16.msra.mxu0 %v5085_v44  ;;  %4328 = vmatpush3.bf16.msra.mxu1 %v5085_v44 }
 0x158   : > { %4317 = vmatprep.subr.bf16.mxu0 %v4566_v1  ;;  %4329 = vmatprep.subr.bf16.mxu1 %v4566_v1 }
 0x159   : > { %v5314_v24 = vpop.f32.mrb[28].mxu0  ;;  %v1025_v26 = vpop.f32.mrb[28].mxu1  ;;  %4323 = vmatprep.mubr.msk.bf16.mxu0 %vm4567_vm0, %v4566_v1  ;;  %4335 = vmatprep.mubr.msk.bf16.mxu1 %vm4567_vm0, %v4566_v1 }
 0x15a   : > { %v5321_v25 = vadd.f32 %v1025_v26, %v5050_v30  ;;  %v3989_v27 = vpop.f32.mrb[29].mxu0  ;;  %v4001_v28 = vpop.f32.mrb[29].mxu1  ;;  %v3418_v30 = vld [vmem:[%s4631_s23 + $0xd8] sm:$0x7f] }
 0x15b   : > { %v5323_v29 = vpop.f32.mrb[30].mxu0  ;;  %v1028_v32 = vpop.f32.mrb[30].mxu1  ;;  %4318 = vmatpush3.bf16.msra.mxu0 %v5096_v45  ;;  %4330 = vmatpush3.bf16.msra.mxu1 %v5096_v45  ;;  %v1691_v43 = vpack.c.bf16 %v3418_v30, %v5067_v38  ;;  %v5356_v38 = vld [vmem:[%s5881_s1 + $0x68] sm:$0xff]  }
 0x15c   : > { %v5328_v37 = vadd.f32 %v1028_v32, %v5058_v34  ;;  %v3990_v39 = vpop.f32.mrb[31].mxu0  ;;  %v4002_v41 = vpop.f32.mrb[31].mxu1  ;;  %4319 = vmatprep.subr.bf16.mxu0 %v4566_v1  ;;  %4331 = vmatprep.subr.bf16.mxu1 %v4566_v1  ;;  %v1692_v34 = vpack.c.bf16 %v3420_v42, %v5073_v40  ;;  %v3453_v30 = vld [vmem:[%s4631_s23 + $0x29] sm:$0x7f]  ;;  %v3454_v42 = vld [vmem:[%s4631_s23 + $0x31] sm:$0xff] }
 0x15d   : > { %v3452_v41 = vld [vmem:[%s4631_s23 + $0x21] sm:$0xff] }
 0x15f   : > { %4320 = vmatpush3.bf16.msra.mxu0 %v5117_v52  ;;  %4332 = vmatpush3.bf16.msra.mxu1 %v5117_v52 }
 0x160   : > { %4321 = vmatprep.subr.bf16.mxu0 %v4566_v1  ;;  %4333 = vmatprep.subr.bf16.mxu1 %v4566_v1 }
 0x163   : > { %4322 = vmatpush3.bf16.msra.mxu0 %v5126_v55  ;;  %4334 = vmatpush3.bf16.msra.mxu1 %v5126_v55 }
 0x164   : > { %4339 = vmatprep.subr.bf16.mxu0 %v4566_v1  ;;  %4351 = vmatprep.subr.bf16.mxu1 %v4566_v1 }
 0x166   : > { %4324 = vmatmul.mubr.msk.bf16.vlgmr.msra.gmra.mrb[84].mxu0 %vm303_vm1, %v1691_v43  ;;  %4336 = vmatmul.mubr.msk.bf16.vlgmr.msra.gmra.mrb[84].mxu1 %vm303_vm1, %v1692_v34  ;;  %v3455_v43 = vld [vmem:[%s4631_s23 + $0x39] sm:$0x7f] }
 0x167   : > { %4340 = vmatpush3.bf16.msra.mxu0 %v5085_v44  ;;  %4352 = vmatpush3.bf16.msra.mxu1 %v5345_v48 }
 0x168   : > { %4341 = vmatprep.subr.bf16.mxu0 %v4566_v1  ;;  %4353 = vmatprep.subr.bf16.mxu1 %v4566_v1 }
 0x169   : > { %v1069_v40 = vpop.f32.mrb[32].mxu0  ;;  %v1113_v49 = vpop.f32.mrb[32].mxu1  ;;  %4347 = vmatprep.mubr.msk.bf16.mxu0 %vm4567_vm0, %v4566_v1  ;;  %4359 = vmatprep.mubr.msk.bf16.mxu1 %vm4567_vm0, %v4566_v1 }
 0x16a   : > { %v5365_v44 = vadd.f32 %v1069_v40, %v5052_v31  ;;  %v5368_v53 = vadd.f32 %v1113_v49, %v5100_v46  ;;  %v4013_v58 = vpop.f32.mrb[33].mxu0  ;;  %v4025_v60 = vpop.f32.mrb[33].mxu1  ;;  %v5375_v31 = vld [vmem:[%s5881_s1 + $0x70] sm:$0xff]  }
 0x16b   : > { %v1072_v61 = vpop.f32.mrb[34].mxu0  ;;  %v1116_v62 = vpop.f32.mrb[34].mxu1  ;;  %4342 = vmatpush3.bf16.msra.mxu0 %v5096_v45  ;;  %4354 = vmatpush3.bf16.msra.mxu1 %v5356_v38  ;;  %v5388_v45 = vld [vmem:[%s5881_s1 + $0x78] sm:$0xff]  }
 0x16c   : > { %v5378_v0 = vadd.f32 %v1072_v61, %v5060_v35  ;;  %v5381_v46 = vadd.f32 %v1116_v62, %v5108_v50  ;;  %v4014_v5 = vpop.f32.mrb[35].mxu0  ;;  %v4026_v7 = vpop.f32.mrb[35].mxu1  ;;  %4343 = vmatprep.subr.bf16.mxu0 %v4566_v1  ;;  %4355 = vmatprep.subr.bf16.mxu1 %v4566_v1  ;;  %v3422_v35 = vld [vmem:[%s4631_s23 + $0xf8] sm:$0x7f] }
 0x16d   : > { %v3451_v50 = vld [vmem:[%s4631_s23 + $0x19] sm:$0x7f]  ;;  %v1693_v15 = vpack.c.bf16 %v3422_v35, %v3421_v9  ;;  %v3456_v35 = vld [vmem:[%s4631_s23 + $0x41] sm:$0xff] }
 0x16e   : > { %v2447_v16 = vpack.c.bf16 %v3451_v50, %v3450_v13  ;;  %v3457_v13 = vld [vmem:[%s4631_s23 + $0x49] sm:$0x7f]  ;;  %v3458_v50 = vld [vmem:[%s4631_s23 + $0x51] sm:$0xff] }
 0x16f   : > { %4344 = vmatpush3.bf16.msra.mxu0 %v5117_v52  ;;  %4356 = vmatpush3.bf16.msra.mxu1 %v5375_v31 }
 0x170   : > { %4345 = vmatprep.subr.bf16.mxu0 %v4566_v1  ;;  %4357 = vmatprep.subr.bf16.mxu1 %v4566_v1 }
 0x173   : > { %4346 = vmatpush3.bf16.msra.mxu0 %v5126_v55  ;;  %4358 = vmatpush3.bf16.msra.mxu1 %v5388_v45 }
 0x174   : > { %4363 = vmatprep.subr.bf16.mxu0 %v4566_v1  ;;  %4375 = vmatprep.subr.bf16.mxu1 %v4566_v1 }
 0x176   : > { %4348 = vmatmul.mubr.msk.bf16.vlgmr.msra.gmra.mrb[88].mxu0 %vm303_vm1, %v1693_v15  ;;  %4360 = vmatmul.mubr.msk.bf16.vlgmr.msra.gmra.mrb[88].mxu1 %vm303_vm1, %v2447_v16  ;;  %v3459_v15 = vld [vmem:[%s4631_s23 + $0x59] sm:$0x7f] }
 0x177   : > { %4364 = vmatpush3.bf16.msra.mxu0 %v5345_v48  ;;  %4376 = vmatpush3.bf16.msra.mxu1 %v5345_v48 }
 0x178   : > { %4365 = vmatprep.subr.bf16.mxu0 %v4566_v1  ;;  %4377 = vmatprep.subr.bf16.mxu1 %v4566_v1 }
 0x179   : > { %v1157_v52 = vpop.f32.mrb[36].mxu0  ;;  %v1201_v55 = vpop.f32.mrb[36].mxu1  ;;  %4371 = vmatprep.mubr.msk.bf16.mxu0 %vm4567_vm0, %v4566_v1  ;;  %4383 = vmatprep.mubr.msk.bf16.mxu1 %vm4567_vm0, %v4566_v1 }
 0x17a   : > { %v5413_v21 = vadd.f32 %v1157_v52, %v5102_v47  ;;  %v5416_v22 = vadd.f32 %v1201_v55, %v5144_v57  ;;  %v4037_v23 = vpop.f32.mrb[37].mxu0  ;;  %v4049_v26 = vpop.f32.mrb[37].mxu1 }
 0x17b   : > { %v1160_v27 = vpop.f32.mrb[38].mxu0  ;;  %v1204_v28 = vpop.f32.mrb[38].mxu1  ;;  %4366 = vmatpush3.bf16.msra.mxu0 %v5356_v38  ;;  %4378 = vmatpush3.bf16.msra.mxu1 %v5356_v38 }
 0x17c   : > { %v5421_v32 = vadd.f32 %v1160_v27, %v5110_v51  ;;  %v5424_v47 = vadd.f32 %v1204_v28, %v5152_v3  ;;  %v4038_v39 = vpop.f32.mrb[39].mxu0  ;;  %v4050_v57 = vpop.f32.mrb[39].mxu1  ;;  %4367 = vmatprep.subr.bf16.mxu0 %v4566_v1  ;;  %4379 = vmatprep.subr.bf16.mxu1 %v4566_v1  ;;  %v2448_v51 = vpack.c.bf16 %v3453_v30, %v3452_v41  ;;  %v3460_v30 = vld [vmem:[%s4631_s23 + $0x61] sm:$0xff] }
 0x17d   : > { %v2449_v3 = vpack.c.bf16 %v3455_v43, %v3454_v42  ;;  %v3461_v42 = vld [vmem:[%s4631_s23 + $0x69] sm:$0x7f]  ;;  %v3462_v43 = vld [vmem:[%s4631_s23 + $0x71] sm:$0xff] }
 0x17f   : > { %4368 = vmatpush3.bf16.msra.mxu0 %v5375_v31  ;;  %4380 = vmatpush3.bf16.msra.mxu1 %v5375_v31 }
 0x180   : > { %4369 = vmatprep.subr.bf16.mxu0 %v4566_v1  ;;  %4381 = vmatprep.subr.bf16.mxu1 %v4566_v1 }
 0x183   : > { %4370 = vmatpush3.bf16.msra.mxu0 %v5388_v45  ;;  %4382 = vmatpush3.bf16.msra.mxu1 %v5388_v45 }
 0x184   : > { %4387 = vmatprep.subr.bf16.mxu0 %v4566_v1  ;;  %4399 = vmatprep.subr.bf16.mxu1 %v4566_v1 }
 0x186   : > { %4372 = vmatmul.mubr.msk.bf16.vlgmr.msra.gmra.mrb[92].mxu0 %vm303_vm1, %v2448_v51  ;;  %4384 = vmatmul.mubr.msk.bf16.vlgmr.msra.gmra.mrb[92].mxu1 %vm303_vm1, %v2449_v3  ;;  %v3463_v51 = vld [vmem:[%s4631_s23 + $0x79] sm:$0x7f] }
 0x187   : > { %4388 = vmatpush3.bf16.msra.mxu0 %v5345_v48  ;;  %4400 = vmatpush3.bf16.msra.mxu1 %v5345_v48 }
 0x188   : > { %4389 = vmatprep.subr.bf16.mxu0 %v4566_v1  ;;  %4401 = vmatprep.subr.bf16.mxu1 %v4566_v1 }
 0x189   : > { %v1245_v34 = vpop.f32.mrb[40].mxu0  ;;  %v1289_v40 = vpop.f32.mrb[40].mxu1  ;;  %4395 = vmatprep.mubr.msk.bf16.mxu0 %vm4567_vm0, %v4566_v1  ;;  %4407 = vmatprep.mubr.msk.bf16.mxu1 %vm4567_vm0, %v4566_v1 }
 0x18a   : > { %v5451_v49 = vadd.f32 %v1245_v34, %v5146_v59  ;;  %v5454_v58 = vadd.f32 %v1289_v40, %v5178_v63  ;;  %v4061_v60 = vpop.f32.mrb[41].mxu0  ;;  %v4073_v61 = vpop.f32.mrb[41].mxu1 }
 0x18b   : > { %v1248_v62 = vpop.f32.mrb[42].mxu0  ;;  %v1292_v5 = vpop.f32.mrb[42].mxu1  ;;  %4390 = vmatpush3.bf16.msra.mxu0 %v5356_v38  ;;  %4402 = vmatpush3.bf16.msra.mxu1 %v5356_v38 }
 0x18c   : > { %v5459_v7 = vadd.f32 %v1248_v62, %v5154_v4  ;;  %v5462_v59 = vadd.f32 %v1292_v5, %v5186_v17  ;;  %v4062_v9 = vpop.f32.mrb[43].mxu0  ;;  %v4074_v63 = vpop.f32.mrb[43].mxu1  ;;  %4391 = vmatprep.subr.bf16.mxu0 %v4566_v1  ;;  %4403 = vmatprep.subr.bf16.mxu1 %v4566_v1  ;;  %v2450_v4 = vpack.c.bf16 %v3457_v13, %v3456_v35  ;;  %v3464_v13 = vld [vmem:[%s4631_s23 + $0x81] sm:$0xff] }
 0x18d   : > { %v2451_v17 = vpack.c.bf16 %v3459_v15, %v3458_v50  ;;  %v3465_v50 = vld [vmem:[%s4631_s23 + $0x89] sm:$0x7f]  ;;  %v3466_v15 = vld [vmem:[%s4631_s23 + $0x91] sm:$0xff] }
 0x18f   : > { %4392 = vmatpush3.bf16.msra.mxu0 %v5375_v31  ;;  %4404 = vmatpush3.bf16.msra.mxu1 %v5375_v31 }
 0x190   : > { %4393 = vmatprep.subr.bf16.mxu0 %v4566_v1  ;;  %4405 = vmatprep.subr.bf16.mxu1 %v4566_v1 }
 0x193   : > { %4394 = vmatpush3.bf16.msra.mxu0 %v5388_v45  ;;  %4406 = vmatpush3.bf16.msra.mxu1 %v5388_v45 }
 0x194   : > { %4411 = vmatprep.subr.bf16.mxu0 %v4566_v1  ;;  %4423 = vmatprep.subr.bf16.mxu1 %v4566_v1 }
 0x196   : > { %4396 = vmatmul.mubr.msk.bf16.vlgmr.msra.gmra.mrb[96].mxu0 %vm303_vm1, %v2450_v4  ;;  %4408 = vmatmul.mubr.msk.bf16.vlgmr.msra.gmra.mrb[96].mxu1 %vm303_vm1, %v2451_v17  ;;  %v3467_v4 = vld [vmem:[%s4631_s23 + $0x99] sm:$0x7f] }
 0x197   : > { %4412 = vmatpush3.bf16.msra.mxu0 %v5345_v48  ;;  %4424 = vmatpush3.bf16.msra.mxu1 %v5345_v48 }
 0x198   : > { %4413 = vmatprep.subr.bf16.mxu0 %v4566_v1  ;;  %4425 = vmatprep.subr.bf16.mxu1 %v4566_v1 }
 0x199   : > { %v1333_v16 = vpop.f32.mrb[44].mxu0  ;;  %v1377_v52 = vpop.f32.mrb[44].mxu1  ;;  %4419 = vmatprep.mubr.msk.bf16.mxu0 %vm4567_vm0, %v4566_v1  ;;  %4431 = vmatprep.mubr.msk.bf16.mxu1 %vm4567_vm0, %v4566_v1 }
 0x19a   : > { %v5489_v55 = vadd.f32 %v1333_v16, %v5180_v2  ;;  %v5492_v23 = vadd.f32 %v1377_v52, %v5212_v6  ;;  %v4085_v26 = vpop.f32.mrb[45].mxu0  ;;  %v4097_v27 = vpop.f32.mrb[45].mxu1 }
 0x19b   : > { %v1336_v28 = vpop.f32.mrb[46].mxu0  ;;  %v1380_v39 = vpop.f32.mrb[46].mxu1  ;;  %4414 = vmatpush3.bf16.msra.mxu0 %v5356_v38  ;;  %4426 = vmatpush3.bf16.msra.mxu1 %v5356_v38 }
 0x19c   : > { %v5497_v57 = vadd.f32 %v1336_v28, %v5188_v19  ;;  %v5500_v2 = vadd.f32 %v1380_v39, %v5220_v33  ;;  %v4086_v41 = vpop.f32.mrb[47].mxu0  ;;  %v4098_v6 = vpop.f32.mrb[47].mxu1  ;;  %4415 = vmatprep.subr.bf16.mxu0 %v4566_v1  ;;  %4427 = vmatprep.subr.bf16.mxu1 %v4566_v1  ;;  %v2452_v19 = vpack.c.bf16 %v3461_v42, %v3460_v30  ;;  %v3468_v42 = vld [vmem:[%s4631_s23 + $0xa1] sm:$0xff] }
 0x19d   : > { %v2453_v33 = vpack.c.bf16 %v3463_v51, %v3462_v43  ;;  %v3469_v43 = vld [vmem:[%s4631_s23 + $0xa9] sm:$0x7f]  ;;  %v3470_v51 = vld [vmem:[%s4631_s23 + $0xb1] sm:$0xff] }
 0x19f   : > { %4416 = vmatpush3.bf16.msra.mxu0 %v5375_v31  ;;  %4428 = vmatpush3.bf16.msra.mxu1 %v5375_v31 }
 0x1a0   : > { %4417 = vmatprep.subr.bf16.mxu0 %v4566_v1  ;;  %4429 = vmatprep.subr.bf16.mxu1 %v4566_v1 }
 0x1a3   : > { %4418 = vmatpush3.bf16.msra.mxu0 %v5388_v45  ;;  %4430 = vmatpush3.bf16.msra.mxu1 %v5388_v45 }
 0x1a4   : > { %4435 = vmatprep.subr.bf16.mxu0 %v4566_v1  ;;  %4447 = vmatprep.subr.bf16.mxu1 %v4566_v1 }
 0x1a6   : > { %4420 = vmatmul.mubr.msk.bf16.vlgmr.msra.gmra.mrb[100].mxu0 %vm303_vm1, %v2452_v19  ;;  %4432 = vmatmul.mubr.msk.bf16.vlgmr.msra.gmra.mrb[100].mxu1 %vm303_vm1, %v2453_v33  ;;  %v3471_v19 = vld [vmem:[%s4631_s23 + $0xb9] sm:$0x7f] }
 0x1a7   : > { %4436 = vmatpush3.bf16.msra.mxu0 %v5345_v48  ;;  %4448 = vmatpush3.bf16.msra.mxu1 %v5345_v48 }
 0x1a8   : > { %4437 = vmatprep.subr.bf16.mxu0 %v4566_v1  ;;  %4449 = vmatprep.subr.bf16.mxu1 %v4566_v1 }
 0x1a9   : > { %v1421_v3 = vpop.f32.mrb[48].mxu0  ;;  %v1465_v34 = vpop.f32.mrb[48].mxu1  ;;  %4443 = vmatprep.mubr.msk.bf16.mxu0 %vm4567_vm0, %v4566_v1  ;;  %4455 = vmatprep.mubr.msk.bf16.mxu1 %vm4567_vm0, %v4566_v1 }
 0x1aa   : > { %v5527_v40 = vadd.f32 %v1421_v3, %v5214_v8  ;;  %v5530_v60 = vadd.f32 %v1465_v34, %v5246_v12  ;;  %v4109_v61 = vpop.f32.mrb[49].mxu0  ;;  %v4121_v62 = vpop.f32.mrb[49].mxu1 }
 0x1ab   : > { %v1424_v5 = vpop.f32.mrb[50].mxu0  ;;  %v1468_v9 = vpop.f32.mrb[50].mxu1  ;;  %4438 = vmatpush3.bf16.msra.mxu0 %v5356_v38  ;;  %4450 = vmatpush3.bf16.msra.mxu1 %v5356_v38 }
 0x1ac   : > { %v5535_v63 = vadd.f32 %v1424_v5, %v5222_v36  ;;  %v5538_v8 = vadd.f32 %v1468_v9, %v5254_v54  ;;  %v4110_v35 = vpop.f32.mrb[51].mxu0  ;;  %v4122_v12 = vpop.f32.mrb[51].mxu1  ;;  %4439 = vmatprep.subr.bf16.mxu0 %v4566_v1  ;;  %4451 = vmatprep.subr.bf16.mxu1 %v4566_v1  ;;  %v2454_v36 = vpack.c.bf16 %v3465_v50, %v3464_v13  ;;  %v3472_v50 = vld [vmem:[%s4631_s23 + $0xc1] sm:$0xff] }
 0x1ad   : > { %v2455_v54 = vpack.c.bf16 %v3467_v4, %v3466_v15  ;;  %v3473_v15 = vld [vmem:[%s4631_s23 + $0xc9] sm:$0x7f]  ;;  %v3474_v4 = vld [vmem:[%s4631_s23 + $0xd1] sm:$0xff] }
 0x1af   : > { %4440 = vmatpush3.bf16.msra.mxu0 %v5375_v31  ;;  %4452 = vmatpush3.bf16.msra.mxu1 %v5375_v31 }
 0x1b0   : > { %4441 = vmatprep.subr.bf16.mxu0 %v4566_v1  ;;  %4453 = vmatprep.subr.bf16.mxu1 %v4566_v1 }
 0x1b3   : > { %4442 = vmatpush3.bf16.msra.mxu0 %v5388_v45  ;;  %4454 = vmatpush3.bf16.msra.mxu1 %v5388_v45 }
 0x1b4   : > { %4459 = vmatprep.subr.bf16.mxu0 %v4566_v1  ;;  %4471 = vmatprep.subr.bf16.mxu1 %v4566_v1 }
 0x1b6   : > { %4444 = vmatmul.mubr.msk.bf16.vlgmr.msra.gmra.mrb[104].mxu0 %vm303_vm1, %v2454_v36  ;;  %4456 = vmatmul.mubr.msk.bf16.vlgmr.msra.gmra.mrb[104].mxu1 %vm303_vm1, %v2455_v54  ;;  %v3475_v36 = vld [vmem:[%s4631_s23 + $0xd9] sm:$0x7f] }
 0x1b7   : > { %4460 = vmatpush3.bf16.msra.mxu0 %v5345_v48  ;;  %4472 = vmatpush3.bf16.msra.mxu1 %v5345_v48 }
 0x1b8   : > { %4461 = vmatprep.subr.bf16.mxu0 %v4566_v1  ;;  %4473 = vmatprep.subr.bf16.mxu1 %v4566_v1 }
 0x1b9   : > { %v1509_v17 = vpop.f32.mrb[52].mxu0  ;;  %v1553_v16 = vpop.f32.mrb[52].mxu1  ;;  %4467 = vmatprep.mubr.msk.bf16.mxu0 %vm4567_vm0, %v4566_v1  ;;  %4479 = vmatprep.mubr.msk.bf16.mxu1 %vm4567_vm0, %v4566_v1 }
 0x1ba   : > { %v5565_v52 = vadd.f32 %v1509_v17, %v5248_v14  ;;  %v5568_v26 = vadd.f32 %v1553_v16, %v5280_v18  ;;  %v4133_v27 = vpop.f32.mrb[53].mxu0  ;;  %v4145_v28 = vpop.f32.mrb[53].mxu1 }
 0x1bb   : > { %v1512_v39 = vpop.f32.mrb[54].mxu0  ;;  %v1556_v41 = vpop.f32.mrb[54].mxu1  ;;  %4462 = vmatpush3.bf16.msra.mxu0 %v5356_v38  ;;  %4474 = vmatpush3.bf16.msra.mxu1 %v5356_v38 }
 0x1bc   : > { %v5573_v6 = vadd.f32 %v1512_v39, %v5256_v56  ;;  %v5576_v14 = vadd.f32 %v1556_v41, %v5288_v10  ;;  %v4134_v30 = vpop.f32.mrb[55].mxu0  ;;  %v4146_v18 = vpop.f32.mrb[55].mxu1  ;;  %4463 = vmatprep.subr.bf16.mxu0 %v4566_v1  ;;  %4475 = vmatprep.subr.bf16.mxu1 %v4566_v1  ;;  %v2456_v56 = vpack.c.bf16 %v3469_v43, %v3468_v42  ;;  %v3476_v42 = vld [vmem:[%s4631_s23 + $0xe1] sm:$0xff]  ;;  %v3477_v43 = vld [vmem:[%s4631_s23 + $0xe9] sm:$0x7f] }
 0x1bd   : > { %v2457_v10 = vpack.c.bf16 %v3471_v19, %v3470_v51  ;;  %v3478_v51 = vld [vmem:[%s4631_s23 + $0xf1] sm:$0xff] }
 0x1bf   : > { %4464 = vmatpush3.bf16.msra.mxu0 %v5375_v31  ;;  %4476 = vmatpush3.bf16.msra.mxu1 %v5375_v31 }
 0x1c0   : > { %4465 = vmatprep.subr.bf16.mxu0 %v4566_v1  ;;  %4477 = vmatprep.subr.bf16.mxu1 %v4566_v1 }
 0x1c3   : > { %4466 = vmatpush3.bf16.msra.mxu0 %v5388_v45  ;;  %4478 = vmatpush3.bf16.msra.mxu1 %v5388_v45 }
 0x1c4   : > { %4483 = vmatprep.subr.bf16.mxu0 %v4566_v1  ;;  %4495 = vmatprep.subr.bf16.mxu1 %v4566_v1 }
 0x1c6   : > { %4468 = vmatmul.mubr.msk.bf16.vlgmr.msra.gmra.mrb[108].mxu0 %vm303_vm1, %v2456_v56  ;;  %4480 = vmatmul.mubr.msk.bf16.vlgmr.msra.gmra.mrb[108].mxu1 %vm303_vm1, %v2457_v10 }
 0x1c7   : > { %4484 = vmatpush3.bf16.msra.mxu0 %v5345_v48  ;;  %4496 = vmatpush3.bf16.msra.mxu1 %v5345_v48 }
 0x1c8   : > { %4485 = vmatprep.subr.bf16.mxu0 %v4566_v1  ;;  %4497 = vmatprep.subr.bf16.mxu1 %v4566_v1 }
 0x1c9   : > { %v1597_v33 = vpop.f32.mrb[56].mxu0  ;;  %v1641_v3 = vpop.f32.mrb[56].mxu1  ;;  %4491 = vmatprep.mubr.msk.bf16.mxu0 %vm4567_vm0, %v4566_v1  ;;  %4503 = vmatprep.mubr.msk.bf16.mxu1 %vm4567_vm0, %v4566_v1 }
 0x1ca   : > { %v5603_v34 = vadd.f32 %v1597_v33, %v5282_v20  ;;  %v5606_v61 = vadd.f32 %v1641_v3, %v5314_v24  ;;  %v4157_v62 = vpop.f32.mrb[57].mxu0  ;;  %v4169_v5 = vpop.f32.mrb[57].mxu1 }
 0x1cb   : > { %v1600_v9 = vpop.f32.mrb[58].mxu0  ;;  %v1644_v35 = vpop.f32.mrb[58].mxu1  ;;  %4486 = vmatpush3.bf16.msra.mxu0 %v5356_v38  ;;  %4498 = vmatpush3.bf16.msra.mxu1 %v5356_v38 }
 0x1cc   : > { %v5611_v12 = vadd.f32 %v1600_v9, %v5290_v11  ;;  %v5614_v20 = vadd.f32 %v1644_v35, %v5323_v29  ;;  %v4158_v13 = vpop.f32.mrb[59].mxu0  ;;  %v4170_v24 = vpop.f32.mrb[59].mxu1  ;;  %4487 = vmatprep.subr.bf16.mxu0 %v4566_v1  ;;  %4499 = vmatprep.subr.bf16.mxu1 %v4566_v1  ;;  %v2458_v11 = vpack.c.bf16 %v3473_v15, %v3472_v50 }
 0x1cd   : > { %v2459_v29 = vpack.c.bf16 %v3475_v36, %v3474_v4 }
 0x1cf   : > { %4488 = vmatpush3.bf16.msra.mxu0 %v5375_v31  ;;  %4500 = vmatpush3.bf16.msra.mxu1 %v5375_v31 }
 0x1d0   : > { %4489 = vmatprep.subr.bf16.mxu0 %v4566_v1  ;;  %4501 = vmatprep.subr.bf16.mxu1 %v4566_v1 }
 0x1d3   : > { %4490 = vmatpush3.bf16.msra.mxu0 %v5388_v45  ;;  %4502 = vmatpush3.bf16.msra.mxu1 %v5388_v45 }
 0x1d4   : > { %4507 = vmatprep.subr.bf16.mxu0 %v4566_v1  ;;  %4519 = vmatprep.subr.bf16.mxu1 %v4566_v1 }
 0x1d6   : > { %4492 = vmatmul.mubr.msk.bf16.vlgmr.msra.gmra.mrb[112].mxu0 %vm303_vm1, %v2458_v11  ;;  %4504 = vmatmul.mubr.msk.bf16.vlgmr.msra.gmra.mrb[112].mxu1 %vm303_vm1, %v2459_v29 }
 0x1d7   : > { %4508 = vmatpush3.bf16.msra.mxu0 %v5345_v48  ;;  %4520 = vmatpush3.bf16.msra.mxu1 %v5345_v48 }
 0x1d8   : > { %4509 = vmatprep.subr.bf16.mxu0 %v4566_v1  ;;  %4521 = vmatprep.subr.bf16.mxu1 %v4566_v1 }
 0x1d9   : > { %v1764_v54 = vpop.f32.mrb[60].mxu0  ;;  %v1808_v17 = vpop.f32.mrb[60].mxu1  ;;  %4515 = vmatprep.mubr.msk.bf16.mxu0 %vm4567_vm0, %v4566_v1  ;;  %4527 = vmatprep.mubr.msk.bf16.mxu1 %vm4567_vm0, %v4566_v1 }
 0x1da   : > { %v5641_v16 = vadd.f32 %v1764_v54, %v5321_v25  ;;  %v5644_v27 = vadd.f32 %v1808_v17, %v5365_v44  ;;  %v4181_v48 = vpop.f32.mrb[61].mxu0  ;;  %v4193_v28 = vpop.f32.mrb[61].mxu1 }
 0x1db   : > { %v1767_v39 = vpop.f32.mrb[62].mxu0  ;;  %v1811_v41 = vpop.f32.mrb[62].mxu1  ;;  %4510 = vmatpush3.bf16.msra.mxu0 %v5356_v38  ;;  %4522 = vmatpush3.bf16.msra.mxu1 %v5356_v38  ;;  %v3479_v38 = vld [vmem:[%s4631_s23 + $0xf9] sm:$0x7f]  ;;  %s4531_s23 = smul.u32 240, %s5885_s13 }
 0x1dc   : > { %v5649_v30 = vadd.f32 %v1767_v39, %v5328_v37  ;;  %v5652_v25 = vadd.f32 %v1811_v41, %v5378_v0  ;;  %v4182_v18 = vpop.f32.mrb[63].mxu0  ;;  %v4194_v44 = vpop.f32.mrb[63].mxu1  ;;  %4511 = vmatprep.subr.bf16.mxu0 %v4566_v1  ;;  %4523 = vmatprep.subr.bf16.mxu1 %v4566_v1  ;;  %v2460_v37 = vpack.c.bf16 %v3477_v43, %v3476_v42 }
 0x1dd   : > { %v2461_v0 = vpack.c.bf16 %v3479_v38, %v3478_v51  ;;  %s5758_s29 = scalar_lea.vmem %s5883_s3, %s4531_s23 }
 0x1df   : > { %4512 = vmatpush3.bf16.msra.mxu0 %v5375_v31  ;;  %4524 = vmatpush3.bf16.msra.mxu1 %v5375_v31 }
 0x1e0   : > { %4513 = vmatprep.subr.bf16.mxu0 %v4566_v1  ;;  %4525 = vmatprep.subr.bf16.mxu1 %v4566_v1 }
 0x1e3   : > { %4514 = vmatpush3.bf16.msra.mxu0 %v5388_v45  ;;  %4526 = vmatpush3.bf16.msra.mxu1 %v5388_v45 }
 0x1e6   : > { %4516 = vmatmul.mubr.msk.bf16.vlgmr.msra.gmra.mrb[116].mxu0 %vm303_vm1, %v2460_v37  ;;  %4528 = vmatmul.mubr.msk.bf16.vlgmr.msra.gmra.mrb[116].mxu1 %vm303_vm1, %v2461_v0 }
 0x1e9   : > { %v1852_v19 = vpop.f32.mrb[64].mxu0  ;;  %v1896_v56 = vpop.f32.mrb[64].mxu1 }
 0x1ea   : > { %v5669_v31 = vadd.f32 %v1852_v19, %v5368_v53  ;;  %v5672_v10 = vadd.f32 %v1896_v56, %v5413_v21  ;;  %v4205_v33 = vpop.f32.mrb[65].mxu0  ;;  %v4217_v1 = vpop.f32.mrb[65].mxu1 }
 0x1eb   : > { %v1855_v3 = vpop.f32.mrb[66].mxu0  ;;  %v1899_v62 = vpop.f32.mrb[66].mxu1 }
 0x1ec   : > { %v5675_v5 = vadd.f32 %v1855_v3, %v5381_v46  ;;  %v5678_v45 = vadd.f32 %v1899_v62, %v5421_v32  ;;  %v4206_v9 = vpop.f32.mrb[67].mxu0  ;;  %v4218_v35 = vpop.f32.mrb[67].mxu1 }
 0x1f9   : > { %v1940_v13 = vpop.f32.mrb[68].mxu0  ;;  %v1984_v24 = vpop.f32.mrb[68].mxu1 }
 0x1fa   : > { %v5681_v53 = vadd.f32 %v1940_v13, %v5416_v22  ;;  %v5684_v21 = vadd.f32 %v1984_v24, %v5451_v49  ;;  %v4229_v50 = vpop.f32.mrb[69].mxu0  ;;  %v4241_v15 = vpop.f32.mrb[69].mxu1 }
 0x1fb   : > { %v1943_v4 = vpop.f32.mrb[70].mxu0  ;;  %v1987_v36 = vpop.f32.mrb[70].mxu1 }
 0x1fc   : > { %v5687_v46 = vadd.f32 %v1943_v4, %v5424_v47  ;;  %v5690_v32 = vadd.f32 %v1987_v36, %v5459_v7  ;;  %v4230_v11 = vpop.f32.mrb[71].mxu0  ;;  %v4242_v29 = vpop.f32.mrb[71].mxu1 }
 0x209   : > { %v2028_v54 = vpop.f32.mrb[72].mxu0  ;;  %v2072_v17 = vpop.f32.mrb[72].mxu1 }
 0x20a   : > { %v5693_v22 = vadd.f32 %v2028_v54, %v5454_v58  ;;  %v5696_v49 = vadd.f32 %v2072_v17, %v5489_v55  ;;  %v4253_v48 = vpop.f32.mrb[73].mxu0  ;;  %v4265_v28 = vpop.f32.mrb[73].mxu1 }
 0x20b   : > { %v2031_v39 = vpop.f32.mrb[74].mxu0  ;;  %v2075_v41 = vpop.f32.mrb[74].mxu1 }
 0x20c   : > { %v5699_v47 = vadd.f32 %v2031_v39, %v5462_v59  ;;  %v5702_v7 = vadd.f32 %v2075_v41, %v5497_v57  ;;  %v4254_v18 = vpop.f32.mrb[75].mxu0  ;;  %v4266_v44 = vpop.f32.mrb[75].mxu1 }
 0x219   : > { %v2116_v42 = vpop.f32.mrb[76].mxu0  ;;  %v2160_v43 = vpop.f32.mrb[76].mxu1 }
 0x21a   : > { %v5705_v58 = vadd.f32 %v2116_v42, %v5492_v23  ;;  %v5708_v55 = vadd.f32 %v2160_v43, %v5527_v40  ;;  %v4277_v51 = vpop.f32.mrb[77].mxu0  ;;  %v4289_v38 = vpop.f32.mrb[77].mxu1 }
 0x21b   : > { %v2119_v37 = vpop.f32.mrb[78].mxu0  ;;  %v2163_v0 = vpop.f32.mrb[78].mxu1 }
 0x21c   : > { %v5711_v59 = vadd.f32 %v2119_v37, %v5500_v2  ;;  %v5714_v57 = vadd.f32 %v2163_v0, %v5535_v63  ;;  %v4278_v19 = vpop.f32.mrb[79].mxu0  ;;  %v4290_v56 = vpop.f32.mrb[79].mxu1 }
 0x229   : > { %v2204_v33 = vpop.f32.mrb[80].mxu0  ;;  %v2248_v1 = vpop.f32.mrb[80].mxu1 }
 0x22a   : > { %v5717_v23 = vadd.f32 %v2204_v33, %v5530_v60  ;;  %v5720_v40 = vadd.f32 %v2248_v1, %v5565_v52  ;;  %v4301_v3 = vpop.f32.mrb[81].mxu0  ;;  %v4313_v62 = vpop.f32.mrb[81].mxu1 }
 0x22b   : > { %v2207_v9 = vpop.f32.mrb[82].mxu0  ;;  %v2251_v35 = vpop.f32.mrb[82].mxu1 }
 0x22c   : > { %v5723_v2 = vadd.f32 %v2207_v9, %v5538_v8  ;;  %v5726_v63 = vadd.f32 %v2251_v35, %v5573_v6  ;;  %v4302_v13 = vpop.f32.mrb[83].mxu0  ;;  %v4314_v24 = vpop.f32.mrb[83].mxu1 }
 0x239   : > { %v2292_v50 = vpop.f32.mrb[84].mxu0  ;;  %v2336_v15 = vpop.f32.mrb[84].mxu1 }
 0x23a   : > { %v5729_v60 = vadd.f32 %v2292_v50, %v5568_v26  ;;  %v5732_v52 = vadd.f32 %v2336_v15, %v5603_v34  ;;  %v4325_v4 = vpop.f32.mrb[85].mxu0  ;;  %v4337_v36 = vpop.f32.mrb[85].mxu1  ;;  %v5744_v26 = vld [vmem:[%s5882_s2] ss:$0 sm:$0xff] }
 0x23b   : > { %v2295_v11 = vpop.f32.mrb[86].mxu0  ;;  %v2339_v29 = vpop.f32.mrb[86].mxu1 }
 0x23c   : > { %v5735_v8 = vadd.f32 %v2295_v11, %v5576_v14  ;;  %v5738_v6 = vadd.f32 %v2339_v29, %v5611_v12  ;;  %v4326_v54 = vpop.f32.mrb[87].mxu0  ;;  %v4338_v17 = vpop.f32.mrb[87].mxu1 }
 0x249   : > { %v2380_v48 = vpop.f32.mrb[88].mxu0  ;;  %v2532_v28 = vpop.f32.mrb[88].mxu1 }
 0x24a   : > { %v5747_v34 = vadd.f32 %v2380_v48, %v5606_v61  ;;  %v3155_v39 = vadd.f32 %v2532_v28, %v5641_v16  ;;  %v4349_v14 = vpop.f32.mrb[89].mxu0  ;;  %v4361_v41 = vpop.f32.mrb[89].mxu1 }
 0x24b   : > { %v2383_v18 = vpop.f32.mrb[90].mxu0  ;;  %v2535_v12 = vpop.f32.mrb[90].mxu1 }
 0x24c   : > { %v3192_v44 = vadd.f32 %v5744_v26, %v3155_v39  ;;  %v5752_v42 = vadd.f32 %v2383_v18, %v5614_v20  ;;  %v3156_v43 = vadd.f32 %v2535_v12, %v5649_v30  ;;  %v4350_v51 = vpop.f32.mrb[91].mxu0  ;;  %v4362_v38 = vpop.f32.mrb[91].mxu1 }
 0x24e   : > { %v3222_v61 = vmax.f32 %v3192_v44, 0.0  ;;  %v3193_v16 = vadd.f32 %v5744_v26, %v3156_v43 }
 0x250   : > { %3253 = vst.msk [vmem:[%s5758_s29] sm:$0xff] %vm3252_vm2, %v3222_v61  ;;  %v3223_v20 = vmax.f32 %v3193_v16, 0.0 }
 0x252   : > { %3255 = vst.msk [vmem:[%s5758_s29 + $0x8] sm:$0x7f] %vm3254_vm3, %v3223_v20 }
 0x259   : > { %v2576_v30 = vpop.f32.mrb[92].mxu0  ;;  %v2620_v37 = vpop.f32.mrb[92].mxu1 }
 0x25a   : > { %v3157_v0 = vadd.f32 %v2576_v30, %v5644_v27  ;;  %v3159_v19 = vadd.f32 %v2620_v37, %v5669_v31  ;;  %v4373_v56 = vpop.f32.mrb[93].mxu0  ;;  %v4385_v33 = vpop.f32.mrb[93].mxu1 }
 0x25b   : > { %v2579_v1 = vpop.f32.mrb[94].mxu0  ;;  %v2623_v3 = vpop.f32.mrb[94].mxu1 }
 0x25c   : > { %v3194_v62 = vadd.f32 %v5744_v26, %v3157_v0  ;;  %v3196_v9 = vadd.f32 %v5744_v26, %v3159_v19  ;;  %v3158_v35 = vadd.f32 %v2579_v1, %v5652_v25  ;;  %v3160_v13 = vadd.f32 %v2623_v3, %v5675_v5  ;;  %v4374_v24 = vpop.f32.mrb[95].mxu0  ;;  %v4386_v27 = vpop.f32.mrb[95].mxu1 }
 0x25e   : > { %v3224_v50 = vmax.f32 %v3194_v62, 0.0  ;;  %v3226_v15 = vmax.f32 %v3196_v9, 0.0  ;;  %v3195_v31 = vadd.f32 %v5744_v26, %v3158_v35  ;;  %v3197_v4 = vadd.f32 %v5744_v26, %v3160_v13 }
 0x260   : > { %3256 = vst.msk [vmem:[%s5758_s29 + $0x10] sm:$0xff] %vm3252_vm2, %v3224_v50  ;;  %3258 = vst.msk [vmem:[%s5758_s29 + $0x20] sm:$0xff] %vm3252_vm2, %v3226_v15  ;;  %v3225_v36 = vmax.f32 %v3195_v31, 0.0  ;;  %v3227_v11 = vmax.f32 %v3197_v4, 0.0 }
 0x262   : > { %3257 = vst.msk [vmem:[%s5758_s29 + $0x18] sm:$0x7f] %vm3254_vm3, %v3225_v36  ;;  %3259 = vst.msk [vmem:[%s5758_s29 + $0x28] sm:$0x7f] %vm3254_vm3, %v3227_v11 }
 0x269   : > { %v2664_v25 = vpop.f32.mrb[96].mxu0  ;;  %v2708_v5 = vpop.f32.mrb[96].mxu1 }
 0x26a   : > { %v3161_v29 = vadd.f32 %v2664_v25, %v5672_v10  ;;  %v3163_v54 = vadd.f32 %v2708_v5, %v5681_v53  ;;  %v4397_v17 = vpop.f32.mrb[97].mxu0  ;;  %v4409_v48 = vpop.f32.mrb[97].mxu1 }
 0x26b   : > { %v2667_v28 = vpop.f32.mrb[98].mxu0  ;;  %v2711_v39 = vpop.f32.mrb[98].mxu1 }
 0x26c   : > { %v3198_v14 = vadd.f32 %v5744_v26, %v3161_v29  ;;  %v3200_v41 = vadd.f32 %v5744_v26, %v3163_v54  ;;  %v3162_v18 = vadd.f32 %v2667_v28, %v5678_v45  ;;  %v3164_v12 = vadd.f32 %v2711_v39, %v5687_v46  ;;  %v4398_v44 = vpop.f32.mrb[99].mxu0  ;;  %v4410_v10 = vpop.f32.mrb[99].mxu1 }
 0x26e   : > { %v3228_v43 = vmax.f32 %v3198_v14, 0.0  ;;  %v3230_v51 = vmax.f32 %v3200_v41, 0.0  ;;  %v3199_v53 = vadd.f32 %v5744_v26, %v3162_v18  ;;  %v3201_v38 = vadd.f32 %v5744_v26, %v3164_v12 }
 0x270   : > { %3260 = vst.msk [vmem:[%s5758_s29 + $0x30] sm:$0xff] %vm3252_vm2, %v3228_v43  ;;  %3262 = vst.msk [vmem:[%s5758_s29 + $0x40] sm:$0xff] %vm3252_vm2, %v3230_v51  ;;  %v3229_v61 = vmax.f32 %v3199_v53, 0.0  ;;  %v3231_v16 = vmax.f32 %v3201_v38, 0.0 }
 0x272   : > { %3261 = vst.msk [vmem:[%s5758_s29 + $0x38] sm:$0x7f] %vm3254_vm3, %v3229_v61  ;;  %3263 = vst.msk [vmem:[%s5758_s29 + $0x48] sm:$0x7f] %vm3254_vm3, %v3231_v16 }
 0x279   : > { %v2752_v45 = vpop.f32.mrb[100].mxu0  ;;  %v2796_v46 = vpop.f32.mrb[100].mxu1 }
 0x27a   : > { %v3165_v20 = vadd.f32 %v2752_v45, %v5684_v21  ;;  %v3167_v30 = vadd.f32 %v2796_v46, %v5693_v22  ;;  %v4421_v37 = vpop.f32.mrb[101].mxu0  ;;  %v4433_v0 = vpop.f32.mrb[101].mxu1 }
 0x27b   : > { %v2755_v19 = vpop.f32.mrb[102].mxu0  ;;  %v2799_v56 = vpop.f32.mrb[102].mxu1 }
 0x27c   : > { %v3202_v33 = vadd.f32 %v5744_v26, %v3165_v20  ;;  %v3204_v1 = vadd.f32 %v5744_v26, %v3167_v30  ;;  %v3166_v3 = vadd.f32 %v2755_v19, %v5690_v32  ;;  %v3168_v62 = vadd.f32 %v2799_v56, %v5699_v47  ;;  %v4422_v9 = vpop.f32.mrb[103].mxu0  ;;  %v4434_v21 = vpop.f32.mrb[103].mxu1 }
 0x27e   : > { %v3232_v35 = vmax.f32 %v3202_v33, 0.0  ;;  %v3234_v13 = vmax.f32 %v3204_v1, 0.0  ;;  %v3203_v22 = vadd.f32 %v5744_v26, %v3166_v3  ;;  %v3205_v24 = vadd.f32 %v5744_v26, %v3168_v62 }
 0x280   : > { %3264 = vst.msk [vmem:[%s5758_s29 + $0x50] sm:$0xff] %vm3252_vm2, %v3232_v35  ;;  %3266 = vst.msk [vmem:[%s5758_s29 + $0x60] sm:$0xff] %vm3252_vm2, %v3234_v13  ;;  %v3233_v27 = vmax.f32 %v3203_v22, 0.0  ;;  %v3235_v50 = vmax.f32 %v3205_v24, 0.0 }
 0x282   : > { %3265 = vst.msk [vmem:[%s5758_s29 + $0x58] sm:$0x7f] %vm3254_vm3, %v3233_v27  ;;  %3267 = vst.msk [vmem:[%s5758_s29 + $0x68] sm:$0x7f] %vm3254_vm3, %v3235_v50 }
 0x289   : > { %v2840_v32 = vpop.f32.mrb[104].mxu0  ;;  %v2884_v47 = vpop.f32.mrb[104].mxu1 }
 0x28a   : > { %v3169_v15 = vadd.f32 %v2840_v32, %v5696_v49  ;;  %v3171_v31 = vadd.f32 %v2884_v47, %v5705_v58  ;;  %v4445_v4 = vpop.f32.mrb[105].mxu0  ;;  %v4457_v36 = vpop.f32.mrb[105].mxu1 }
 0x28b   : > { %v2843_v11 = vpop.f32.mrb[106].mxu0  ;;  %v2887_v25 = vpop.f32.mrb[106].mxu1 }
 0x28c   : > { %v3206_v5 = vadd.f32 %v5744_v26, %v3169_v15  ;;  %v3208_v29 = vadd.f32 %v5744_v26, %v3171_v31  ;;  %v3170_v54 = vadd.f32 %v2843_v11, %v5702_v7  ;;  %v3172_v17 = vadd.f32 %v2887_v25, %v5711_v59  ;;  %v4446_v48 = vpop.f32.mrb[107].mxu0  ;;  %v4458_v49 = vpop.f32.mrb[107].mxu1 }
 0x28e   : > { %v3236_v28 = vmax.f32 %v3206_v5, 0.0  ;;  %v3238_v39 = vmax.f32 %v3208_v29, 0.0  ;;  %v3207_v58 = vadd.f32 %v5744_v26, %v3170_v54  ;;  %v3209_v14 = vadd.f32 %v5744_v26, %v3172_v17 }
 0x290   : > { %3268 = vst.msk [vmem:[%s5758_s29 + $0x70] sm:$0xff] %vm3252_vm2, %v3236_v28  ;;  %3270 = vst.msk [vmem:[%s5758_s29 + $0x80] sm:$0xff] %vm3252_vm2, %v3238_v39  ;;  %v3237_v41 = vmax.f32 %v3207_v58, 0.0  ;;  %v3239_v18 = vmax.f32 %v3209_v14, 0.0 }
 0x292   : > { %3269 = vst.msk [vmem:[%s5758_s29 + $0x78] sm:$0x7f] %vm3254_vm3, %v3237_v41  ;;  %3271 = vst.msk [vmem:[%s5758_s29 + $0x88] sm:$0x7f] %vm3254_vm3, %v3239_v18 }
 0x299   : > { %v2928_v7 = vpop.f32.mrb[108].mxu0  ;;  %v2972_v59 = vpop.f32.mrb[108].mxu1 }
 0x29a   : > { %v3173_v12 = vadd.f32 %v2928_v7, %v5708_v55  ;;  %v3175_v44 = vadd.f32 %v2972_v59, %v5717_v23  ;;  %v4469_v10 = vpop.f32.mrb[109].mxu0  ;;  %v4481_v43 = vpop.f32.mrb[109].mxu1 }
 0x29b   : > { %v2931_v51 = vpop.f32.mrb[110].mxu0  ;;  %v2975_v53 = vpop.f32.mrb[110].mxu1 }
 0x29c   : > { %v3210_v38 = vadd.f32 %v5744_v26, %v3173_v12  ;;  %v3212_v61 = vadd.f32 %v5744_v26, %v3175_v44  ;;  %v3174_v16 = vadd.f32 %v2931_v51, %v5714_v57  ;;  %v3176_v45 = vadd.f32 %v2975_v53, %v5723_v2  ;;  %v4470_v46 = vpop.f32.mrb[111].mxu0  ;;  %v4482_v55 = vpop.f32.mrb[111].mxu1 }
 0x29e   : > { %v3240_v20 = vmax.f32 %v3210_v38, 0.0  ;;  %v3242_v30 = vmax.f32 %v3212_v61, 0.0  ;;  %v3211_v23 = vadd.f32 %v5744_v26, %v3174_v16  ;;  %v3213_v37 = vadd.f32 %v5744_v26, %v3176_v45 }
 0x2a0   : > { %3272 = vst.msk [vmem:[%s5758_s29 + $0x90] sm:$0xff] %vm3252_vm2, %v3240_v20  ;;  %3274 = vst.msk [vmem:[%s5758_s29 + $0xa0] sm:$0xff] %vm3252_vm2, %v3242_v30  ;;  %v3241_v0 = vmax.f32 %v3211_v23, 0.0  ;;  %v3243_v19 = vmax.f32 %v3213_v37, 0.0 }
 0x2a2   : > { %3273 = vst.msk [vmem:[%s5758_s29 + $0x98] sm:$0x7f] %vm3254_vm3, %v3241_v0  ;;  %3275 = vst.msk [vmem:[%s5758_s29 + $0xa8] sm:$0x7f] %vm3254_vm3, %v3243_v19 }
 0x2a9   : > { %v3016_v57 = vpop.f32.mrb[112].mxu0  ;;  %v3060_v2 = vpop.f32.mrb[112].mxu1 }
 0x2aa   : > { %v3177_v56 = vadd.f32 %v3016_v57, %v5720_v40  ;;  %v3179_v33 = vadd.f32 %v3060_v2, %v5729_v60  ;;  %v4493_v1 = vpop.f32.mrb[113].mxu0  ;;  %v4505_v3 = vpop.f32.mrb[113].mxu1 }
 0x2ab   : > { %v3019_v62 = vpop.f32.mrb[114].mxu0  ;;  %v3063_v9 = vpop.f32.mrb[114].mxu1 }
 0x2ac   : > { %v3214_v21 = vadd.f32 %v5744_v26, %v3177_v56  ;;  %v3216_v35 = vadd.f32 %v5744_v26, %v3179_v33  ;;  %v3178_v13 = vadd.f32 %v3019_v62, %v5726_v63  ;;  %v3180_v22 = vadd.f32 %v3063_v9, %v5735_v8  ;;  %v4494_v24 = vpop.f32.mrb[115].mxu0  ;;  %v4506_v40 = vpop.f32.mrb[115].mxu1 }
 0x2ae   : > { %v3244_v27 = vmax.f32 %v3214_v21, 0.0  ;;  %v3246_v50 = vmax.f32 %v3216_v35, 0.0  ;;  %v3215_v60 = vadd.f32 %v5744_v26, %v3178_v13  ;;  %v3217_v32 = vadd.f32 %v5744_v26, %v3180_v22 }
 0x2b0   : > { %3276 = vst.msk [vmem:[%s5758_s29 + $0xb0] sm:$0xff] %vm3252_vm2, %v3244_v27  ;;  %3278 = vst.msk [vmem:[%s5758_s29 + $0xc0] sm:$0xff] %vm3252_vm2, %v3246_v50  ;;  %v3245_v47 = vmax.f32 %v3215_v60, 0.0  ;;  %v3247_v15 = vmax.f32 %v3217_v32, 0.0 }
 0x2b2   : > { %3277 = vst.msk [vmem:[%s5758_s29 + $0xb8] sm:$0x7f] %vm3254_vm3, %v3245_v47  ;;  %3279 = vst.msk [vmem:[%s5758_s29 + $0xc8] sm:$0x7f] %vm3254_vm3, %v3247_v15 }
 0x2b9   : > { %v3104_v63 = vpop.f32.mrb[116].mxu0  ;;  %v3148_v8 = vpop.f32.mrb[116].mxu1 }
 0x2ba   : > { %v3181_v31 = vadd.f32 %v3104_v63, %v5732_v52  ;;  %v3183_v4 = vadd.f32 %v3148_v8, %v5747_v34  ;;  %v4517_v36 = vpop.f32.mrb[117].mxu0  ;;  %v4529_v11 = vpop.f32.mrb[117].mxu1 }
 0x2bb   : > { %v3107_v25 = vpop.f32.mrb[118].mxu0  ;;  %v3151_v5 = vpop.f32.mrb[118].mxu1 }
 0x2bc   : > { %v3218_v29 = vadd.f32 %v5744_v26, %v3181_v31  ;;  %v3220_v54 = vadd.f32 %v5744_v26, %v3183_v4  ;;  %v3182_v17 = vadd.f32 %v3107_v25, %v5738_v6  ;;  %v3184_v48 = vadd.f32 %v3151_v5, %v5752_v42  ;;  %v4518_v49 = vpop.f32.mrb[119].mxu0  ;;  %v4530_v52 = vpop.f32.mrb[119].mxu1 }
 0x2be   : > { %v3248_v28 = vmax.f32 %v3218_v29, 0.0  ;;  %v3250_v39 = vmax.f32 %v3220_v54, 0.0  ;;  %v3219_v34 = vadd.f32 %v5744_v26, %v3182_v17  ;;  %v3221_v58 = vadd.f32 %v5744_v26, %v3184_v48 }
 0x2c0   : > { %3280 = vst.msk [vmem:[%s5758_s29 + $0xd0] sm:$0xff] %vm3252_vm2, %v3248_v28  ;;  %3282 = vst.msk [vmem:[%s5758_s29 + $0xe0] sm:$0xff] %vm3252_vm2, %v3250_v39  ;;  %v3249_v14 = vmax.f32 %v3219_v34, 0.0  ;;  %v3251_v41 = vmax.f32 %v3221_v58, 0.0 }
 0x2c2   : > { %3281 = vst.msk [vmem:[%s5758_s29 + $0xd8] sm:$0x7f] %vm3254_vm3, %v3249_v14  ;;  %3283 = vst.msk [vmem:[%s5758_s29 + $0xe8] sm:$0x7f] %vm3254_vm3, %v3251_v41 }
 0x2c3 PF: > { %s13_s12 = sadd.s32 1, %s4564_s12  }
 0x2c4   : > { %p10_p4 = scmp.ge.s32.totalorder %s13_s12, 4  }
 0x2c6   :  { %12 = sbr.rel (!%p10_p4) target bundleno = 1 (0x1), region = 66 }

// kernel: atari_critic_forward.3
= control target key start
LH: loop header
LB: loop body
LE: loop exit
PB: predicated region body
PF: predicated region fallthrough
CT: control target
= control target key end

     0   :  { %14 = vsyncpa [#allocation5], 0  ;;  %s8925_s0 = inlined_call_operand.vmem [shape: f32[2,7,7,128], index: 0, kind: input, shape index: {}]   ;;  %s8926_s1 = inlined_call_operand.vmem [shape: bf16[4,128,64], index: 1, kind: input, shape index: {}]   ;;  %s8927_s2 = inlined_call_operand.vmem [shape: f32[1,64], index: 2, kind: input, shape index: {}]   ;;  %s8928_s3 = inlined_call_operand.vmem [shape: bf16[9,64,64], index: 3, kind: input, shape index: {}]   ;;  %s8929_s4 = inlined_call_operand.vmem [shape: f32[1,64], index: 4, kind: input, shape index: {}]   ;;  %s8930_s5 = inlined_call_operand.vmem [shape: bf16[16,64,128], index: 5, kind: input, shape index: {}]   ;;  %s8931_s6 = inlined_call_operand.vmem [shape: f32[1,128], index: 6, kind: input, shape index: {}]   ;;  %s8932_s7 = inlined_call_operand.vmem [shape: bf16[128,6], index: 7, kind: input, shape index: {}]   ;;  %s8933_s8 = inlined_call_operand.vmem [shape: f32[1,6], index: 8, kind: input, shape index: {}]   ;;  %s8934_s9 = inlined_call_operand.hbm [shape: f32[2,1,6], index: 9, kind: output, shape index: {}]  }
   0x1   :  { %16 = vsyncpa [#allocation5 + $0x1], 0  ;;  %s7401_s30 = smov 0   ;;  %s7403_s10 = smov 0  }
   0x2   :  { %s7405_s11 = smov 0   ;;  %s7407_s12 = smov 0  }
   0x3 LB: > { %s7422_s13 = sadd.s32 4294967295, %s7346_s12   ;;  %s5047_s14 = sadd.s32 4294967294, %s7346_s12   ;;  %s7346_s12 = sphi %s7407_s12, %s8940_s12   ;;  %s7342_s11 = sphi %s7405_s11, %s8939_s11   ;;  %s7338_s10 = sphi %s7403_s10, %s8938_s10   ;;  %s7334_s30 = sphi %s7401_s30, %s8937_s30  }
   0x4   : > { %s7426_s15 = sadd.s32 1, %s7346_s12   ;;  %s223_s16 = sadd.s32 1, %s7342_s11 }
   0x5   : > { %s220_s17 = ssub.s32 %s7346_s12, %s7426_s15  ;;  %p233_p0 = scmp.ne.s32.totalorder %s7342_s11, %s7338_s10 }
   0x6   : > { %p221_p1 = scmp.eq.s32.totalorder %s220_s17, 0  ;;  %p234_p2 = scmp.eq.s32.totalorder %s7422_s13, 1 }
   0x7   : > { %p239_p3 = scmp.ne.s32.totalorder %s7338_s10, %s7334_s30  ;;  %p240_p4 = scmp.eq.s32.totalorder %s5047_s14, 1 }
   0x8   : > { %s7437_s18 = scalar_select %p221_p1, %s7342_s11, %s223_s16  }
   0x9   : > { %p7439_p5 = por %p234_p2, %p233_p0  ;;  %p7443_p6 = por %p240_p4, %p239_p3 }
   0xa   : > { %p5050_p7 = scmp.ge.s32.totalorder %s7346_s12, 1  ;;  %p290_p8 = scmp.lt.s32.totalorder %s7346_s12, 3 }
   0xc   : > { %p291_p9 = pnand %p5050_p7, %p290_p8 }
   0xd   : > { %v7452_v0 = vld [vmem:[%s8926_s1 + $0x40] sm:$0xff] (!%p291_p9)   ;;  %v7348_v1 = vmov (!%p291_p9), 0.0   ;;  %v7461_v2 = vld [vmem:[%s8926_s1 + $0x48] sm:$0xff] (!%p291_p9)   ;;  %vm7349_vm0 = vmmov (!%p291_p9), 0   ;;  %v7474_v3 = vld [vmem:[%s8926_s1 + $0x50] sm:$0xff] (!%p291_p9)   ;;  %p325_p10 = scmp.lt.s32.totalorder (!%p291_p9), %s7422_s13, 1 }
   0xe   : > { %294 = sbr.rel (%p291_p9) target bundleno = 1624 (0x658), region = 56  ;;  %5978 = vmatprep.subr.bf16.mxu0 (!%p291_p9), %v7348_v1  ;;  %5998 = vmatprep.subr.bf16.mxu1 (!%p291_p9), %v7348_v1  ;;  %v7484_v4 = vld [vmem:[%s8926_s1 + $0x58] sm:$0xff] (!%p291_p9)   ;;  %v7494_v5 = vld [vmem:[%s8926_s1 + $0x60] sm:$0xff] (!%p291_p9)   ;;  %v7503_v6 = vld [vmem:[%s8926_s1 + $0x68] sm:$0xff] (!%p291_p9)   ;;  %vm1630_vm1 = vcmask (!%p291_p9), 521216   ;;  %vm1694_vm2 = vcmask (!%p291_p9), 523264  }
   0xf   : > { %5979 = vmatpush3.bf16.msra.mxu0 (!%p291_p9), %v7452_v0  ;;  %5999 = vmatpush3.bf16.msra.mxu1 (!%p291_p9), %v7452_v0  ;;  %v7510_v7 = vld [vmem:[%s8926_s1 + $0x70] sm:$0xff] (!%p291_p9)   ;;  %v7524_v8 = vld [vmem:[%s8926_s1 + $0x78] sm:$0xff] (!%p291_p9)   ;;  %v7613_v21 = vld [vmem:[%s8926_s1] sm:$0xff] (!%p291_p9)   ;;  %vm3599_vm3 = vcmask (!%p291_p9), 519168   ;;  %s323_s28 = sand.u32 (!%p291_p9), 1, %s7338_s10   ;;  %s5490_s16 = sshll.u32 (!%p291_p9), %s7422_s13, 4 }
  0x10   : > { %5980 = vmatprep.subr.bf16.mxu0 (!%p291_p9), %v7348_v1  ;;  %6000 = vmatprep.subr.bf16.mxu1 (!%p291_p9), %v7348_v1  ;;  %v7620_v22 = vld [vmem:[%s8926_s1 + $0x8] sm:$0xff] (!%p291_p9)   ;;  %v7629_v23 = vld [vmem:[%s8926_s1 + $0x10] sm:$0xff] (!%p291_p9)   ;;  %v7644_v24 = vld [vmem:[%s8926_s1 + $0x18] sm:$0xff] (!%p291_p9)   ;;  %vm4977_vm4 = vcmask (!%p291_p9), 40960   ;;  %s8883_s23 = scalar_lea.hbm (!%p291_p9), %s8934_s9, %s5490_s16  ;;  %s7350_s25 = smov (!%p291_p9), [#allocation4]  }
  0x11   : > { %5994 = vmatprep.mubr.msk.bf16.mxu0 (!%p291_p9), %vm7349_vm0, %v7348_v1  ;;  %6014 = vmatprep.mubr.msk.bf16.mxu1 (!%p291_p9), %vm7349_vm0, %v7348_v1  ;;  %v7653_v25 = vld [vmem:[%s8926_s1 + $0x20] sm:$0xff] (!%p291_p9)   ;;  %v7662_v26 = vld [vmem:[%s8926_s1 + $0x28] sm:$0xff] (!%p291_p9)   ;;  %v7671_v27 = vld [vmem:[%s8926_s1 + $0x30] sm:$0xff] (!%p291_p9)   ;;  %s7288_s26 = sshll.u32 (!%p291_p9), %s7350_s25, 4  ;;  %s7289_s26 = int_to_ptr.vmem [resolvable:$false] %s7288_s26 }
  0x12   : > { %v7680_v28 = vld [vmem:[%s8926_s1 + $0x38] sm:$0xff] (!%p291_p9)   ;;  %v7767_v41 = vld [vmem:[%s8926_s1 + $0x80] sm:$0xff] (!%p291_p9)   ;;  %v7776_v42 = vld [vmem:[%s8926_s1 + $0x88] sm:$0xff] (!%p291_p9)  }
  0x13   : > { %5981 = vmatpush3.bf16.msra.mxu0 (!%p291_p9), %v7461_v2  ;;  %6001 = vmatpush3.bf16.msra.mxu1 (!%p291_p9), %v7461_v2  ;;  %v7789_v43 = vld [vmem:[%s8926_s1 + $0x90] sm:$0xff] (!%p291_p9)   ;;  %v7798_v44 = vld [vmem:[%s8926_s1 + $0x98] sm:$0xff] (!%p291_p9)   ;;  %v7807_v45 = vld [vmem:[%s8926_s1 + $0xa0] sm:$0xff] (!%p291_p9)  }
  0x14   : > { %5982 = vmatprep.subr.bf16.mxu0 (!%p291_p9), %v7348_v1  ;;  %6002 = vmatprep.subr.bf16.mxu1 (!%p291_p9), %v7348_v1  ;;  %v7816_v46 = vld [vmem:[%s8926_s1 + $0xa8] sm:$0xff] (!%p291_p9)   ;;  %v7825_v47 = vld [vmem:[%s8926_s1 + $0xb0] sm:$0xff] (!%p291_p9)   ;;  %v7834_v48 = vld [vmem:[%s8926_s1 + $0xb8] sm:$0xff] (!%p291_p9)  }
  0x15   : > { %s326_s29 = scalar_select %p325_p10, %s7422_s13, 1 }
  0x16   : > { %s4980_s13 = scalar_lea.sflag [#allocation5], %s323_s28 }
  0x17   : > { %5983 = vmatpush3.bf16.msra.mxu0 %v7474_v3  ;;  %6003 = vmatpush3.bf16.msra.mxu1 %v7474_v3  ;;  %s7102_s17 = smul.u32 56, %s326_s29  ;;  %s7290_s29 = scalar_lea.vmem %s7289_s26, 32 }
  0x18   : > { %5984 = vmatprep.subr.bf16.mxu0 %v7348_v1  ;;  %6004 = vmatprep.subr.bf16.mxu1 %v7348_v1 }
  0x19   : > { %s7515_s27 = scalar_lea.vmem %s8925_s0, %s7102_s17  ;;  %s324_s17 = scalar_lea.vmem [#allocation4], %s323_s28 }
  0x1a   : > { %v359_v9 = vld [vmem:[%s7515_s27 + $0x1] sm:$0x3f]  ;;  %v360_v10 = vld [vmem:[%s7515_s27 + $0x9] sm:$0x3f]  ;;  %v361_v13 = vld [vmem:[%s7515_s27 + $0x11] sm:$0x3f] }
  0x1b   : > { %5985 = vmatpush3.bf16.msra.mxu0 %v7484_v4  ;;  %6005 = vmatpush3.bf16.msra.mxu1 %v7484_v4  ;;  %v365_v11 = vpack.c.bf16 %v359_v9, %v359_v9  ;;  %v366_v12 = vpack.c.bf16 %v360_v10, %v360_v10  ;;  %v362_v14 = vld [vmem:[%s7515_s27 + $0x19] sm:$0x3f]  ;;  %v367_v15 = vpack.c.bf16 %v361_v13, %v361_v13  ;;  %v363_v17 = vld [vmem:[%s7515_s27 + $0x21] sm:$0x3f]  ;;  %v364_v18 = vld [vmem:[%s7515_s27 + $0x29] sm:$0x3f] }
  0x1c   : > { %5986 = vmatprep.subr.bf16.mxu0 %v7348_v1  ;;  %6006 = vmatprep.subr.bf16.mxu1 %v7348_v1  ;;  %v368_v16 = vpack.c.bf16 %v362_v14, %v362_v14  ;;  %v369_v19 = vpack.c.bf16 %v363_v17, %v363_v17  ;;  %v370_v20 = vpack.c.bf16 %v364_v18, %v364_v18  ;;  %v331_v29 = vld [vmem:[%s7515_s27] sm:$0x3f]  ;;  %v332_v30 = vld [vmem:[%s7515_s27 + $0x8] sm:$0x3f]  ;;  %v333_v33 = vld [vmem:[%s7515_s27 + $0x10] sm:$0x3f] }
  0x1d   : > { %v337_v31 = vpack.c.bf16 %v331_v29, %v331_v29  ;;  %v338_v32 = vpack.c.bf16 %v332_v30, %v332_v30  ;;  %v334_v34 = vld [vmem:[%s7515_s27 + $0x18] sm:$0x3f]  ;;  %v339_v35 = vpack.c.bf16 %v333_v33, %v333_v33  ;;  %v335_v37 = vld [vmem:[%s7515_s27 + $0x20] sm:$0x3f]  ;;  %v336_v38 = vld [vmem:[%s7515_s27 + $0x28] sm:$0x3f] }
  0x1e   : > { %v340_v36 = vpack.c.bf16 %v334_v34, %v334_v34  ;;  %v341_v39 = vpack.c.bf16 %v335_v37, %v335_v37  ;;  %v342_v40 = vpack.c.bf16 %v336_v38, %v336_v38  ;;  %v5084_v49 = vld [vmem:[%s7515_s27 + $0x8] sm:$0x3f]  ;;  %v5085_v50 = vld [vmem:[%s7515_s27 + $0x10] sm:$0x3f]  ;;  %v5086_v61 = vld [vmem:[%s7515_s27 + $0x18] sm:$0x3f] }
  0x1f   : > { %5987 = vmatpush3.bf16.msra.mxu0 %v7494_v5  ;;  %6007 = vmatpush3.bf16.msra.mxu1 %v7494_v5  ;;  %v971_v51 = vpack.c.bf16 %v5084_v49, %v5084_v49  ;;  %v972_v52 = vpack.c.bf16 %v5085_v50, %v5085_v50  ;;  %v5087_v62 = vld [vmem:[%s7515_s27 + $0x20] sm:$0x3f]  ;;  %v973_v63 = vpack.c.bf16 %v5086_v61, %v5086_v61  ;;  %v5088_v10 = vld [vmem:[%s7515_s27 + $0x28] sm:$0x3f]  ;;  %v7960_v17 = vld [vmem:[%s8926_s1 + $0xd8] sm:$0xff]   ;;  %s4992_s21 = sshll.u32 %s324_s17, 4  ;;  %s8885_s21 = int_to_ptr.vmem [resolvable:$true] %s4992_s21 }
  0x20   : > { %5988 = vmatprep.subr.bf16.mxu0 %v7348_v1  ;;  %6008 = vmatprep.subr.bf16.mxu1 %v7348_v1  ;;  %v7929_v14 = vld [vmem:[%s8926_s1 + $0xc0] sm:$0xff]   ;;  %v8000_v29 = vld [vmem:[%s8926_s1 + $0xf8] sm:$0xff]   ;;  %v5114_v30 = vld [vmem:[%s7515_s27 + $0x9] sm:$0x3f]  ;;  %s7284_s24 = scalar_lea.vmem %s8885_s21, 16  ;;  %p7291_p0 = scmp.lt.s32.totalorder %s8885_s21, %s7289_s26 }
  0x21   : > { %v7969_v18 = vld [vmem:[%s8926_s1 + $0xe0] sm:$0xff]   ;;  %p7285_p11 = scmp.ne.s32.totalorder %s8885_s21, %s7284_s24  ;;  %p7292_p1 = scmp.lt.s32.totalorder %s7290_s29, %s7284_s24 }
  0x23   : > { %5989 = vmatpush3.bf16.msra.mxu0 %v7503_v6  ;;  %6009 = vmatpush3.bf16.msra.mxu1 %v7503_v6  ;;  %p7286_p12 = pnand %p7285_p11, %p7439_p5  ;;  %p7293_p2 = por %p7292_p1, %p7291_p0 }
  0x24   : > { %5990 = vmatprep.subr.bf16.mxu0 %v7348_v1  ;;  %6010 = vmatprep.subr.bf16.mxu1 %v7348_v1 }
  0x25   : > { %p7287_p13 = pneg %p7286_p12 }
  0x27   : > { %5991 = vmatpush3.bf16.msra.mxu0 %v7510_v7  ;;  %6011 = vmatpush3.bf16.msra.mxu1 %v7510_v7  ;;  %p7294_p3 = pnand %p7293_p2, %p7287_p13 }
  0x28   : > { %5992 = vmatprep.subr.bf16.mxu0 %v7348_v1  ;;  %6012 = vmatprep.subr.bf16.mxu1 %v7348_v1 }
  0x2b   : > { %5993 = vmatpush3.bf16.msra.mxu0 %v7524_v8  ;;  %6013 = vmatpush3.bf16.msra.mxu1 %v7524_v8 }
  0x2c   : > { %6018 = vmatprep.subr.bf16.mxu0 %v7348_v1  ;;  %6038 = vmatprep.subr.bf16.mxu1 %v7348_v1 }
  0x2e   : > { %5995 = vmatmul.mubr.bf16.vlgmr.msra.gmra.mrb[0].mxu0 %v365_v11  ;;  %6015 = vmatmul.mubr.bf16.vlgmr.msra.gmra.mrb[0].mxu1 %v366_v12  ;;  %v5089_v11 = vld [vmem:[%s7515_s27 + $0x30] sm:$0x3f]  ;;  %v975_v12 = vpack.c.bf16 %v5088_v10, %v5088_v10  ;;  %v8116_v10 = vld [vmem:[%s8928_s3 + $0x28] sm:$0xff]  }
  0x2f   : > { %6019 = vmatpush3.bf16.msra.mxu0 %v7452_v0  ;;  %6039 = vmatpush3.bf16.msra.mxu1 %v7452_v0  ;;  %v976_v13 = vpack.c.bf16 %v5089_v11, %v5089_v11  ;;  %v8125_v11 = vld [vmem:[%s8928_s3 + $0x30] sm:$0xff]  }
  0x30   : > { %6020 = vmatprep.subr.bf16.mxu0 %v7348_v1  ;;  %6040 = vmatprep.subr.bf16.mxu1 %v7348_v1 }
  0x31   : > { %6034 = vmatprep.mubr.msk.bf16.mxu0 %vm7349_vm0, %v7348_v1  ;;  %6054 = vmatprep.mubr.msk.bf16.mxu1 %vm7349_vm0, %v7348_v1 }
  0x33   : > { %6021 = vmatpush3.bf16.msra.mxu0 %v7461_v2  ;;  %6041 = vmatpush3.bf16.msra.mxu1 %v7461_v2 }
  0x34   : > { %6022 = vmatprep.subr.bf16.mxu0 %v7348_v1  ;;  %6042 = vmatprep.subr.bf16.mxu1 %v7348_v1 }
  0x37   : > { %6023 = vmatpush3.bf16.msra.mxu0 %v7474_v3  ;;  %6043 = vmatpush3.bf16.msra.mxu1 %v7474_v3 }
  0x38   : > { %6024 = vmatprep.subr.bf16.mxu0 %v7348_v1  ;;  %6044 = vmatprep.subr.bf16.mxu1 %v7348_v1 }
  0x3b   : > { %6025 = vmatpush3.bf16.msra.mxu0 %v7484_v4  ;;  %6045 = vmatpush3.bf16.msra.mxu1 %v7484_v4 }
  0x3c   : > { %6026 = vmatprep.subr.bf16.mxu0 %v7348_v1  ;;  %6046 = vmatprep.subr.bf16.mxu1 %v7348_v1 }
  0x3f   : > { %6027 = vmatpush3.bf16.msra.mxu0 %v7494_v5  ;;  %6047 = vmatpush3.bf16.msra.mxu1 %v7494_v5 }
  0x40   : > { %6028 = vmatprep.subr.bf16.mxu0 %v7348_v1  ;;  %6048 = vmatprep.subr.bf16.mxu1 %v7348_v1 }
  0x43   : > { %6029 = vmatpush3.bf16.msra.mxu0 %v7503_v6  ;;  %6049 = vmatpush3.bf16.msra.mxu1 %v7503_v6 }
  0x44   : > { %6030 = vmatprep.subr.bf16.mxu0 %v7348_v1  ;;  %6050 = vmatprep.subr.bf16.mxu1 %v7348_v1 }
  0x47   : > { %6031 = vmatpush3.bf16.msra.mxu0 %v7510_v7  ;;  %6051 = vmatpush3.bf16.msra.mxu1 %v7510_v7 }
  0x48   : > { %6032 = vmatprep.subr.bf16.mxu0 %v7348_v1  ;;  %6052 = vmatprep.subr.bf16.mxu1 %v7348_v1 }
  0x4b   : > { %6033 = vmatpush3.bf16.msra.mxu0 %v7524_v8  ;;  %6053 = vmatpush3.bf16.msra.mxu1 %v7524_v8 }
  0x4c   : > { %6058 = vmatprep.subr.bf16.mxu0 %v7348_v1  ;;  %6078 = vmatprep.subr.bf16.mxu1 %v7348_v1 }
  0x4e   : > { %6035 = vmatmul.mubr.bf16.vlgmr.msra.gmra.mrb[4].mxu0 %v367_v15  ;;  %6055 = vmatmul.mubr.bf16.vlgmr.msra.gmra.mrb[4].mxu1 %v368_v16  ;;  %v7938_v15 = vld [vmem:[%s8926_s1 + $0xc8] sm:$0xff]   ;;  %v7951_v16 = vld [vmem:[%s8926_s1 + $0xd0] sm:$0xff]  }
  0x4f   : > { %6059 = vmatpush3.bf16.msra.mxu0 %v7452_v0  ;;  %6079 = vmatpush3.bf16.msra.mxu1 %v7452_v0  ;;  %v974_v0 = vpack.c.bf16 %v5087_v62, %v5087_v62  ;;  %v8105_v62 = vld [vmem:[%s8928_s3 + $0x20] sm:$0xff]  }
  0x50   : > { %6060 = vmatprep.subr.bf16.mxu0 %v7348_v1  ;;  %6080 = vmatprep.subr.bf16.mxu1 %v7348_v1 }
  0x51   : > { %6074 = vmatprep.mubr.msk.bf16.mxu0 %vm7349_vm0, %v7348_v1  ;;  %6094 = vmatprep.mubr.msk.bf16.mxu1 %vm7349_vm0, %v7348_v1 }
  0x53   : > { %6061 = vmatpush3.bf16.msra.mxu0 %v7461_v2  ;;  %6081 = vmatpush3.bf16.msra.mxu1 %v7461_v2 }
  0x54   : > { %6062 = vmatprep.subr.bf16.mxu0 %v7348_v1  ;;  %6082 = vmatprep.subr.bf16.mxu1 %v7348_v1 }
  0x57   : > { %6063 = vmatpush3.bf16.msra.mxu0 %v7474_v3  ;;  %6083 = vmatpush3.bf16.msra.mxu1 %v7474_v3 }
  0x58   : > { %6064 = vmatprep.subr.bf16.mxu0 %v7348_v1  ;;  %6084 = vmatprep.subr.bf16.mxu1 %v7348_v1 }
  0x5b   : > { %6065 = vmatpush3.bf16.msra.mxu0 %v7484_v4  ;;  %6085 = vmatpush3.bf16.msra.mxu1 %v7484_v4 }
  0x5c   : > { %6066 = vmatprep.subr.bf16.mxu0 %v7348_v1  ;;  %6086 = vmatprep.subr.bf16.mxu1 %v7348_v1 }
  0x5f   : > { %6067 = vmatpush3.bf16.msra.mxu0 %v7494_v5  ;;  %6087 = vmatpush3.bf16.msra.mxu1 %v7494_v5 }
  0x60   : > { %6068 = vmatprep.subr.bf16.mxu0 %v7348_v1  ;;  %6088 = vmatprep.subr.bf16.mxu1 %v7348_v1 }
  0x63   : > { %6069 = vmatpush3.bf16.msra.mxu0 %v7503_v6  ;;  %6089 = vmatpush3.bf16.msra.mxu1 %v7503_v6 }
  0x64   : > { %6070 = vmatprep.subr.bf16.mxu0 %v7348_v1  ;;  %6090 = vmatprep.subr.bf16.mxu1 %v7348_v1 }
  0x67   : > { %6071 = vmatpush3.bf16.msra.mxu0 %v7510_v7  ;;  %6091 = vmatpush3.bf16.msra.mxu1 %v7510_v7 }
  0x68   : > { %6072 = vmatprep.subr.bf16.mxu0 %v7348_v1  ;;  %6092 = vmatprep.subr.bf16.mxu1 %v7348_v1 }
  0x6b   : > { %6073 = vmatpush3.bf16.msra.mxu0 %v7524_v8  ;;  %6093 = vmatpush3.bf16.msra.mxu1 %v7524_v8 }
  0x6c   : > { %6098 = vmatprep.subr.bf16.mxu0 %v7348_v1  ;;  %6118 = vmatprep.subr.bf16.mxu1 %v7348_v1 }
  0x6e   : > { %6075 = vmatmul.mubr.bf16.vlgmr.msra.gmra.mrb[8].mxu0 %v369_v19  ;;  %6095 = vmatmul.mubr.bf16.vlgmr.msra.gmra.mrb[8].mxu1 %v370_v20  ;;  %v7978_v19 = vld [vmem:[%s8926_s1 + $0xe8] sm:$0xff]  }
  0x6f   : > { %6099 = vmatpush3.bf16.msra.mxu0 %v7613_v21  ;;  %6119 = vmatpush3.bf16.msra.mxu1 %v7613_v21 }
  0x70   : > { %6100 = vmatprep.subr.bf16.mxu0 %v7348_v1  ;;  %6120 = vmatprep.subr.bf16.mxu1 %v7348_v1 }
  0x71   : > { %6114 = vmatprep.mubr.msk.bf16.mxu0 %vm7349_vm0, %v7348_v1  ;;  %6134 = vmatprep.mubr.msk.bf16.mxu1 %vm7349_vm0, %v7348_v1 }
  0x73   : > { %6101 = vmatpush3.bf16.msra.mxu0 %v7620_v22  ;;  %6121 = vmatpush3.bf16.msra.mxu1 %v7620_v22 }
  0x74   : > { %6102 = vmatprep.subr.bf16.mxu0 %v7348_v1  ;;  %6122 = vmatprep.subr.bf16.mxu1 %v7348_v1 }
  0x77   : > { %6103 = vmatpush3.bf16.msra.mxu0 %v7629_v23  ;;  %6123 = vmatpush3.bf16.msra.mxu1 %v7629_v23 }
  0x78   : > { %6104 = vmatprep.subr.bf16.mxu0 %v7348_v1  ;;  %6124 = vmatprep.subr.bf16.mxu1 %v7348_v1 }
  0x7b   : > { %6105 = vmatpush3.bf16.msra.mxu0 %v7644_v24  ;;  %6125 = vmatpush3.bf16.msra.mxu1 %v7644_v24 }
  0x7c   : > { %6106 = vmatprep.subr.bf16.mxu0 %v7348_v1  ;;  %6126 = vmatprep.subr.bf16.mxu1 %v7348_v1 }
  0x7f   : > { %6107 = vmatpush3.bf16.msra.mxu0 %v7653_v25  ;;  %6127 = vmatpush3.bf16.msra.mxu1 %v7653_v25 }
  0x80   : > { %6108 = vmatprep.subr.bf16.mxu0 %v7348_v1  ;;  %6128 = vmatprep.subr.bf16.mxu1 %v7348_v1 }
  0x83   : > { %6109 = vmatpush3.bf16.msra.mxu0 %v7662_v26  ;;  %6129 = vmatpush3.bf16.msra.mxu1 %v7662_v26 }
  0x84   : > { %6110 = vmatprep.subr.bf16.mxu0 %v7348_v1  ;;  %6130 = vmatprep.subr.bf16.mxu1 %v7348_v1 }
  0x87   : > { %6111 = vmatpush3.bf16.msra.mxu0 %v7671_v27  ;;  %6131 = vmatpush3.bf16.msra.mxu1 %v7671_v27 }
  0x88   : > { %6112 = vmatprep.subr.bf16.mxu0 %v7348_v1  ;;  %6132 = vmatprep.subr.bf16.mxu1 %v7348_v1 }
  0x8b   : > { %6113 = vmatpush3.bf16.msra.mxu0 %v7680_v28  ;;  %6133 = vmatpush3.bf16.msra.mxu1 %v7680_v28 }
  0x8c   : > { %6138 = vmatprep.subr.bf16.mxu0 %v7348_v1  ;;  %6158 = vmatprep.subr.bf16.mxu1 %v7348_v1 }
  0x8e   : > { %6115 = vmatmul.mubr.bf16.vlgmr.msra.gmra.mrb[12].mxu0 %v337_v31  ;;  %6135 = vmatmul.mubr.bf16.vlgmr.msra.gmra.mrb[12].mxu1 %v338_v32  ;;  %v5115_v31 = vld [vmem:[%s7515_s27 + $0x11] sm:$0x3f]  ;;  %v1294_v32 = vpack.c.bf16 %v5114_v30, %v5114_v30 }
  0x8f   : > { %6139 = vmatpush3.bf16.msra.mxu0 %v7613_v21  ;;  %6159 = vmatpush3.bf16.msra.mxu1 %v7613_v21  ;;  %v1295_v33 = vpack.c.bf16 %v5115_v31, %v5115_v31 }
  0x90   : > { %6140 = vmatprep.subr.bf16.mxu0 %v7348_v1  ;;  %6160 = vmatprep.subr.bf16.mxu1 %v7348_v1 }
  0x91   : > { %6154 = vmatprep.mubr.msk.bf16.mxu0 %vm7349_vm0, %v7348_v1  ;;  %6174 = vmatprep.mubr.msk.bf16.mxu1 %vm7349_vm0, %v7348_v1 }
  0x93   : > { %6141 = vmatpush3.bf16.msra.mxu0 %v7620_v22  ;;  %6161 = vmatpush3.bf16.msra.mxu1 %v7620_v22 }
  0x94   : > { %6142 = vmatprep.subr.bf16.mxu0 %v7348_v1  ;;  %6162 = vmatprep.subr.bf16.mxu1 %v7348_v1 }
  0x97   : > { %6143 = vmatpush3.bf16.msra.mxu0 %v7629_v23  ;;  %6163 = vmatpush3.bf16.msra.mxu1 %v7629_v23 }
  0x98   : > { %6144 = vmatprep.subr.bf16.mxu0 %v7348_v1  ;;  %6164 = vmatprep.subr.bf16.mxu1 %v7348_v1 }
  0x9b   : > { %6145 = vmatpush3.bf16.msra.mxu0 %v7644_v24  ;;  %6165 = vmatpush3.bf16.msra.mxu1 %v7644_v24 }
  0x9c   : > { %6146 = vmatprep.subr.bf16.mxu0 %v7348_v1  ;;  %6166 = vmatprep.subr.bf16.mxu1 %v7348_v1 }
  0x9f   : > { %6147 = vmatpush3.bf16.msra.mxu0 %v7653_v25  ;;  %6167 = vmatpush3.bf16.msra.mxu1 %v7653_v25 }
  0xa0   : > { %6148 = vmatprep.subr.bf16.mxu0 %v7348_v1  ;;  %6168 = vmatprep.subr.bf16.mxu1 %v7348_v1 }
  0xa3   : > { %6149 = vmatpush3.bf16.msra.mxu0 %v7662_v26  ;;  %6169 = vmatpush3.bf16.msra.mxu1 %v7662_v26 }
  0xa4   : > { %6150 = vmatprep.subr.bf16.mxu0 %v7348_v1  ;;  %6170 = vmatprep.subr.bf16.mxu1 %v7348_v1 }
  0xa7   : > { %6151 = vmatpush3.bf16.msra.mxu0 %v7671_v27  ;;  %6171 = vmatpush3.bf16.msra.mxu1 %v7671_v27 }
  0xa8   : > { %6152 = vmatprep.subr.bf16.mxu0 %v7348_v1  ;;  %6172 = vmatprep.subr.bf16.mxu1 %v7348_v1 }
  0xab   : > { %6153 = vmatpush3.bf16.msra.mxu0 %v7680_v28  ;;  %6173 = vmatpush3.bf16.msra.mxu1 %v7680_v28 }
  0xac   : > { %6178 = vmatprep.subr.bf16.mxu0 %v7348_v1  ;;  %6198 = vmatprep.subr.bf16.mxu1 %v7348_v1 }
  0xae   : > { %6155 = vmatmul.mubr.bf16.vlgmr.msra.gmra.mrb[16].mxu0 %v339_v35  ;;  %6175 = vmatmul.mubr.bf16.vlgmr.msra.gmra.mrb[16].mxu1 %v340_v36 }
  0xaf   : > { %6179 = vmatpush3.bf16.msra.mxu0 %v7613_v21  ;;  %6199 = vmatpush3.bf16.msra.mxu1 %v7613_v21 }
  0xb0   : > { %6180 = vmatprep.subr.bf16.mxu0 %v7348_v1  ;;  %6200 = vmatprep.subr.bf16.mxu1 %v7348_v1 }
  0xb1   : > { %6194 = vmatprep.mubr.msk.bf16.mxu0 %vm7349_vm0, %v7348_v1  ;;  %6214 = vmatprep.mubr.msk.bf16.mxu1 %vm7349_vm0, %v7348_v1 }
  0xb3   : > { %6181 = vmatpush3.bf16.msra.mxu0 %v7620_v22  ;;  %6201 = vmatpush3.bf16.msra.mxu1 %v7620_v22 }
  0xb4   : > { %6182 = vmatprep.subr.bf16.mxu0 %v7348_v1  ;;  %6202 = vmatprep.subr.bf16.mxu1 %v7348_v1 }
  0xb7   : > { %6183 = vmatpush3.bf16.msra.mxu0 %v7629_v23  ;;  %6203 = vmatpush3.bf16.msra.mxu1 %v7629_v23 }
  0xb8   : > { %6184 = vmatprep.subr.bf16.mxu0 %v7348_v1  ;;  %6204 = vmatprep.subr.bf16.mxu1 %v7348_v1 }
  0xbb   : > { %6185 = vmatpush3.bf16.msra.mxu0 %v7644_v24  ;;  %6205 = vmatpush3.bf16.msra.mxu1 %v7644_v24 }
  0xbc   : > { %6186 = vmatprep.subr.bf16.mxu0 %v7348_v1  ;;  %6206 = vmatprep.subr.bf16.mxu1 %v7348_v1 }
  0xbf   : > { %6187 = vmatpush3.bf16.msra.mxu0 %v7653_v25  ;;  %6207 = vmatpush3.bf16.msra.mxu1 %v7653_v25  ;;  %v7991_v25 = vld [vmem:[%s8926_s1 + $0xf0] sm:$0xff]  }
  0xc0   : > { %6188 = vmatprep.subr.bf16.mxu0 %v7348_v1  ;;  %6208 = vmatprep.subr.bf16.mxu1 %v7348_v1 }
  0xc3   : > { %6189 = vmatpush3.bf16.msra.mxu0 %v7662_v26  ;;  %6209 = vmatpush3.bf16.msra.mxu1 %v7662_v26 }
  0xc4   : > { %6190 = vmatprep.subr.bf16.mxu0 %v7348_v1  ;;  %6210 = vmatprep.subr.bf16.mxu1 %v7348_v1 }
  0xc7   : > { %6191 = vmatpush3.bf16.msra.mxu0 %v7671_v27  ;;  %6211 = vmatpush3.bf16.msra.mxu1 %v7671_v27 }
  0xc8   : > { %6192 = vmatprep.subr.bf16.mxu0 %v7348_v1  ;;  %6212 = vmatprep.subr.bf16.mxu1 %v7348_v1 }
  0xcb   : > { %6193 = vmatpush3.bf16.msra.mxu0 %v7680_v28  ;;  %6213 = vmatpush3.bf16.msra.mxu1 %v7680_v28 }
  0xcc   : > { %6218 = vmatprep.subr.bf16.mxu0 %v7348_v1  ;;  %6238 = vmatprep.subr.bf16.mxu1 %v7348_v1 }
  0xce   : > { %6195 = vmatmul.mubr.bf16.vlgmr.msra.gmra.mrb[20].mxu0 %v341_v39  ;;  %6215 = vmatmul.mubr.bf16.vlgmr.msra.gmra.mrb[20].mxu1 %v342_v40 }
  0xcf   : > { %6219 = vmatpush3.bf16.msra.mxu0 %v7767_v41  ;;  %6239 = vmatpush3.bf16.msra.mxu1 %v7767_v41 }
  0xd0   : > { %6220 = vmatprep.subr.bf16.mxu0 %v7348_v1  ;;  %6240 = vmatprep.subr.bf16.mxu1 %v7348_v1 }
  0xd1   : > { %6234 = vmatprep.mubr.msk.bf16.mxu0 %vm7349_vm0, %v7348_v1  ;;  %6254 = vmatprep.mubr.msk.bf16.mxu1 %vm7349_vm0, %v7348_v1 }
  0xd3   : > { %6221 = vmatpush3.bf16.msra.mxu0 %v7776_v42  ;;  %6241 = vmatpush3.bf16.msra.mxu1 %v7776_v42 }
  0xd4   : > { %6222 = vmatprep.subr.bf16.mxu0 %v7348_v1  ;;  %6242 = vmatprep.subr.bf16.mxu1 %v7348_v1 }
  0xd7   : > { %6223 = vmatpush3.bf16.msra.mxu0 %v7789_v43  ;;  %6243 = vmatpush3.bf16.msra.mxu1 %v7789_v43 }
  0xd8   : > { %6224 = vmatprep.subr.bf16.mxu0 %v7348_v1  ;;  %6244 = vmatprep.subr.bf16.mxu1 %v7348_v1 }
  0xdb   : > { %6225 = vmatpush3.bf16.msra.mxu0 %v7798_v44  ;;  %6245 = vmatpush3.bf16.msra.mxu1 %v7798_v44 }
  0xdc   : > { %6226 = vmatprep.subr.bf16.mxu0 %v7348_v1  ;;  %6246 = vmatprep.subr.bf16.mxu1 %v7348_v1 }
  0xdf   : > { %6227 = vmatpush3.bf16.msra.mxu0 %v7807_v45  ;;  %6247 = vmatpush3.bf16.msra.mxu1 %v7807_v45 }
  0xe0   : > { %6228 = vmatprep.subr.bf16.mxu0 %v7348_v1  ;;  %6248 = vmatprep.subr.bf16.mxu1 %v7348_v1 }
  0xe3   : > { %6229 = vmatpush3.bf16.msra.mxu0 %v7816_v46  ;;  %6249 = vmatpush3.bf16.msra.mxu1 %v7816_v46 }
  0xe4   : > { %6230 = vmatprep.subr.bf16.mxu0 %v7348_v1  ;;  %6250 = vmatprep.subr.bf16.mxu1 %v7348_v1 }
  0xe7   : > { %6231 = vmatpush3.bf16.msra.mxu0 %v7825_v47  ;;  %6251 = vmatpush3.bf16.msra.mxu1 %v7825_v47 }
  0xe8   : > { %6232 = vmatprep.subr.bf16.mxu0 %v7348_v1  ;;  %6252 = vmatprep.subr.bf16.mxu1 %v7348_v1 }
  0xeb   : > { %6233 = vmatpush3.bf16.msra.mxu0 %v7834_v48  ;;  %6253 = vmatpush3.bf16.msra.mxu1 %v7834_v48 }
  0xec   : > { %6258 = vmatprep.subr.bf16.mxu0 %v7348_v1  ;;  %6278 = vmatprep.subr.bf16.mxu1 %v7348_v1 }
  0xee   : > { %6235 = vmatmul.mubr.bf16.vlgmr.msra.gmra.mrb[24].mxu0 %v971_v51  ;;  %6255 = vmatmul.mubr.bf16.vlgmr.msra.gmra.mrb[24].mxu1 %v972_v52 }
  0xef   : > { %6259 = vmatpush3.bf16.msra.mxu0 %v7767_v41  ;;  %6279 = vmatpush3.bf16.msra.mxu1 %v7767_v41 }
  0xf0   : > { %6260 = vmatprep.subr.bf16.mxu0 %v7348_v1  ;;  %6280 = vmatprep.subr.bf16.mxu1 %v7348_v1 }
  0xf1   : > { %6274 = vmatprep.mubr.msk.bf16.mxu0 %vm7349_vm0, %v7348_v1  ;;  %6294 = vmatprep.mubr.msk.bf16.mxu1 %vm7349_vm0, %v7348_v1 }
  0xf3   : > { %6261 = vmatpush3.bf16.msra.mxu0 %v7776_v42  ;;  %6281 = vmatpush3.bf16.msra.mxu1 %v7776_v42 }
  0xf4   : > { %6262 = vmatprep.subr.bf16.mxu0 %v7348_v1  ;;  %6282 = vmatprep.subr.bf16.mxu1 %v7348_v1 }
  0xf7   : > { %6263 = vmatpush3.bf16.msra.mxu0 %v7789_v43  ;;  %6283 = vmatpush3.bf16.msra.mxu1 %v7789_v43 }
  0xf8   : > { %6264 = vmatprep.subr.bf16.mxu0 %v7348_v1  ;;  %6284 = vmatprep.subr.bf16.mxu1 %v7348_v1 }
  0xfb   : > { %6265 = vmatpush3.bf16.msra.mxu0 %v7798_v44  ;;  %6285 = vmatpush3.bf16.msra.mxu1 %v7798_v44 }
  0xfc   : > { %6266 = vmatprep.subr.bf16.mxu0 %v7348_v1  ;;  %6286 = vmatprep.subr.bf16.mxu1 %v7348_v1 }
  0xff   : > { %6267 = vmatpush3.bf16.msra.mxu0 %v7807_v45  ;;  %6287 = vmatpush3.bf16.msra.mxu1 %v7807_v45 }
 0x100   : > { %6268 = vmatprep.subr.bf16.mxu0 %v7348_v1  ;;  %6288 = vmatprep.subr.bf16.mxu1 %v7348_v1 }
 0x101   : > { %v7868_v53 = vpop.f32.mrb[0].mxu0  ;;  %v7870_v54 = vpop.f32.mrb[0].mxu1 }
 0x102   : > { %v5996_v55 = vpop.f32.mrb[1].mxu0  ;;  %v6016_v56 = vpop.f32.mrb[1].mxu1 }
 0x103   : > { %v473_v57 = vpop.f32.mrb[2].mxu0  ;;  %6269 = vmatpush3.bf16.msra.mxu0 %v7816_v46  ;;  %6289 = vmatpush3.bf16.msra.mxu1 %v7816_v46  ;;  %v513_v58 = vpop.f32.mrb[2].mxu1 }
 0x104   : > { %v5997_v59 = vpop.f32.mrb[3].mxu0  ;;  %6270 = vmatprep.subr.bf16.mxu0 %v7348_v1  ;;  %6290 = vmatprep.subr.bf16.mxu1 %v7348_v1  ;;  %v6017_v60 = vpop.f32.mrb[3].mxu1  ;;  %v5118_v58 = vld [vmem:[%s7515_s27 + $0x29] sm:$0x3f] }
 0x105   : > { %v5119_v59 = vld [vmem:[%s7515_s27 + $0x31] sm:$0x3f]  ;;  %v1298_v60 = vpack.c.bf16 %v5118_v58, %v5118_v58 }
 0x106   : > { %v1299_v61 = vpack.c.bf16 %v5119_v59, %v5119_v59 }
 0x107   : > { %6271 = vmatpush3.bf16.msra.mxu0 %v7825_v47  ;;  %6291 = vmatpush3.bf16.msra.mxu1 %v7825_v47 }
 0x108   : > { %6272 = vmatprep.subr.bf16.mxu0 %v7348_v1  ;;  %6292 = vmatprep.subr.bf16.mxu1 %v7348_v1 }
 0x10b   : > { %6273 = vmatpush3.bf16.msra.mxu0 %v7834_v48  ;;  %6293 = vmatpush3.bf16.msra.mxu1 %v7834_v48 }
 0x10c   : > { %6298 = vmatprep.subr.bf16.mxu0 %v7348_v1  ;;  %6318 = vmatprep.subr.bf16.mxu1 %v7348_v1 }
 0x10e   : > { %6275 = vmatmul.mubr.bf16.vlgmr.msra.gmra.mrb[28].mxu0 %v973_v63  ;;  %6295 = vmatmul.mubr.bf16.vlgmr.msra.gmra.mrb[28].mxu1 %v974_v0 }
 0x10f   : > { %6299 = vmatpush3.bf16.msra.mxu0 %v7767_v41  ;;  %6319 = vmatpush3.bf16.msra.mxu1 %v7767_v41 }
 0x110   : > { %6300 = vmatprep.subr.bf16.mxu0 %v7348_v1  ;;  %6320 = vmatprep.subr.bf16.mxu1 %v7348_v1 }
 0x111   : > { %6314 = vmatprep.mubr.msk.bf16.mxu0 %vm7349_vm0, %v7348_v1  ;;  %6334 = vmatprep.mubr.msk.bf16.mxu1 %vm7349_vm0, %v7348_v1 }
 0x113   : > { %6301 = vmatpush3.bf16.msra.mxu0 %v7776_v42  ;;  %6321 = vmatpush3.bf16.msra.mxu1 %v7776_v42 }
 0x114   : > { %6302 = vmatprep.subr.bf16.mxu0 %v7348_v1  ;;  %6322 = vmatprep.subr.bf16.mxu1 %v7348_v1 }
 0x117   : > { %6303 = vmatpush3.bf16.msra.mxu0 %v7789_v43  ;;  %6323 = vmatpush3.bf16.msra.mxu1 %v7789_v43 }
 0x118   : > { %6304 = vmatprep.subr.bf16.mxu0 %v7348_v1  ;;  %6324 = vmatprep.subr.bf16.mxu1 %v7348_v1 }
 0x11b   : > { %6305 = vmatpush3.bf16.msra.mxu0 %v7798_v44  ;;  %6325 = vmatpush3.bf16.msra.mxu1 %v7798_v44  ;;  %v5116_v44 = vld [vmem:[%s7515_s27 + $0x19] sm:$0x3f] }
 0x11c   : > { %6306 = vmatprep.subr.bf16.mxu0 %v7348_v1  ;;  %6326 = vmatprep.subr.bf16.mxu1 %v7348_v1 }
 0x11f   : > { %6307 = vmatpush3.bf16.msra.mxu0 %v7807_v45  ;;  %6327 = vmatpush3.bf16.msra.mxu1 %v7807_v45  ;;  %v5117_v45 = vld [vmem:[%s7515_s27 + $0x21] sm:$0x3f] }
 0x120   : > { %6308 = vmatprep.subr.bf16.mxu0 %v7348_v1  ;;  %6328 = vmatprep.subr.bf16.mxu1 %v7348_v1 }
 0x121   : > { %v7910_v2 = vpop.f32.mrb[4].mxu0  ;;  %v7912_v3 = vpop.f32.mrb[4].mxu1 }
 0x122   : > { %v6036_v4 = vpop.f32.mrb[5].mxu0  ;;  %v6056_v5 = vpop.f32.mrb[5].mxu1 }
 0x123   : > { %v553_v6 = vpop.f32.mrb[6].mxu0  ;;  %6309 = vmatpush3.bf16.msra.mxu0 %v7816_v46  ;;  %6329 = vmatpush3.bf16.msra.mxu1 %v7816_v46  ;;  %v593_v7 = vpop.f32.mrb[6].mxu1  ;;  %v1296_v46 = vpack.c.bf16 %v5116_v44, %v5116_v44  ;;  %v8151_v44 = vld [vmem:[%s8927_s2] ss:$0 sm:$0xff] }
 0x124   : > { %v6037_v8 = vpop.f32.mrb[7].mxu0  ;;  %6310 = vmatprep.subr.bf16.mxu0 %v7348_v1  ;;  %6330 = vmatprep.subr.bf16.mxu1 %v7348_v1  ;;  %v6057_v9 = vpop.f32.mrb[7].mxu1 }
 0x127   : > { %6311 = vmatpush3.bf16.msra.mxu0 %v7825_v47  ;;  %6331 = vmatpush3.bf16.msra.mxu1 %v7825_v47  ;;  %v1297_v47 = vpack.c.bf16 %v5117_v45, %v5117_v45 }
 0x128   : > { %6312 = vmatprep.subr.bf16.mxu0 %v7348_v1  ;;  %6332 = vmatprep.subr.bf16.mxu1 %v7348_v1 }
 0x12b   : > { %6313 = vmatpush3.bf16.msra.mxu0 %v7834_v48  ;;  %6333 = vmatpush3.bf16.msra.mxu1 %v7834_v48 }
 0x12c   : > { %6338 = vmatprep.subr.bf16.mxu0 %v7348_v1  ;;  %6358 = vmatprep.subr.bf16.mxu1 %v7348_v1 }
 0x12e   : > { %6315 = vmatmul.mubr.bf16.vlgmr.msra.gmra.mrb[32].mxu0 %v975_v12  ;;  %6335 = vmatmul.mubr.bf16.vlgmr.msra.gmra.mrb[32].mxu1 %v976_v13  ;;  %v8131_v12 = vld [vmem:[%s8928_s3 + $0x38] sm:$0xff]  }
 0x12f   : > { %6339 = vmatpush3.bf16.msra.mxu0 %v7929_v14  ;;  %6359 = vmatpush3.bf16.msra.mxu1 %v7929_v14 }
 0x130   : > { %6340 = vmatprep.subr.bf16.mxu0 %v7348_v1  ;;  %6360 = vmatprep.subr.bf16.mxu1 %v7348_v1 }
 0x131   : > { %6354 = vmatprep.mubr.msk.bf16.mxu0 %vm7349_vm0, %v7348_v1  ;;  %6374 = vmatprep.mubr.msk.bf16.mxu1 %vm7349_vm0, %v7348_v1 }
 0x133   : > { %6341 = vmatpush3.bf16.msra.mxu0 %v7938_v15  ;;  %6361 = vmatpush3.bf16.msra.mxu1 %v7938_v15 }
 0x134   : > { %6342 = vmatprep.subr.bf16.mxu0 %v7348_v1  ;;  %6362 = vmatprep.subr.bf16.mxu1 %v7348_v1 }
 0x137   : > { %6343 = vmatpush3.bf16.msra.mxu0 %v7951_v16  ;;  %6363 = vmatpush3.bf16.msra.mxu1 %v7951_v16 }
 0x138   : > { %6344 = vmatprep.subr.bf16.mxu0 %v7348_v1  ;;  %6364 = vmatprep.subr.bf16.mxu1 %v7348_v1 }
 0x13b   : > { %6345 = vmatpush3.bf16.msra.mxu0 %v7960_v17  ;;  %6365 = vmatpush3.bf16.msra.mxu1 %v7960_v17 }
 0x13c   : > { %6346 = vmatprep.subr.bf16.mxu0 %v7348_v1  ;;  %6366 = vmatprep.subr.bf16.mxu1 %v7348_v1 }
 0x13f   : > { %6347 = vmatpush3.bf16.msra.mxu0 %v7969_v18  ;;  %6367 = vmatpush3.bf16.msra.mxu1 %v7969_v18 }
 0x140   : > { %6348 = vmatprep.subr.bf16.mxu0 %v7348_v1  ;;  %6368 = vmatprep.subr.bf16.mxu1 %v7348_v1 }
 0x141   : > { %v7982_v20 = vpop.f32.mrb[8].mxu0  ;;  %v7984_v21 = vpop.f32.mrb[8].mxu1 }
 0x142   : > { %v6076_v22 = vpop.f32.mrb[9].mxu0  ;;  %v6096_v23 = vpop.f32.mrb[9].mxu1 }
 0x143   : > { %v633_v24 = vpop.f32.mrb[10].mxu0  ;;  %6349 = vmatpush3.bf16.msra.mxu0 %v7978_v19  ;;  %6369 = vmatpush3.bf16.msra.mxu1 %v7978_v19  ;;  %v673_v26 = vpop.f32.mrb[10].mxu1 }
 0x144   : > { %v6077_v27 = vpop.f32.mrb[11].mxu0  ;;  %6350 = vmatprep.subr.bf16.mxu0 %v7348_v1  ;;  %6370 = vmatprep.subr.bf16.mxu1 %v7348_v1  ;;  %v6097_v28 = vpop.f32.mrb[11].mxu1 }
 0x147   : > { %6351 = vmatpush3.bf16.msra.mxu0 %v7991_v25  ;;  %6371 = vmatpush3.bf16.msra.mxu1 %v7991_v25 }
 0x148   : > { %6352 = vmatprep.subr.bf16.mxu0 %v7348_v1  ;;  %6372 = vmatprep.subr.bf16.mxu1 %v7348_v1 }
 0x14b   : > { %6353 = vmatpush3.bf16.msra.mxu0 %v8000_v29  ;;  %6373 = vmatpush3.bf16.msra.mxu1 %v8000_v29 }
 0x14c   : > { %6378 = vmatprep.subr.bf16.mxu0 %v7348_v1  ;;  %6398 = vmatprep.subr.bf16.mxu1 %v7348_v1 }
 0x14e   : > { %6355 = vmatmul.mubr.bf16.vlgmr.msra.gmra.mrb[36].mxu0 %v1294_v32  ;;  %6375 = vmatmul.mubr.bf16.vlgmr.msra.gmra.mrb[36].mxu1 %v1295_v33 }
 0x14f   : > { %6379 = vmatpush3.bf16.msra.mxu0 %v7929_v14  ;;  %6399 = vmatpush3.bf16.msra.mxu1 %v7929_v14 }
 0x150   : > { %6380 = vmatprep.subr.bf16.mxu0 %v7348_v1  ;;  %6400 = vmatprep.subr.bf16.mxu1 %v7348_v1 }
 0x151   : > { %6394 = vmatprep.mubr.msk.bf16.mxu0 %vm7349_vm0, %v7348_v1  ;;  %6414 = vmatprep.mubr.msk.bf16.mxu1 %vm7349_vm0, %v7348_v1 }
 0x153   : > { %6381 = vmatpush3.bf16.msra.mxu0 %v7938_v15  ;;  %6401 = vmatpush3.bf16.msra.mxu1 %v7938_v15 }
 0x154   : > { %6382 = vmatprep.subr.bf16.mxu0 %v7348_v1  ;;  %6402 = vmatprep.subr.bf16.mxu1 %v7348_v1 }
 0x157   : > { %6383 = vmatpush3.bf16.msra.mxu0 %v7951_v16  ;;  %6403 = vmatpush3.bf16.msra.mxu1 %v7951_v16 }
 0x158   : > { %6384 = vmatprep.subr.bf16.mxu0 %v7348_v1  ;;  %6404 = vmatprep.subr.bf16.mxu1 %v7348_v1 }
 0x15b   : > { %6385 = vmatpush3.bf16.msra.mxu0 %v7960_v17  ;;  %6405 = vmatpush3.bf16.msra.mxu1 %v7960_v17 }
 0x15c   : > { %6386 = vmatprep.subr.bf16.mxu0 %v7348_v1  ;;  %6406 = vmatprep.subr.bf16.mxu1 %v7348_v1 }
 0x15f   : > { %6387 = vmatpush3.bf16.msra.mxu0 %v7969_v18  ;;  %6407 = vmatpush3.bf16.msra.mxu1 %v7969_v18 }
 0x160   : > { %6388 = vmatprep.subr.bf16.mxu0 %v7348_v1  ;;  %6408 = vmatprep.subr.bf16.mxu1 %v7348_v1 }
 0x161   : > { %v758_v34 = vpop.f32.mrb[12].mxu0  ;;  %v798_v35 = vpop.f32.mrb[12].mxu1 }
 0x162   : > { %v8035_v36 = vadd.f32 %v758_v34, %v7868_v53  ;;  %v8038_v37 = vadd.f32 %v798_v35, %v7870_v54  ;;  %v6116_v38 = vpop.f32.mrb[13].mxu0  ;;  %v6136_v39 = vpop.f32.mrb[13].mxu1 }
 0x163   : > { %v761_v40 = vpop.f32.mrb[14].mxu0  ;;  %6389 = vmatpush3.bf16.msra.mxu0 %v7978_v19  ;;  %6409 = vmatpush3.bf16.msra.mxu1 %v7978_v19  ;;  %v801_v41 = vpop.f32.mrb[14].mxu1 }
 0x164   : > { %v6117_v42 = vpop.f32.mrb[15].mxu0  ;;  %6390 = vmatprep.subr.bf16.mxu0 %v7348_v1  ;;  %6410 = vmatprep.subr.bf16.mxu1 %v7348_v1  ;;  %v6137_v43 = vpop.f32.mrb[15].mxu1 }
 0x167   : > { %6391 = vmatpush3.bf16.msra.mxu0 %v7991_v25  ;;  %6411 = vmatpush3.bf16.msra.mxu1 %v7991_v25 }
 0x168   : > { %6392 = vmatprep.subr.bf16.mxu0 %v7348_v1  ;;  %6412 = vmatprep.subr.bf16.mxu1 %v7348_v1 }
 0x16b   : > { %6393 = vmatpush3.bf16.msra.mxu0 %v8000_v29  ;;  %6413 = vmatpush3.bf16.msra.mxu1 %v8000_v29 }
 0x16c   : > { %6418 = vmatprep.subr.bf16.mxu0 %v7348_v1  ;;  %6438 = vmatprep.subr.bf16.mxu1 %v7348_v1 }
 0x16e   : > { %6395 = vmatmul.mubr.bf16.vlgmr.msra.gmra.mrb[40].mxu0 %v1296_v46  ;;  %6415 = vmatmul.mubr.bf16.vlgmr.msra.gmra.mrb[40].mxu1 %v1297_v47 }
 0x16f   : > { %6419 = vmatpush3.bf16.msra.mxu0 %v7929_v14  ;;  %6439 = vmatpush3.bf16.msra.mxu1 %v7929_v14 }
 0x170   : > { %6420 = vmatprep.subr.bf16.mxu0 %v7348_v1  ;;  %6440 = vmatprep.subr.bf16.mxu1 %v7348_v1 }
 0x171   : > { %6434 = vmatprep.mubr.msk.bf16.mxu0 %vm7349_vm0, %v7348_v1  ;;  %6454 = vmatprep.mubr.msk.bf16.mxu1 %vm7349_vm0, %v7348_v1 }
 0x173   : > { %6421 = vmatpush3.bf16.msra.mxu0 %v7938_v15  ;;  %6441 = vmatpush3.bf16.msra.mxu1 %v7938_v15 }
 0x174   : > { %6422 = vmatprep.subr.bf16.mxu0 %v7348_v1  ;;  %6442 = vmatprep.subr.bf16.mxu1 %v7348_v1 }
 0x177   : > { %6423 = vmatpush3.bf16.msra.mxu0 %v7951_v16  ;;  %6443 = vmatpush3.bf16.msra.mxu1 %v7951_v16 }
 0x178   : > { %6424 = vmatprep.subr.bf16.mxu0 %v7348_v1  ;;  %6444 = vmatprep.subr.bf16.mxu1 %v7348_v1 }
 0x17b   : > { %6425 = vmatpush3.bf16.msra.mxu0 %v7960_v17  ;;  %6445 = vmatpush3.bf16.msra.mxu1 %v7960_v17 }
 0x17c   : > { %6426 = vmatprep.subr.bf16.mxu0 %v7348_v1  ;;  %6446 = vmatprep.subr.bf16.mxu1 %v7348_v1 }
 0x17f   : > { %6427 = vmatpush3.bf16.msra.mxu0 %v7969_v18  ;;  %6447 = vmatpush3.bf16.msra.mxu1 %v7969_v18 }
 0x180   : > { %6428 = vmatprep.subr.bf16.mxu0 %v7348_v1  ;;  %6448 = vmatprep.subr.bf16.mxu1 %v7348_v1 }
 0x181   : > { %v838_v48 = vpop.f32.mrb[16].mxu0  ;;  %v878_v49 = vpop.f32.mrb[16].mxu1 }
 0x182   : > { %v8079_v50 = vadd.f32 %v838_v48, %v7910_v2  ;;  %v8082_v51 = vadd.f32 %v878_v49, %v7912_v3  ;;  %v6156_v52 = vpop.f32.mrb[17].mxu0  ;;  %v6176_v53 = vpop.f32.mrb[17].mxu1 }
 0x183   : > { %v841_v54 = vpop.f32.mrb[18].mxu0  ;;  %6429 = vmatpush3.bf16.msra.mxu0 %v7978_v19  ;;  %6449 = vmatpush3.bf16.msra.mxu1 %v7978_v19  ;;  %v881_v55 = vpop.f32.mrb[18].mxu1 }
 0x184   : > { %v6157_v56 = vpop.f32.mrb[19].mxu0  ;;  %6430 = vmatprep.subr.bf16.mxu0 %v7348_v1  ;;  %6450 = vmatprep.subr.bf16.mxu1 %v7348_v1  ;;  %v6177_v57 = vpop.f32.mrb[19].mxu1 }
 0x187   : > { %6431 = vmatpush3.bf16.msra.mxu0 %v7991_v25  ;;  %6451 = vmatpush3.bf16.msra.mxu1 %v7991_v25 }
 0x188   : > { %6432 = vmatprep.subr.bf16.mxu0 %v7348_v1  ;;  %6452 = vmatprep.subr.bf16.mxu1 %v7348_v1 }
 0x18b   : > { %6433 = vmatpush3.bf16.msra.mxu0 %v8000_v29  ;;  %6453 = vmatpush3.bf16.msra.mxu1 %v8000_v29 }
 0x18c   : > { %6458 = vmatprep.subr.bf16.mxu1 %v7348_v1  ;;  %6482 = vmatprep.subr.bf16.mxu0 %v7348_v1 }
 0x18e   : > { %6435 = vmatmul.mubr.bf16.vlgmr.msra.gmra.mrb[44].mxu0 %v1298_v60  ;;  %6455 = vmatmul.mubr.bf16.vlgmr.msra.gmra.mrb[44].mxu1 %v1299_v61 }
 0x18f   : > { %6466 = vmatprep.mubr.msk.bf16.mxu1 %vm7349_vm0, %v7348_v1  ;;  %6490 = vmatprep.mubr.msk.bf16.mxu0 %vm7349_vm0, %v7348_v1 }
 0x190   : > { %6459 = vmatpush3.bf16.msra.mxu1 %v8105_v62  ;;  %6483 = vmatpush3.bf16.msra.mxu0 %v8105_v62 }
 0x191   : > { %6460 = vmatprep.subr.bf16.mxu1 %v7348_v1  ;;  %6484 = vmatprep.subr.bf16.mxu0 %v7348_v1 }
 0x194   : > { %6461 = vmatpush3.bf16.msra.mxu1 %v8116_v10  ;;  %6485 = vmatpush3.bf16.msra.mxu0 %v8116_v10 }
 0x195   : > { %6462 = vmatprep.subr.bf16.mxu1 %v7348_v1  ;;  %6486 = vmatprep.subr.bf16.mxu0 %v7348_v1 }
 0x198   : > { %6463 = vmatpush3.bf16.msra.mxu1 %v8125_v11  ;;  %6487 = vmatpush3.bf16.msra.mxu0 %v8125_v11 }
 0x199   : > { %6464 = vmatprep.subr.bf16.mxu1 %v7348_v1  ;;  %6488 = vmatprep.subr.bf16.mxu0 %v7348_v1 }
 0x19c   : > { %6465 = vmatpush3.bf16.msra.mxu1 %v8131_v12  ;;  %6489 = vmatpush3.bf16.msra.mxu0 %v8131_v12 }
 0x19d   : > { %6470 = vmatprep.subr.bf16.mxu1 %v7348_v1  ;;  %6506 = vmatprep.subr.bf16.mxu0 %v7348_v1 }
 0x1a1   : > { %v918_v63 = vpop.f32.mrb[20].mxu0  ;;  %v958_v0 = vpop.f32.mrb[20].mxu1 }
 0x1a2   : > { %v919_v2 = vadd.f32 %v918_v63, %v7982_v20  ;;  %v959_v3 = vadd.f32 %v958_v0, %v7984_v21  ;;  %v6196_v4 = vpop.f32.mrb[21].mxu0  ;;  %v6216_v5 = vpop.f32.mrb[21].mxu1 }
 0x1a3   : > { %v921_v6 = vpop.f32.mrb[22].mxu0  ;;  %v961_v7 = vpop.f32.mrb[22].mxu1 }
 0x1a4   : > { %v6197_v8 = vpop.f32.mrb[23].mxu0  ;;  %v6217_v9 = vpop.f32.mrb[23].mxu1 }
 0x1c1   : > { %v1076_v13 = vpop.f32.mrb[24].mxu0  ;;  %v1116_v14 = vpop.f32.mrb[24].mxu1 }
 0x1c2   : > { %v1282_v15 = vadd.f32 %v1076_v13, %v8035_v36  ;;  %v1283_v16 = vadd.f32 %v1116_v14, %v8038_v37  ;;  %v6236_v17 = vpop.f32.mrb[25].mxu0  ;;  %v6256_v18 = vpop.f32.mrb[25].mxu1 }
 0x1c3   : > { %v1079_v19 = vpop.f32.mrb[26].mxu0  ;;  %v1119_v20 = vpop.f32.mrb[26].mxu1  ;;  %v7180_v18 = vld [vmem:[%s8928_s3] sm:$0xff]  }
 0x1c4   : > { %v6237_v21 = vpop.f32.mrb[27].mxu0  ;;  %v6257_v22 = vpop.f32.mrb[27].mxu1  ;;  %v7183_v20 = vld [vmem:[%s8928_s3 + $0x18] sm:$0xff]  }
 0x1e1   : > { %v1156_v23 = vpop.f32.mrb[28].mxu0  ;;  %v1196_v24 = vpop.f32.mrb[28].mxu1 }
 0x1e2   : > { %v1284_v25 = vadd.f32 %v1156_v23, %v8079_v50  ;;  %v1285_v26 = vadd.f32 %v1196_v24, %v8082_v51  ;;  %v6276_v27 = vpop.f32.mrb[29].mxu0  ;;  %v6296_v28 = vpop.f32.mrb[29].mxu1 }
 0x1e3   : > { %v1159_v29 = vpop.f32.mrb[30].mxu0  ;;  %v1199_v30 = vpop.f32.mrb[30].mxu1 }
 0x1e4   : > { %v6277_v31 = vpop.f32.mrb[31].mxu0  ;;  %v6297_v32 = vpop.f32.mrb[31].mxu1 }
 0x201   : > { %v1236_v33 = vpop.f32.mrb[32].mxu0  ;;  %v1276_v34 = vpop.f32.mrb[32].mxu1 }
 0x202   : > { %v8144_v35 = vadd.f32 %v1236_v33, %v919_v2  ;;  %v8146_v36 = vadd.f32 %v1276_v34, %v959_v3  ;;  %v6316_v37 = vpop.f32.mrb[33].mxu0  ;;  %v6336_v38 = vpop.f32.mrb[33].mxu1 }
 0x203   : > { %v1239_v39 = vpop.f32.mrb[34].mxu0  ;;  %v1279_v40 = vpop.f32.mrb[34].mxu1 }
 0x204   : > { %v6317_v41 = vpop.f32.mrb[35].mxu0  ;;  %v6337_v42 = vpop.f32.mrb[35].mxu1 }
 0x205   : > { %v7184_v41 = vld [vmem:[%s8928_s3 + $0x40] sm:$0xff]  }
 0x221   : > { %v1399_v43 = vpop.f32.mrb[36].mxu0  ;;  %v1439_v45 = vpop.f32.mrb[36].mxu1 }
 0x222   : > { %v1605_v46 = vadd.f32 %v1399_v43, %v1282_v15  ;;  %v1606_v47 = vadd.f32 %v1439_v45, %v1283_v16  ;;  %v6356_v48 = vpop.f32.mrb[37].mxu0  ;;  %v6376_v49 = vpop.f32.mrb[37].mxu1  ;;  %v7186_v45 = vld [vmem:[%s8928_s3 + $0x50] sm:$0xff]  }
 0x223   : > { %v1402_v50 = vpop.f32.mrb[38].mxu0  ;;  %v1442_v51 = vpop.f32.mrb[38].mxu1 }
 0x224   : > { %v1618_v52 = vadd.f32 %v8151_v44, %v1605_v46  ;;  %v1619_v53 = vadd.f32 %v8151_v44, %v1606_v47  ;;  %v6357_v54 = vpop.f32.mrb[39].mxu0  ;;  %v6377_v55 = vpop.f32.mrb[39].mxu1  ;;  %v7187_v46 = vld [vmem:[%s8928_s3 + $0x58] sm:$0xff]  }
 0x226   : > { %v1624_v56 = vmax.f32 %v1618_v52, 0.0  ;;  %v1625_v57 = vmax.f32 %v1619_v53, 0.0  ;;  %v7188_v53 = vld [vmem:[%s8928_s3 + $0x60] sm:$0xff]  }
 0x228   : > { %1631 = vst.msk [vmem:[#allocation2] sm:$0x3f] %vm1630_vm1, %v1624_v56  ;;  %1632 = vst.msk [vmem:[#allocation2 + $0x8] sm:$0x3f] %vm1630_vm1, %v1625_v57  ;;  %v7189_v56 = vld [vmem:[%s8928_s3 + $0x68] sm:$0xff]   ;;  %v7190_v57 = vld [vmem:[%s8928_s3 + $0x70] sm:$0xff]  }
 0x22f   : > { %v1653_v58 = vld [vmem:[#allocation2 + $0x1] sm:$0xf]  ;;  %v1654_v60 = vld [vmem:[#allocation2 + $0x9] sm:$0xf] }
 0x230   : > { %v1657_v59 = vpack.c.bf16 %v1653_v58, %v1653_v58  ;;  %v1658_v61 = vpack.c.bf16 %v1654_v60, %v1654_v60  ;;  %v1637_v21 = vld [vmem:[#allocation2] sm:$0xf]  ;;  %v1638_v22 = vld [vmem:[#allocation2 + $0x8] sm:$0xf]  ;;  %v7191_v58 = vld [vmem:[%s8928_s3 + $0x78] sm:$0xff]  }
 0x231   : > { %v1641_v23 = vpack.c.bf16 %v1637_v21, %v1637_v21  ;;  %v1642_v24 = vpack.c.bf16 %v1638_v22, %v1638_v22  ;;  %v2063_v47 = vld [vmem:[#allocation2 + $0x2] sm:$0xf]  ;;  %v2064_v48 = vld [vmem:[#allocation2 + $0xa] sm:$0xf] }
 0x232   : > { %6467 = vmatmul.mubr.msk.bf16.vlgmr.msra.gmra.mrb[48].mxu1 %vm1694_vm2, %v1657_v59  ;;  %v2067_v49 = vpack.c.bf16 %v2063_v47, %v2063_v47  ;;  %v2068_v50 = vpack.c.bf16 %v2064_v48, %v2064_v48  ;;  %v2281_v59 = vld [vmem:[#allocation2 + $0x8] sm:$0xf] }
 0x233   : > { %6471 = vmatpush3.bf16.msra.mxu1 %v8105_v62  ;;  %6478 = vmatprep.mubr.msk.bf16.mxu1 %vm7349_vm0, %v7348_v1 }
 0x234   : > { %6472 = vmatprep.subr.bf16.mxu1 %v7348_v1 }
 0x237   : > { %6473 = vmatpush3.bf16.msra.mxu1 %v8116_v10 }
 0x238   : > { %6474 = vmatprep.subr.bf16.mxu1 %v7348_v1 }
 0x23b   : > { %6475 = vmatpush3.bf16.msra.mxu1 %v8125_v11 }
 0x23c   : > { %6476 = vmatprep.subr.bf16.mxu1 %v7348_v1 }
 0x23f   : > { %6477 = vmatpush3.bf16.msra.mxu1 %v8131_v12 }
 0x240   : > { %6494 = vmatprep.subr.bf16.mxu1 %v7348_v1 }
 0x241   : > { %v1479_v63 = vpop.f32.mrb[40].mxu0  ;;  %v1519_v0 = vpop.f32.mrb[40].mxu1 }
 0x242   : > { %v1607_v2 = vadd.f32 %v1479_v63, %v1284_v25  ;;  %v1608_v3 = vadd.f32 %v1519_v0, %v1285_v26  ;;  %6479 = vmatmul.mubr.msk.bf16.vlgmr.msra.gmra.mrb[52].mxu1 %vm1694_vm2, %v1658_v61  ;;  %v6396_v4 = vpop.f32.mrb[41].mxu0  ;;  %v6416_v5 = vpop.f32.mrb[41].mxu1  ;;  %v2285_v61 = vpack.c.bf16 %v2281_v59, %v2281_v59 }
 0x243   : > { %6495 = vmatpush3.bf16.msra.mxu1 %v8105_v62  ;;  %v1482_v6 = vpop.f32.mrb[42].mxu0  ;;  %6502 = vmatprep.mubr.msk.bf16.mxu1 %vm7349_vm0, %v7348_v1  ;;  %v1522_v7 = vpop.f32.mrb[42].mxu1 }
 0x244   : > { %v1620_v8 = vadd.f32 %v8151_v44, %v1607_v2  ;;  %v1621_v9 = vadd.f32 %v8151_v44, %v1608_v3  ;;  %v6397_v13 = vpop.f32.mrb[43].mxu0  ;;  %6496 = vmatprep.subr.bf16.mxu1 %v7348_v1  ;;  %v6417_v14 = vpop.f32.mrb[43].mxu1  ;;  %v7192_v3 = vld [vmem:[%s8928_s3 + $0x80] sm:$0xff]   ;;  %v7193_v6 = vld [vmem:[%s8928_s3 + $0x88] sm:$0xff]   ;;  %v7194_v7 = vld [vmem:[%s8928_s3 + $0x90] sm:$0xff]  }
 0x246   : > { %v1626_v15 = vmax.f32 %v1620_v8, 0.0  ;;  %v1627_v16 = vmax.f32 %v1621_v9, 0.0  ;;  %v7195_v8 = vld [vmem:[%s8928_s3 + $0x98] sm:$0xff]   ;;  %v2498_v9 = vld [vmem:[#allocation2 + $0x9] sm:$0xf] }
 0x247   : > { %6497 = vmatpush3.bf16.msra.mxu1 %v8116_v10  ;;  %v2502_v14 = vpack.c.bf16 %v2498_v9, %v2498_v9 }
 0x248   : > { %1633 = vst.msk [vmem:[#allocation2 + $0x10] sm:$0x3f] %vm1630_vm1, %v1626_v15  ;;  %1634 = vst.msk [vmem:[#allocation2 + $0x18] sm:$0x3f] %vm1630_vm1, %v1627_v16  ;;  %6498 = vmatprep.subr.bf16.mxu1 %v7348_v1 }
 0x24b   : > { %6499 = vmatpush3.bf16.msra.mxu1 %v8125_v11  ;;  %v7181_v11 = vld [vmem:[%s8928_s3 + $0x8] sm:$0xff]  }
 0x24c   : > { %6500 = vmatprep.subr.bf16.mxu1 %v7348_v1 }
 0x24f   : > { %6501 = vmatpush3.bf16.msra.mxu1 %v8131_v12  ;;  %v1655_v62 = vld [vmem:[#allocation2 + $0x11] sm:$0xf]  ;;  %v1656_v17 = vld [vmem:[#allocation2 + $0x19] sm:$0xf] }
 0x250   : > { %6518 = vmatprep.subr.bf16.mxu1 %v7348_v1  ;;  %v1659_v10 = vpack.c.bf16 %v1655_v62, %v1655_v62  ;;  %v1660_v19 = vpack.c.bf16 %v1656_v17, %v1656_v17  ;;  %v7182_v12 = vld [vmem:[%s8928_s3 + $0x10] sm:$0xff]   ;;  %v1640_v40 = vld [vmem:[#allocation2 + $0x18] sm:$0xf]  ;;  %v7196_v17 = vld [vmem:[%s8928_s3 + $0xa0] sm:$0xff]  }
 0x251   : > { %v1639_v39 = vld [vmem:[#allocation2 + $0x10] sm:$0xf]  ;;  %v1644_v43 = vpack.c.bf16 %v1640_v40, %v1640_v40  ;;  %v2066_v52 = vld [vmem:[#allocation2 + $0x1a] sm:$0xf] }
 0x252   : > { %6491 = vmatmul.mubr.msk.bf16.vlgmr.msra.gmra.mrb[48].mxu0 %vm1694_vm2, %v1659_v10  ;;  %6503 = vmatmul.mubr.msk.bf16.vlgmr.msra.gmra.mrb[56].mxu1 %vm1694_vm2, %v1660_v19  ;;  %v1643_v42 = vpack.c.bf16 %v1639_v39, %v1639_v39  ;;  %v2065_v51 = vld [vmem:[#allocation2 + $0x12] sm:$0xf]  ;;  %v2070_v55 = vpack.c.bf16 %v2066_v52, %v2066_v52  ;;  %v2283_v0 = vld [vmem:[#allocation2 + $0x18] sm:$0xf]  ;;  %v7197_v19 = vld [vmem:[%s8928_s3 + $0xa8] sm:$0xff]  }
 0x253   : > { %6507 = vmatpush3.bf16.msra.mxu0 %v7180_v18  ;;  %6519 = vmatpush3.bf16.msra.mxu1 %v7180_v18  ;;  %v2069_v54 = vpack.c.bf16 %v2065_v51, %v2065_v51  ;;  %v2282_v60 = vld [vmem:[#allocation2 + $0x10] sm:$0xf]  ;;  %v2287_v4 = vpack.c.bf16 %v2283_v0, %v2283_v0  ;;  %v2500_v16 = vld [vmem:[#allocation2 + $0x19] sm:$0xf] }
 0x254   : > { %6508 = vmatprep.subr.bf16.mxu0 %v7348_v1  ;;  %6520 = vmatprep.subr.bf16.mxu1 %v7348_v1  ;;  %v2286_v63 = vpack.c.bf16 %v2282_v60, %v2282_v60  ;;  %v2499_v13 = vld [vmem:[#allocation2 + $0x11] sm:$0xf]  ;;  %v7207_v51 = vld [vmem:[%s8928_s3 + $0xf8] sm:$0xff]  }
 0x255   : > { %6514 = vmatprep.mubr.msk.bf16.mxu0 %vm7349_vm0, %v7348_v1  ;;  %6526 = vmatprep.mubr.msk.bf16.mxu1 %vm7349_vm0, %v7348_v1  ;;  %v2503_v15 = vpack.c.bf16 %v2499_v13, %v2499_v13  ;;  %v2716_v21 = vld [vmem:[#allocation2 + $0x12] sm:$0xf] }
 0x256   : > { %v3150_v52 = vld [vmem:[#allocation2 + $0x11] sm:$0xf] }
 0x257   : > { %6509 = vmatpush3.bf16.msra.mxu0 %v7181_v11  ;;  %6521 = vmatpush3.bf16.msra.mxu1 %v7181_v11 }
 0x258   : > { %6510 = vmatprep.subr.bf16.mxu0 %v7348_v1  ;;  %6522 = vmatprep.subr.bf16.mxu1 %v7348_v1 }
 0x25b   : > { %6511 = vmatpush3.bf16.msra.mxu0 %v7182_v12  ;;  %6523 = vmatpush3.bf16.msra.mxu1 %v7182_v12 }
 0x25c   : > { %6512 = vmatprep.subr.bf16.mxu0 %v7348_v1  ;;  %6524 = vmatprep.subr.bf16.mxu1 %v7348_v1 }
 0x25f   : > { %6513 = vmatpush3.bf16.msra.mxu0 %v7183_v20  ;;  %6525 = vmatpush3.bf16.msra.mxu1 %v7183_v20 }
 0x260   : > { %6530 = vmatprep.subr.bf16.mxu0 %v7348_v1  ;;  %6542 = vmatprep.subr.bf16.mxu1 %v7348_v1 }
 0x261   : > { %v1559_v25 = vpop.f32.mrb[44].mxu0  ;;  %v1599_v26 = vpop.f32.mrb[44].mxu1 }
 0x262   : > { %v1609_v27 = vadd.f32 %v1559_v25, %v8144_v35  ;;  %v1610_v28 = vadd.f32 %v1599_v26, %v8146_v36  ;;  %6515 = vmatmul.mubr.msk.bf16.vlgmr.msra.gmra.mrb[52].mxu0 %vm1694_vm2, %v1641_v23  ;;  %6527 = vmatmul.mubr.msk.bf16.vlgmr.msra.gmra.mrb[60].mxu1 %vm1694_vm2, %v1642_v24  ;;  %v6436_v29 = vpop.f32.mrb[45].mxu0  ;;  %v6456_v30 = vpop.f32.mrb[45].mxu1  ;;  %v2720_v23 = vpack.c.bf16 %v2716_v21, %v2716_v21  ;;  %v2717_v24 = vld [vmem:[#allocation2 + $0x1a] sm:$0xf]  ;;  %v7200_v26 = vld [vmem:[%s8928_s3 + $0xc0] sm:$0xff]  }
 0x263   : > { %6531 = vmatpush3.bf16.msra.mxu0 %v7180_v18  ;;  %6543 = vmatpush3.bf16.msra.mxu1 %v7180_v18  ;;  %v1562_v31 = vpop.f32.mrb[46].mxu0  ;;  %v1602_v32 = vpop.f32.mrb[46].mxu1  ;;  %v2504_v18 = vpack.c.bf16 %v2500_v16, %v2500_v16  ;;  %v7201_v29 = vld [vmem:[%s8928_s3 + $0xc8] sm:$0xff]   ;;  %v7202_v30 = vld [vmem:[%s8928_s3 + $0xd0] sm:$0xff]  }
 0x264   : > { %v1622_v33 = vadd.f32 %v8151_v44, %v1609_v27  ;;  %v1623_v34 = vadd.f32 %v8151_v44, %v1610_v28  ;;  %6532 = vmatprep.subr.bf16.mxu0 %v7348_v1  ;;  %6544 = vmatprep.subr.bf16.mxu1 %v7348_v1  ;;  %v6437_v35 = vpop.f32.mrb[47].mxu0  ;;  %v6457_v36 = vpop.f32.mrb[47].mxu1  ;;  %v7185_v44 = vld [vmem:[%s8928_s3 + $0x48] sm:$0xff]   ;;  %v2721_v27 = vpack.c.bf16 %v2717_v24, %v2717_v24  ;;  %v7203_v31 = vld [vmem:[%s8928_s3 + $0xd8] sm:$0xff]   ;;  %v2933_v32 = vld [vmem:[#allocation2 + $0x10] sm:$0xf] }
 0x265   : > { %6538 = vmatprep.mubr.msk.bf16.mxu0 %vm7349_vm0, %v7348_v1  ;;  %6550 = vmatprep.mubr.msk.bf16.mxu1 %vm7349_vm0, %v7348_v1 }
 0x266   : > { %v1628_v37 = vmax.f32 %v1622_v33, 0.0  ;;  %v1629_v38 = vmax.f32 %v1623_v34, 0.0  ;;  %v2934_v33 = vld [vmem:[#allocation2 + $0x18] sm:$0xf]  ;;  %v2937_v34 = vpack.c.bf16 %v2933_v32, %v2933_v32 }
 0x267   : > { %6533 = vmatpush3.bf16.msra.mxu0 %v7181_v11  ;;  %6545 = vmatpush3.bf16.msra.mxu1 %v7181_v11  ;;  %v7198_v11 = vld [vmem:[%s8928_s3 + $0xb0] sm:$0xff]   ;;  %v2938_v35 = vpack.c.bf16 %v2934_v33, %v2934_v33 }
 0x268   : > { %1635 = vst.msk [vmem:[#allocation2 + $0x20] sm:$0x3f] %vm1630_vm1, %v1628_v37  ;;  %1636 = vst.msk [vmem:[#allocation2 + $0x28] sm:$0x3f] %vm1630_vm1, %v1629_v38  ;;  %6534 = vmatprep.subr.bf16.mxu0 %v7348_v1  ;;  %6546 = vmatprep.subr.bf16.mxu1 %v7348_v1 }
 0x26b   : > { %6535 = vmatpush3.bf16.msra.mxu0 %v7182_v12  ;;  %6547 = vmatpush3.bf16.msra.mxu1 %v7182_v12  ;;  %v7199_v12 = vld [vmem:[%s8928_s3 + $0xb8] sm:$0xff]  }
 0x26c   : > { %6536 = vmatprep.subr.bf16.mxu0 %v7348_v1  ;;  %6548 = vmatprep.subr.bf16.mxu1 %v7348_v1 }
 0x26f   : > { %6537 = vmatpush3.bf16.msra.mxu0 %v7183_v20  ;;  %6549 = vmatpush3.bf16.msra.mxu1 %v7183_v20  ;;  %v2284_v2 = vld [vmem:[#allocation2 + $0x20] sm:$0xf]  ;;  %v2715_v20 = vld [vmem:[#allocation2 + $0xa] sm:$0xf] }
 0x270   : > { %6554 = vmatprep.subr.bf16.mxu0 %v7348_v1  ;;  %6566 = vmatprep.subr.bf16.mxu1 %v7348_v1  ;;  %v2288_v5 = vpack.c.bf16 %v2284_v2, %v2284_v2  ;;  %v2501_v62 = vld [vmem:[#allocation2 + $0x21] sm:$0xf]  ;;  %v2719_v22 = vpack.c.bf16 %v2715_v20, %v2715_v20  ;;  %v3368_v20 = vld [vmem:[#allocation2 + $0x1a] sm:$0xf] }
 0x271   : > { %v2505_v10 = vpack.c.bf16 %v2501_v62, %v2501_v62  ;;  %v2718_v25 = vld [vmem:[#allocation2 + $0x22] sm:$0xf] }
 0x272   : > { %6539 = vmatmul.mubr.msk.bf16.vlgmr.msra.gmra.mrb[56].mxu0 %vm1694_vm2, %v1643_v42  ;;  %6551 = vmatmul.mubr.msk.bf16.vlgmr.msra.gmra.mrb[64].mxu1 %vm1694_vm2, %v1644_v43  ;;  %v2722_v28 = vpack.c.bf16 %v2718_v25, %v2718_v25  ;;  %v2935_v40 = vld [vmem:[#allocation2 + $0x20] sm:$0xf] }
 0x273   : > { %6555 = vmatpush3.bf16.msra.mxu0 %v7184_v41  ;;  %6567 = vmatpush3.bf16.msra.mxu1 %v7184_v41  ;;  %v7204_v42 = vld [vmem:[%s8928_s3 + $0xe0] sm:$0xff]   ;;  %v2939_v43 = vpack.c.bf16 %v2935_v40, %v2935_v40 }
 0x274   : > { %6556 = vmatprep.subr.bf16.mxu0 %v7348_v1  ;;  %6568 = vmatprep.subr.bf16.mxu1 %v7348_v1  ;;  %v3152_v2 = vld [vmem:[#allocation2 + $0x21] sm:$0xf] }
 0x275   : > { %6562 = vmatprep.mubr.msk.bf16.mxu0 %vm7349_vm0, %v7348_v1  ;;  %6574 = vmatprep.mubr.msk.bf16.mxu1 %vm7349_vm0, %v7348_v1  ;;  %v3369_v33 = vld [vmem:[#allocation2 + $0x22] sm:$0xf] }
 0x277   : > { %6557 = vmatpush3.bf16.msra.mxu0 %v7185_v44  ;;  %6569 = vmatpush3.bf16.msra.mxu1 %v7185_v44 }
 0x278   : > { %6558 = vmatprep.subr.bf16.mxu0 %v7348_v1  ;;  %6570 = vmatprep.subr.bf16.mxu1 %v7348_v1 }
 0x27b   : > { %6559 = vmatpush3.bf16.msra.mxu0 %v7186_v45  ;;  %6571 = vmatpush3.bf16.msra.mxu1 %v7186_v45 }
 0x27c   : > { %6560 = vmatprep.subr.bf16.mxu0 %v7348_v1  ;;  %6572 = vmatprep.subr.bf16.mxu1 %v7348_v1 }
 0x27f   : > { %6561 = vmatpush3.bf16.msra.mxu0 %v7187_v46  ;;  %6573 = vmatpush3.bf16.msra.mxu1 %v7187_v46 }
 0x280   : > { %6578 = vmatprep.subr.bf16.mxu0 %v7348_v1  ;;  %6590 = vmatprep.subr.bf16.mxu1 %v7348_v1 }
 0x282   : > { %6563 = vmatmul.mubr.msk.bf16.vlgmr.msra.gmra.mrb[60].mxu0 %vm1694_vm2, %v2067_v49  ;;  %6575 = vmatmul.mubr.msk.bf16.vlgmr.msra.gmra.mrb[68].mxu1 %vm1694_vm2, %v2068_v50  ;;  %v7206_v49 = vld [vmem:[%s8928_s3 + $0xf0] sm:$0xff]  }
 0x283   : > { %6579 = vmatpush3.bf16.msra.mxu0 %v7184_v41  ;;  %6591 = vmatpush3.bf16.msra.mxu1 %v7184_v41  ;;  %v2936_v41 = vld [vmem:[#allocation2 + $0x28] sm:$0xf] }
 0x284   : > { %6580 = vmatprep.subr.bf16.mxu0 %v7348_v1  ;;  %6592 = vmatprep.subr.bf16.mxu1 %v7348_v1 }
 0x285   : > { %6586 = vmatprep.mubr.msk.bf16.mxu0 %vm7349_vm0, %v7348_v1  ;;  %6598 = vmatprep.mubr.msk.bf16.mxu1 %vm7349_vm0, %v7348_v1 }
 0x287   : > { %6581 = vmatpush3.bf16.msra.mxu0 %v7185_v44  ;;  %6593 = vmatpush3.bf16.msra.mxu1 %v7185_v44  ;;  %v2940_v44 = vpack.c.bf16 %v2936_v41, %v2936_v41 }
 0x288   : > { %6582 = vmatprep.subr.bf16.mxu0 %v7348_v1  ;;  %6594 = vmatprep.subr.bf16.mxu1 %v7348_v1 }
 0x28b   : > { %6583 = vmatpush3.bf16.msra.mxu0 %v7186_v45  ;;  %6595 = vmatpush3.bf16.msra.mxu1 %v7186_v45  ;;  %v7205_v45 = vld [vmem:[%s8928_s3 + $0xe8] sm:$0xff]  }
 0x28c   : > { %6584 = vmatprep.subr.bf16.mxu0 %v7348_v1  ;;  %6596 = vmatprep.subr.bf16.mxu1 %v7348_v1 }
 0x28f   : > { %6585 = vmatpush3.bf16.msra.mxu0 %v7187_v46  ;;  %6597 = vmatpush3.bf16.msra.mxu1 %v7187_v46 }
 0x290   : > { %6602 = vmatprep.subr.bf16.mxu0 %v7348_v1  ;;  %6614 = vmatprep.subr.bf16.mxu1 %v7348_v1 }
 0x292   : > { %6587 = vmatmul.mubr.msk.bf16.vlgmr.msra.gmra.mrb[64].mxu0 %vm1694_vm2, %v2069_v54  ;;  %6599 = vmatmul.mubr.msk.bf16.vlgmr.msra.gmra.mrb[72].mxu1 %vm1694_vm2, %v2070_v55  ;;  %v3154_v54 = vpack.c.bf16 %v3150_v52, %v3150_v52 }
 0x293   : > { %6603 = vmatpush3.bf16.msra.mxu0 %v7188_v53  ;;  %6615 = vmatpush3.bf16.msra.mxu1 %v7188_v53 }
 0x294   : > { %6604 = vmatprep.subr.bf16.mxu0 %v7348_v1  ;;  %6616 = vmatprep.subr.bf16.mxu1 %v7348_v1 }
 0x295   : > { %6610 = vmatprep.mubr.msk.bf16.mxu0 %vm7349_vm0, %v7348_v1  ;;  %6622 = vmatprep.mubr.msk.bf16.mxu1 %vm7349_vm0, %v7348_v1 }
 0x297   : > { %6605 = vmatpush3.bf16.msra.mxu0 %v7189_v56  ;;  %6617 = vmatpush3.bf16.msra.mxu1 %v7189_v56 }
 0x298   : > { %6606 = vmatprep.subr.bf16.mxu0 %v7348_v1  ;;  %6618 = vmatprep.subr.bf16.mxu1 %v7348_v1 }
 0x29b   : > { %6607 = vmatpush3.bf16.msra.mxu0 %v7190_v57  ;;  %6619 = vmatpush3.bf16.msra.mxu1 %v7190_v57 }
 0x29c   : > { %6608 = vmatprep.subr.bf16.mxu0 %v7348_v1  ;;  %6620 = vmatprep.subr.bf16.mxu1 %v7348_v1 }
 0x29f   : > { %6609 = vmatpush3.bf16.msra.mxu0 %v7191_v58  ;;  %6621 = vmatpush3.bf16.msra.mxu1 %v7191_v58 }
 0x2a0   : > { %6626 = vmatprep.subr.bf16.mxu0 %v7348_v1  ;;  %6638 = vmatprep.subr.bf16.mxu1 %v7348_v1 }
 0x2a2   : > { %6611 = vmatmul.mubr.msk.bf16.vlgmr.msra.gmra.mrb[68].mxu0 %vm1694_vm2, %v2285_v61  ;;  %6623 = vmatmul.mubr.msk.bf16.vlgmr.msra.gmra.mrb[76].mxu1 %vm1694_vm2, %v2286_v63 }
 0x2a3   : > { %6627 = vmatpush3.bf16.msra.mxu0 %v7188_v53  ;;  %6639 = vmatpush3.bf16.msra.mxu1 %v7188_v53  ;;  %v3151_v53 = vld [vmem:[#allocation2 + $0x19] sm:$0xf] }
 0x2a4   : > { %6628 = vmatprep.subr.bf16.mxu0 %v7348_v1  ;;  %6640 = vmatprep.subr.bf16.mxu1 %v7348_v1  ;;  %v3155_v55 = vpack.c.bf16 %v3151_v53, %v3151_v53 }
 0x2a5   : > { %6634 = vmatprep.mubr.msk.bf16.mxu0 %vm7349_vm0, %v7348_v1  ;;  %6646 = vmatprep.mubr.msk.bf16.mxu1 %vm7349_vm0, %v7348_v1 }
 0x2a7   : > { %6629 = vmatpush3.bf16.msra.mxu0 %v7189_v56  ;;  %6641 = vmatpush3.bf16.msra.mxu1 %v7189_v56 }
 0x2a8   : > { %6630 = vmatprep.subr.bf16.mxu0 %v7348_v1  ;;  %6642 = vmatprep.subr.bf16.mxu1 %v7348_v1 }
 0x2ab   : > { %6631 = vmatpush3.bf16.msra.mxu0 %v7190_v57  ;;  %6643 = vmatpush3.bf16.msra.mxu1 %v7190_v57 }
 0x2ac   : > { %6632 = vmatprep.subr.bf16.mxu0 %v7348_v1  ;;  %6644 = vmatprep.subr.bf16.mxu1 %v7348_v1 }
 0x2af   : > { %6633 = vmatpush3.bf16.msra.mxu0 %v7191_v58  ;;  %6645 = vmatpush3.bf16.msra.mxu1 %v7191_v58 }
 0x2b0   : > { %6650 = vmatprep.subr.bf16.mxu0 %v7348_v1  ;;  %6662 = vmatprep.subr.bf16.mxu1 %v7348_v1 }
 0x2b2   : > { %6635 = vmatmul.mubr.msk.bf16.vlgmr.msra.gmra.mrb[72].mxu0 %vm1694_vm2, %v2287_v4  ;;  %6647 = vmatmul.mubr.msk.bf16.vlgmr.msra.gmra.mrb[80].mxu1 %vm1694_vm2, %v2288_v5  ;;  %v7208_v4 = vld [vmem:[%s8928_s3 + $0x100] sm:$0xff]   ;;  %v3156_v5 = vpack.c.bf16 %v3152_v2, %v3152_v2 }
 0x2b3   : > { %6651 = vmatpush3.bf16.msra.mxu0 %v7192_v3  ;;  %6663 = vmatpush3.bf16.msra.mxu1 %v7192_v3 }
 0x2b4   : > { %6652 = vmatprep.subr.bf16.mxu0 %v7348_v1  ;;  %6664 = vmatprep.subr.bf16.mxu1 %v7348_v1 }
 0x2b5   : > { %6658 = vmatprep.mubr.msk.bf16.mxu0 %vm7349_vm0, %v7348_v1  ;;  %6670 = vmatprep.mubr.msk.bf16.mxu1 %vm7349_vm0, %v7348_v1 }
 0x2b7   : > { %6653 = vmatpush3.bf16.msra.mxu0 %v7193_v6  ;;  %6665 = vmatpush3.bf16.msra.mxu1 %v7193_v6 }
 0x2b8   : > { %6654 = vmatprep.subr.bf16.mxu0 %v7348_v1  ;;  %6666 = vmatprep.subr.bf16.mxu1 %v7348_v1 }
 0x2bb   : > { %6655 = vmatpush3.bf16.msra.mxu0 %v7194_v7  ;;  %6667 = vmatpush3.bf16.msra.mxu1 %v7194_v7 }
 0x2bc   : > { %6656 = vmatprep.subr.bf16.mxu0 %v7348_v1  ;;  %6668 = vmatprep.subr.bf16.mxu1 %v7348_v1 }
 0x2bf   : > { %6657 = vmatpush3.bf16.msra.mxu0 %v7195_v8  ;;  %6669 = vmatpush3.bf16.msra.mxu1 %v7195_v8 }
 0x2c0   : > { %6674 = vmatprep.subr.bf16.mxu0 %v7348_v1  ;;  %6686 = vmatprep.subr.bf16.mxu1 %v7348_v1 }
 0x2c2   : > { %6659 = vmatmul.mubr.msk.bf16.vlgmr.msra.gmra.mrb[76].mxu0 %vm1694_vm2, %v2502_v14  ;;  %6671 = vmatmul.mubr.msk.bf16.vlgmr.msra.gmra.mrb[84].mxu1 %vm1694_vm2, %v2503_v15 }
 0x2c3   : > { %6675 = vmatpush3.bf16.msra.mxu0 %v7192_v3  ;;  %6687 = vmatpush3.bf16.msra.mxu1 %v7192_v3  ;;  %v3153_v3 = vld [vmem:[#allocation2 + $0x29] sm:$0xf] }
 0x2c4   : > { %6676 = vmatprep.subr.bf16.mxu0 %v7348_v1  ;;  %6688 = vmatprep.subr.bf16.mxu1 %v7348_v1 }
 0x2c5   : > { %6682 = vmatprep.mubr.msk.bf16.mxu0 %vm7349_vm0, %v7348_v1  ;;  %6694 = vmatprep.mubr.msk.bf16.mxu1 %vm7349_vm0, %v7348_v1 }
 0x2c7   : > { %6677 = vmatpush3.bf16.msra.mxu0 %v7193_v6  ;;  %6689 = vmatpush3.bf16.msra.mxu1 %v7193_v6  ;;  %v3157_v6 = vpack.c.bf16 %v3153_v3, %v3153_v3 }
 0x2c8   : > { %6678 = vmatprep.subr.bf16.mxu0 %v7348_v1  ;;  %6690 = vmatprep.subr.bf16.mxu1 %v7348_v1 }
 0x2cb   : > { %6679 = vmatpush3.bf16.msra.mxu0 %v7194_v7  ;;  %6691 = vmatpush3.bf16.msra.mxu1 %v7194_v7  ;;  %v7209_v7 = vld [vmem:[%s8928_s3 + $0x108] sm:$0xff]  }
 0x2cc   : > { %6680 = vmatprep.subr.bf16.mxu0 %v7348_v1  ;;  %6692 = vmatprep.subr.bf16.mxu1 %v7348_v1 }
 0x2cf   : > { %6681 = vmatpush3.bf16.msra.mxu0 %v7195_v8  ;;  %6693 = vmatpush3.bf16.msra.mxu1 %v7195_v8 }
 0x2d0   : > { %6698 = vmatprep.subr.bf16.mxu0 %v7348_v1  ;;  %6710 = vmatprep.subr.bf16.mxu1 %v7348_v1 }
 0x2d2   : > { %6683 = vmatmul.mubr.msk.bf16.vlgmr.msra.gmra.mrb[80].mxu0 %vm1694_vm2, %v2504_v18  ;;  %6695 = vmatmul.mubr.msk.bf16.vlgmr.msra.gmra.mrb[88].mxu1 %vm1694_vm2, %v2505_v10  ;;  %v7210_v18 = vld [vmem:[%s8928_s3 + $0x110] sm:$0xff]  }
 0x2d3   : > { %6699 = vmatpush3.bf16.msra.mxu0 %v7196_v17  ;;  %6711 = vmatpush3.bf16.msra.mxu1 %v7196_v17 }
 0x2d4   : > { %6700 = vmatprep.subr.bf16.mxu0 %v7348_v1  ;;  %6712 = vmatprep.subr.bf16.mxu1 %v7348_v1 }
 0x2d5   : > { %6706 = vmatprep.mubr.msk.bf16.mxu0 %vm7349_vm0, %v7348_v1  ;;  %6718 = vmatprep.mubr.msk.bf16.mxu1 %vm7349_vm0, %v7348_v1 }
 0x2d7   : > { %6701 = vmatpush3.bf16.msra.mxu0 %v7197_v19  ;;  %6713 = vmatpush3.bf16.msra.mxu1 %v7197_v19 }
 0x2d8   : > { %6702 = vmatprep.subr.bf16.mxu0 %v7348_v1  ;;  %6714 = vmatprep.subr.bf16.mxu1 %v7348_v1 }
 0x2db   : > { %6703 = vmatpush3.bf16.msra.mxu0 %v7198_v11  ;;  %6715 = vmatpush3.bf16.msra.mxu1 %v7198_v11 }
 0x2dc   : > { %6704 = vmatprep.subr.bf16.mxu0 %v7348_v1  ;;  %6716 = vmatprep.subr.bf16.mxu1 %v7348_v1 }
 0x2df   : > { %6705 = vmatpush3.bf16.msra.mxu0 %v7199_v12  ;;  %6717 = vmatpush3.bf16.msra.mxu1 %v7199_v12 }
 0x2e0   : > { %6722 = vmatprep.subr.bf16.mxu0 %v7348_v1  ;;  %6734 = vmatprep.subr.bf16.mxu1 %v7348_v1 }
 0x2e2   : > { %6707 = vmatmul.mubr.msk.bf16.vlgmr.msra.gmra.mrb[84].mxu0 %vm1694_vm2, %v2719_v22  ;;  %6719 = vmatmul.mubr.msk.bf16.vlgmr.msra.gmra.mrb[92].mxu1 %vm1694_vm2, %v2720_v23  ;;  %v3372_v22 = vpack.c.bf16 %v3368_v20, %v3368_v20 }
 0x2e3   : > { %6723 = vmatpush3.bf16.msra.mxu0 %v7196_v17  ;;  %6735 = vmatpush3.bf16.msra.mxu1 %v7196_v17 }
 0x2e4   : > { %6724 = vmatprep.subr.bf16.mxu0 %v7348_v1  ;;  %6736 = vmatprep.subr.bf16.mxu1 %v7348_v1 }
 0x2e5   : > { %6730 = vmatprep.mubr.msk.bf16.mxu0 %vm7349_vm0, %v7348_v1  ;;  %6742 = vmatprep.mubr.msk.bf16.mxu1 %vm7349_vm0, %v7348_v1 }
 0x2e7   : > { %6725 = vmatpush3.bf16.msra.mxu0 %v7197_v19  ;;  %6737 = vmatpush3.bf16.msra.mxu1 %v7197_v19 }
 0x2e8   : > { %6726 = vmatprep.subr.bf16.mxu0 %v7348_v1  ;;  %6738 = vmatprep.subr.bf16.mxu1 %v7348_v1 }
 0x2eb   : > { %6727 = vmatpush3.bf16.msra.mxu0 %v7198_v11  ;;  %6739 = vmatpush3.bf16.msra.mxu1 %v7198_v11  ;;  %v7211_v11 = vld [vmem:[%s8928_s3 + $0x118] sm:$0xff]  }
 0x2ec   : > { %6728 = vmatprep.subr.bf16.mxu0 %v7348_v1  ;;  %6740 = vmatprep.subr.bf16.mxu1 %v7348_v1 }
 0x2ef   : > { %6729 = vmatpush3.bf16.msra.mxu0 %v7199_v12  ;;  %6741 = vmatpush3.bf16.msra.mxu1 %v7199_v12  ;;  %v3367_v12 = vld [vmem:[#allocation2 + $0x12] sm:$0xf] }
 0x2f0   : > { %6746 = vmatprep.subr.bf16.mxu0 %v7348_v1  ;;  %6758 = vmatprep.subr.bf16.mxu1 %v7348_v1  ;;  %v3371_v21 = vpack.c.bf16 %v3367_v12, %v3367_v12 }
 0x2f2   : > { %6731 = vmatmul.mubr.msk.bf16.vlgmr.msra.gmra.mrb[88].mxu0 %vm1694_vm2, %v2721_v27  ;;  %6743 = vmatmul.mubr.msk.bf16.vlgmr.msra.gmra.mrb[96].mxu1 %vm1694_vm2, %v2722_v28 }
 0x2f3   : > { %6747 = vmatpush3.bf16.msra.mxu0 %v7200_v26  ;;  %6759 = vmatpush3.bf16.msra.mxu1 %v7200_v26 }
 0x2f4   : > { %6748 = vmatprep.subr.bf16.mxu0 %v7348_v1  ;;  %6760 = vmatprep.subr.bf16.mxu1 %v7348_v1 }
 0x2f5   : > { %6754 = vmatprep.mubr.msk.bf16.mxu0 %vm7349_vm0, %v7348_v1  ;;  %6766 = vmatprep.mubr.msk.bf16.mxu1 %vm7349_vm0, %v7348_v1 }
 0x2f7   : > { %6749 = vmatpush3.bf16.msra.mxu0 %v7201_v29  ;;  %6761 = vmatpush3.bf16.msra.mxu1 %v7201_v29 }
 0x2f8   : > { %6750 = vmatprep.subr.bf16.mxu0 %v7348_v1  ;;  %6762 = vmatprep.subr.bf16.mxu1 %v7348_v1 }
 0x2fb   : > { %6751 = vmatpush3.bf16.msra.mxu0 %v7202_v30  ;;  %6763 = vmatpush3.bf16.msra.mxu1 %v7202_v30 }
 0x2fc   : > { %6752 = vmatprep.subr.bf16.mxu0 %v7348_v1  ;;  %6764 = vmatprep.subr.bf16.mxu1 %v7348_v1 }
 0x2ff   : > { %6753 = vmatpush3.bf16.msra.mxu0 %v7203_v31  ;;  %6765 = vmatpush3.bf16.msra.mxu1 %v7203_v31 }
 0x300   : > { %6770 = vmatprep.subr.bf16.mxu0 %v7348_v1  ;;  %6782 = vmatprep.subr.bf16.mxu1 %v7348_v1 }
 0x302   : > { %6755 = vmatmul.mubr.msk.bf16.vlgmr.msra.gmra.mrb[92].mxu0 %vm1694_vm2, %v2937_v34  ;;  %6767 = vmatmul.mubr.msk.bf16.vlgmr.msra.gmra.mrb[100].mxu1 %vm1694_vm2, %v2938_v35  ;;  %v3370_v34 = vld [vmem:[#allocation2 + $0x2a] sm:$0xf]  ;;  %v3373_v35 = vpack.c.bf16 %v3369_v33, %v3369_v33 }
 0x303   : > { %6771 = vmatpush3.bf16.msra.mxu0 %v7200_v26  ;;  %6783 = vmatpush3.bf16.msra.mxu1 %v7200_v26 }
 0x304   : > { %6772 = vmatprep.subr.bf16.mxu0 %v7348_v1  ;;  %6784 = vmatprep.subr.bf16.mxu1 %v7348_v1 }
 0x305   : > { %v8419_v36 = vpop.f32.mrb[48].mxu1  ;;  %6778 = vmatprep.mubr.msk.bf16.mxu0 %vm7349_vm0, %v7348_v1  ;;  %6790 = vmatprep.mubr.msk.bf16.mxu1 %vm7349_vm0, %v7348_v1 }
 0x306   : > { %v6468_v37 = vpop.f32.mrb[49].mxu1 }
 0x307   : > { %6773 = vmatpush3.bf16.msra.mxu0 %v7201_v29  ;;  %6785 = vmatpush3.bf16.msra.mxu1 %v7201_v29  ;;  %v1735_v38 = vpop.f32.mrb[50].mxu1 }
 0x308   : > { %v6469_v39 = vpop.f32.mrb[51].mxu1  ;;  %6774 = vmatprep.subr.bf16.mxu0 %v7348_v1  ;;  %6786 = vmatprep.subr.bf16.mxu1 %v7348_v1 }
 0x30b   : > { %6775 = vmatpush3.bf16.msra.mxu0 %v7202_v30  ;;  %6787 = vmatpush3.bf16.msra.mxu1 %v7202_v30 }
 0x30c   : > { %6776 = vmatprep.subr.bf16.mxu0 %v7348_v1  ;;  %6788 = vmatprep.subr.bf16.mxu1 %v7348_v1 }
 0x30f   : > { %6777 = vmatpush3.bf16.msra.mxu0 %v7203_v31  ;;  %6789 = vmatpush3.bf16.msra.mxu1 %v7203_v31 }
 0x310   : > { %6794 = vmatprep.subr.bf16.mxu0 %v7348_v1  ;;  %6806 = vmatprep.subr.bf16.mxu1 %v7348_v1 }
 0x312   : > { %6779 = vmatmul.mubr.msk.bf16.vlgmr.msra.gmra.mrb[96].mxu0 %vm1694_vm2, %v2939_v43  ;;  %6791 = vmatmul.mubr.msk.bf16.vlgmr.msra.gmra.mrb[104].mxu1 %vm1694_vm2, %v2940_v44 }
 0x313   : > { %6795 = vmatpush3.bf16.msra.mxu0 %v7204_v42  ;;  %6807 = vmatpush3.bf16.msra.mxu1 %v7204_v42 }
 0x314   : > { %6796 = vmatprep.subr.bf16.mxu0 %v7348_v1  ;;  %6808 = vmatprep.subr.bf16.mxu1 %v7348_v1 }
 0x315   : > { %v8441_v46 = vpop.f32.mrb[52].mxu1  ;;  %6802 = vmatprep.mubr.msk.bf16.mxu0 %vm7349_vm0, %v7348_v1  ;;  %6814 = vmatprep.mubr.msk.bf16.mxu1 %vm7349_vm0, %v7348_v1 }
 0x316   : > { %v6480_v47 = vpop.f32.mrb[53].mxu1 }
 0x317   : > { %v1778_v48 = vpop.f32.mrb[54].mxu1  ;;  %6797 = vmatpush3.bf16.msra.mxu0 %v7205_v45  ;;  %6809 = vmatpush3.bf16.msra.mxu1 %v7205_v45 }
 0x318   : > { %v6481_v50 = vpop.f32.mrb[55].mxu1  ;;  %6798 = vmatprep.subr.bf16.mxu0 %v7348_v1  ;;  %6810 = vmatprep.subr.bf16.mxu1 %v7348_v1 }
 0x31b   : > { %6799 = vmatpush3.bf16.msra.mxu0 %v7206_v49  ;;  %6811 = vmatpush3.bf16.msra.mxu1 %v7206_v49 }
 0x31c   : > { %6800 = vmatprep.subr.bf16.mxu0 %v7348_v1  ;;  %6812 = vmatprep.subr.bf16.mxu1 %v7348_v1 }
 0x31f   : > { %6801 = vmatpush3.bf16.msra.mxu0 %v7207_v51  ;;  %6813 = vmatpush3.bf16.msra.mxu1 %v7207_v51 }
 0x320   : > { %6818 = vmatprep.subr.bf16.mxu0 %v7348_v1  ;;  %6830 = vmatprep.subr.bf16.mxu1 %v7348_v1 }
 0x322   : > { %6803 = vmatmul.mubr.msk.bf16.vlgmr.msra.gmra.mrb[100].mxu0 %vm1694_vm2, %v3154_v54  ;;  %6815 = vmatmul.mubr.msk.bf16.vlgmr.msra.gmra.mrb[108].mxu1 %vm1694_vm2, %v3155_v55 }
 0x323   : > { %6819 = vmatpush3.bf16.msra.mxu0 %v7204_v42  ;;  %6831 = vmatpush3.bf16.msra.mxu1 %v7204_v42 }
 0x324   : > { %6820 = vmatprep.subr.bf16.mxu0 %v7348_v1  ;;  %6832 = vmatprep.subr.bf16.mxu1 %v7348_v1 }
 0x325   : > { %v8463_v56 = vpop.f32.mrb[48].mxu0  ;;  %v8465_v57 = vpop.f32.mrb[56].mxu1  ;;  %6826 = vmatprep.mubr.msk.bf16.mxu0 %vm7349_vm0, %v7348_v1  ;;  %6838 = vmatprep.mubr.msk.bf16.mxu1 %vm7349_vm0, %v7348_v1 }
 0x326   : > { %v6492_v58 = vpop.f32.mrb[49].mxu0  ;;  %v6504_v59 = vpop.f32.mrb[57].mxu1 }
 0x327   : > { %6821 = vmatpush3.bf16.msra.mxu0 %v7205_v45  ;;  %6833 = vmatpush3.bf16.msra.mxu1 %v7205_v45  ;;  %v1821_v60 = vpop.f32.mrb[50].mxu0  ;;  %v1864_v61 = vpop.f32.mrb[58].mxu1 }
 0x328   : > { %v6493_v63 = vpop.f32.mrb[51].mxu0  ;;  %v6505_v0 = vpop.f32.mrb[59].mxu1  ;;  %6822 = vmatprep.subr.bf16.mxu0 %v7348_v1  ;;  %6834 = vmatprep.subr.bf16.mxu1 %v7348_v1 }
 0x32b   : > { %6823 = vmatpush3.bf16.msra.mxu0 %v7206_v49  ;;  %6835 = vmatpush3.bf16.msra.mxu1 %v7206_v49 }
 0x32c   : > { %6824 = vmatprep.subr.bf16.mxu0 %v7348_v1  ;;  %6836 = vmatprep.subr.bf16.mxu1 %v7348_v1 }
 0x32f   : > { %6825 = vmatpush3.bf16.msra.mxu0 %v7207_v51  ;;  %6837 = vmatpush3.bf16.msra.mxu1 %v7207_v51 }
 0x330   : > { %6842 = vmatprep.subr.bf16.mxu0 %v7348_v1  ;;  %6854 = vmatprep.subr.bf16.mxu1 %v7348_v1 }
 0x332   : > { %6827 = vmatmul.mubr.msk.bf16.vlgmr.msra.gmra.mrb[104].mxu0 %vm1694_vm2, %v3156_v5  ;;  %6839 = vmatmul.mubr.msk.bf16.vlgmr.msra.gmra.mrb[112].mxu1 %vm1694_vm2, %v3157_v6 }
 0x333   : > { %6843 = vmatpush3.bf16.msra.mxu0 %v7208_v4  ;;  %6855 = vmatpush3.bf16.msra.mxu1 %v7208_v4 }
 0x334   : > { %6844 = vmatprep.subr.bf16.mxu0 %v7348_v1  ;;  %6856 = vmatprep.subr.bf16.mxu1 %v7348_v1 }
 0x335   : > { %v1928_v8 = vpop.f32.mrb[52].mxu0  ;;  %v1971_v9 = vpop.f32.mrb[60].mxu1  ;;  %6850 = vmatprep.mubr.msk.bf16.mxu0 %vm7349_vm0, %v7348_v1  ;;  %6862 = vmatprep.mubr.msk.bf16.mxu1 %vm7349_vm0, %v7348_v1 }
 0x336   : > { %v8492_v13 = vadd.f32 %v1928_v8, %v8419_v36  ;;  %v8495_v14 = vadd.f32 %v1971_v9, %v8441_v46  ;;  %v6516_v15 = vpop.f32.mrb[53].mxu0  ;;  %v6528_v16 = vpop.f32.mrb[61].mxu1  ;;  %v3374_v36 = vpack.c.bf16 %v3370_v34, %v3370_v34 }
 0x337   : > { %v1931_v62 = vpop.f32.mrb[54].mxu0  ;;  %v1974_v17 = vpop.f32.mrb[62].mxu1  ;;  %6845 = vmatpush3.bf16.msra.mxu0 %v7209_v7  ;;  %6857 = vmatpush3.bf16.msra.mxu1 %v7209_v7 }
 0x338   : > { %v6517_v10 = vpop.f32.mrb[55].mxu0  ;;  %v6529_v19 = vpop.f32.mrb[63].mxu1  ;;  %6846 = vmatprep.subr.bf16.mxu0 %v7348_v1  ;;  %6858 = vmatprep.subr.bf16.mxu1 %v7348_v1 }
 0x33b   : > { %6847 = vmatpush3.bf16.msra.mxu0 %v7210_v18  ;;  %6859 = vmatpush3.bf16.msra.mxu1 %v7210_v18 }
 0x33c   : > { %6848 = vmatprep.subr.bf16.mxu0 %v7348_v1  ;;  %6860 = vmatprep.subr.bf16.mxu1 %v7348_v1 }
 0x33f   : > { %6849 = vmatpush3.bf16.msra.mxu0 %v7211_v11  ;;  %6861 = vmatpush3.bf16.msra.mxu1 %v7211_v11 }
 0x340   : > { %6866 = vmatprep.subr.bf16.mxu0 %v7348_v1  ;;  %6878 = vmatprep.subr.bf16.mxu1 %v7348_v1 }
 0x342   : > { %6851 = vmatmul.mubr.msk.bf16.vlgmr.msra.gmra.mrb[108].mxu0 %vm1694_vm2, %v3371_v21  ;;  %6863 = vmatmul.mubr.msk.bf16.vlgmr.msra.gmra.mrb[116].mxu1 %vm1694_vm2, %v3372_v22 }
 0x343   : > { %6867 = vmatpush3.bf16.msra.mxu0 %v7208_v4  ;;  %6879 = vmatpush3.bf16.msra.mxu1 %v7208_v4 }
 0x344   : > { %6868 = vmatprep.subr.bf16.mxu0 %v7348_v1  ;;  %6880 = vmatprep.subr.bf16.mxu1 %v7348_v1 }
 0x345   : > { %v2014_v23 = vpop.f32.mrb[56].mxu0  ;;  %v2057_v24 = vpop.f32.mrb[64].mxu1  ;;  %6874 = vmatprep.mubr.msk.bf16.mxu0 %vm7349_vm0, %v7348_v1  ;;  %6886 = vmatprep.mubr.msk.bf16.mxu1 %vm7349_vm0, %v7348_v1 }
 0x346   : > { %v2015_v25 = vadd.f32 %v2014_v23, %v8463_v56  ;;  %v2058_v26 = vadd.f32 %v2057_v24, %v8465_v57  ;;  %v6540_v27 = vpop.f32.mrb[57].mxu0  ;;  %v6552_v28 = vpop.f32.mrb[65].mxu1  ;;  %v7212_v24 = vld [vmem:[%s8930_s5 + $0x20] sm:$0xff]  }
 0x347   : > { %v2017_v29 = vpop.f32.mrb[58].mxu0  ;;  %v2060_v30 = vpop.f32.mrb[66].mxu1  ;;  %6869 = vmatpush3.bf16.msra.mxu0 %v7209_v7  ;;  %6881 = vmatpush3.bf16.msra.mxu1 %v7209_v7  ;;  %v7215_v27 = vld [vmem:[%s8930_s5 + $0x8] sm:$0xff]   ;;  %v7216_v28 = vld [vmem:[%s8930_s5 + $0x30] sm:$0xff]  }
 0x348   : > { %v6541_v31 = vpop.f32.mrb[59].mxu0  ;;  %v6553_v32 = vpop.f32.mrb[67].mxu1  ;;  %6870 = vmatprep.subr.bf16.mxu0 %v7348_v1  ;;  %6882 = vmatprep.subr.bf16.mxu1 %v7348_v1  ;;  %v7217_v29 = vld [vmem:[%s8930_s5 + $0x10] sm:$0xff]   ;;  %v7218_v30 = vld [vmem:[%s8930_s5 + $0x38] sm:$0xff]  }
 0x349   : > { %v7219_v31 = vld [vmem:[%s8930_s5 + $0x18] sm:$0xff]  }
 0x34b   : > { %6871 = vmatpush3.bf16.msra.mxu0 %v7210_v18  ;;  %6883 = vmatpush3.bf16.msra.mxu1 %v7210_v18 }
 0x34c   : > { %6872 = vmatprep.subr.bf16.mxu0 %v7348_v1  ;;  %6884 = vmatprep.subr.bf16.mxu1 %v7348_v1 }
 0x34f   : > { %6873 = vmatpush3.bf16.msra.mxu0 %v7211_v11  ;;  %6885 = vmatpush3.bf16.msra.mxu1 %v7211_v11 }
 0x350   : > { %6890 = vmatprep.subr.bf16.mxu0 %v7348_v1  ;;  %6902 = vmatprep.subr.bf16.mxu1 %v7348_v1 }
 0x352   : > { %6875 = vmatmul.mubr.msk.bf16.vlgmr.msra.gmra.mrb[112].mxu0 %vm1694_vm2, %v3373_v35  ;;  %6887 = vmatmul.mubr.msk.bf16.vlgmr.msra.gmra.mrb[120].mxu1 %vm1694_vm2, %v3374_v36 }
 0x353   : > { %6898 = vmatprep.mubr.msk.bf16.mxu0 %vm7349_vm0, %v7348_v1  ;;  %6910 = vmatprep.mubr.msk.bf16.mxu1 %vm7349_vm0, %v7348_v1 }
 0x354   : > { %6891 = vmatpush3.bf16.msra.mxu0 %v7212_v24 }
 0x355   : > { %v2141_v37 = vpop.f32.mrb[60].mxu0  ;;  %v2184_v38 = vpop.f32.mrb[68].mxu1  ;;  %6892 = vmatprep.subr.bf16.mxu0 %v7348_v1 }
 0x356   : > { %v2276_v39 = vadd.f32 %v2141_v37, %v8492_v13  ;;  %v2277_v40 = vadd.f32 %v2184_v38, %v8495_v14  ;;  %v6564_v41 = vpop.f32.mrb[61].mxu0  ;;  %v6576_v42 = vpop.f32.mrb[69].mxu1 }
 0x357   : > { %v2144_v43 = vpop.f32.mrb[62].mxu0  ;;  %v2187_v44 = vpop.f32.mrb[70].mxu1 }
 0x358   : > { %v6565_v45 = vpop.f32.mrb[63].mxu0  ;;  %v6577_v46 = vpop.f32.mrb[71].mxu1 }
 0x365   : > { %v2227_v47 = vpop.f32.mrb[64].mxu0  ;;  %v2270_v48 = vpop.f32.mrb[72].mxu1 }
 0x366   : > { %v2278_v49 = vadd.f32 %v2227_v47, %v2015_v25  ;;  %v2279_v50 = vadd.f32 %v2270_v48, %v2058_v26  ;;  %v6588_v51 = vpop.f32.mrb[65].mxu0  ;;  %v6600_v52 = vpop.f32.mrb[73].mxu1  ;;  %v7213_v25 = vld [vmem:[%s8930_s5] sm:$0xff]   ;;  %v7214_v26 = vld [vmem:[%s8930_s5 + $0x28] sm:$0xff]  }
 0x367   : > { %v2230_v53 = vpop.f32.mrb[66].mxu0  ;;  %v2273_v54 = vpop.f32.mrb[74].mxu1  ;;  %6903 = vmatpush3.bf16.msra.mxu1 %v7213_v25  ;;  %6893 = vmatpush3.bf16.msra.mxu0 %v7214_v26 }
 0x368   : > { %v6589_v55 = vpop.f32.mrb[67].mxu0  ;;  %v6601_v56 = vpop.f32.mrb[75].mxu1  ;;  %6904 = vmatprep.subr.bf16.mxu1 %v7348_v1  ;;  %6894 = vmatprep.subr.bf16.mxu0 %v7348_v1 }
 0x36b   : > { %6905 = vmatpush3.bf16.msra.mxu1 %v7215_v27  ;;  %6895 = vmatpush3.bf16.msra.mxu0 %v7216_v28 }
 0x36c   : > { %6906 = vmatprep.subr.bf16.mxu1 %v7348_v1  ;;  %6896 = vmatprep.subr.bf16.mxu0 %v7348_v1 }
 0x36f   : > { %6907 = vmatpush3.bf16.msra.mxu1 %v7217_v29  ;;  %6897 = vmatpush3.bf16.msra.mxu0 %v7218_v30 }
 0x370   : > { %6908 = vmatprep.subr.bf16.mxu1 %v7348_v1  ;;  %6914 = vmatprep.subr.bf16.mxu0 %v7348_v1 }
 0x373   : > { %6909 = vmatpush3.bf16.msra.mxu1 %v7219_v31 }
 0x374   : > { %6926 = vmatprep.subr.bf16.mxu1 %v7348_v1 }
 0x375   : > { %v2359_v57 = vpop.f32.mrb[68].mxu0  ;;  %v2402_v58 = vpop.f32.mrb[76].mxu1 }
 0x376   : > { %v2494_v59 = vadd.f32 %v2359_v57, %v2276_v39  ;;  %v2495_v60 = vadd.f32 %v2402_v58, %v2277_v40  ;;  %v6612_v61 = vpop.f32.mrb[69].mxu0  ;;  %v6624_v63 = vpop.f32.mrb[77].mxu1 }
 0x377   : > { %v2362_v0 = vpop.f32.mrb[70].mxu0  ;;  %v2405_v2 = vpop.f32.mrb[78].mxu1 }
 0x378   : > { %v6613_v3 = vpop.f32.mrb[71].mxu0  ;;  %v6625_v4 = vpop.f32.mrb[79].mxu1 }
 0x385   : > { %v2445_v5 = vpop.f32.mrb[72].mxu0  ;;  %v2488_v6 = vpop.f32.mrb[80].mxu1 }
 0x386   : > { %v2496_v7 = vadd.f32 %v2445_v5, %v2278_v49  ;;  %v2497_v8 = vadd.f32 %v2488_v6, %v2279_v50  ;;  %v6636_v9 = vpop.f32.mrb[73].mxu0  ;;  %v6648_v13 = vpop.f32.mrb[81].mxu1 }
 0x387   : > { %v2448_v14 = vpop.f32.mrb[74].mxu0  ;;  %v2491_v15 = vpop.f32.mrb[82].mxu1 }
 0x388   : > { %v6637_v16 = vpop.f32.mrb[75].mxu0  ;;  %v6649_v62 = vpop.f32.mrb[83].mxu1 }
 0x395   : > { %v2576_v17 = vpop.f32.mrb[76].mxu0  ;;  %v2619_v18 = vpop.f32.mrb[84].mxu1 }
 0x396   : > { %v2711_v10 = vadd.f32 %v2576_v17, %v2494_v59  ;;  %v2712_v19 = vadd.f32 %v2619_v18, %v2495_v60  ;;  %v6660_v11 = vpop.f32.mrb[77].mxu0  ;;  %v6672_v12 = vpop.f32.mrb[85].mxu1 }
 0x397   : > { %v2579_v20 = vpop.f32.mrb[78].mxu0  ;;  %v2622_v21 = vpop.f32.mrb[86].mxu1 }
 0x398   : > { %v6661_v22 = vpop.f32.mrb[79].mxu0  ;;  %v6673_v23 = vpop.f32.mrb[87].mxu1 }
 0x3a5   : > { %v2662_v32 = vpop.f32.mrb[80].mxu0  ;;  %v2705_v33 = vpop.f32.mrb[88].mxu1 }
 0x3a6   : > { %v2713_v34 = vadd.f32 %v2662_v32, %v2496_v7  ;;  %v2714_v35 = vadd.f32 %v2705_v33, %v2497_v8  ;;  %v6684_v36 = vpop.f32.mrb[81].mxu0  ;;  %v6696_v37 = vpop.f32.mrb[89].mxu1 }
 0x3a7   : > { %v2665_v38 = vpop.f32.mrb[82].mxu0  ;;  %v2708_v39 = vpop.f32.mrb[90].mxu1 }
 0x3a8   : > { %v6685_v40 = vpop.f32.mrb[83].mxu0  ;;  %v6697_v41 = vpop.f32.mrb[91].mxu1 }
 0x3a9   : > { %v5281_v40 = vld [vmem:[%s8929_s4] ss:$0 sm:$0xff] }
 0x3b5   : > { %v2793_v42 = vpop.f32.mrb[84].mxu0  ;;  %v2836_v43 = vpop.f32.mrb[92].mxu1 }
 0x3b6   : > { %v2928_v44 = vadd.f32 %v2793_v42, %v2711_v10  ;;  %v2929_v45 = vadd.f32 %v2836_v43, %v2712_v19  ;;  %v6708_v46 = vpop.f32.mrb[85].mxu0  ;;  %v6720_v47 = vpop.f32.mrb[93].mxu1 }
 0x3b7   : > { %v2796_v48 = vpop.f32.mrb[86].mxu0  ;;  %v2839_v49 = vpop.f32.mrb[94].mxu1 }
 0x3b8   : > { %v6709_v50 = vpop.f32.mrb[87].mxu0  ;;  %v6721_v51 = vpop.f32.mrb[95].mxu1 }
 0x3c5   : > { %v2879_v52 = vpop.f32.mrb[88].mxu0  ;;  %v2922_v53 = vpop.f32.mrb[96].mxu1 }
 0x3c6   : > { %v2930_v54 = vadd.f32 %v2879_v52, %v2713_v34  ;;  %v2931_v55 = vadd.f32 %v2922_v53, %v2714_v35  ;;  %v6732_v56 = vpop.f32.mrb[89].mxu0  ;;  %v6744_v57 = vpop.f32.mrb[97].mxu1 }
 0x3c7   : > { %v2882_v58 = vpop.f32.mrb[90].mxu0  ;;  %v2925_v59 = vpop.f32.mrb[98].mxu1  ;;  %v7221_v57 = vld [vmem:[%s8930_s5 + $0x60] sm:$0xff]  }
 0x3c8   : > { %v6733_v60 = vpop.f32.mrb[91].mxu0  ;;  %v6745_v61 = vpop.f32.mrb[99].mxu1 }
 0x3d5   : > { %v3011_v63 = vpop.f32.mrb[92].mxu0  ;;  %v3054_v0 = vpop.f32.mrb[100].mxu1 }
 0x3d6   : > { %v3146_v2 = vadd.f32 %v3011_v63, %v2928_v44  ;;  %v3147_v3 = vadd.f32 %v3054_v0, %v2929_v45  ;;  %v6756_v4 = vpop.f32.mrb[93].mxu0  ;;  %v6768_v5 = vpop.f32.mrb[101].mxu1 }
 0x3d7   : > { %v3014_v6 = vpop.f32.mrb[94].mxu0  ;;  %v3057_v7 = vpop.f32.mrb[102].mxu1 }
 0x3d8   : > { %v6757_v8 = vpop.f32.mrb[95].mxu0  ;;  %v6769_v9 = vpop.f32.mrb[103].mxu1  ;;  %v7222_v6 = vld [vmem:[%s8930_s5 + $0x48] sm:$0xff]  }
 0x3d9   : > { %v7223_v7 = vld [vmem:[%s8930_s5 + $0x68] sm:$0xff]  }
 0x3e5   : > { %v3097_v13 = vpop.f32.mrb[96].mxu0  ;;  %v3140_v14 = vpop.f32.mrb[104].mxu1 }
 0x3e6   : > { %v3148_v15 = vadd.f32 %v3097_v13, %v2930_v54  ;;  %v3149_v16 = vadd.f32 %v3140_v14, %v2931_v55  ;;  %v6780_v62 = vpop.f32.mrb[97].mxu0  ;;  %v6792_v17 = vpop.f32.mrb[105].mxu1  ;;  %v7220_v54 = vld [vmem:[%s8930_s5 + $0x40] sm:$0xff]  }
 0x3e7   : > { %v3100_v18 = vpop.f32.mrb[98].mxu0  ;;  %v3143_v10 = vpop.f32.mrb[106].mxu1  ;;  %v7224_v62 = vld [vmem:[%s8930_s5 + $0x50] sm:$0xff]  }
 0x3e8   : > { %v6781_v19 = vpop.f32.mrb[99].mxu0  ;;  %v6793_v11 = vpop.f32.mrb[107].mxu1  ;;  %v7225_v17 = vld [vmem:[%s8930_s5 + $0x70] sm:$0xff]   ;;  %v7226_v18 = vld [vmem:[%s8930_s5 + $0x58] sm:$0xff]  }
 0x3e9   : > { %v7227_v10 = vld [vmem:[%s8930_s5 + $0x78] sm:$0xff]  }
 0x3f5   : > { %v3228_v12 = vpop.f32.mrb[100].mxu0  ;;  %v3271_v20 = vpop.f32.mrb[108].mxu1 }
 0x3f6   : > { %v3363_v21 = vadd.f32 %v3228_v12, %v3146_v2  ;;  %v3364_v22 = vadd.f32 %v3271_v20, %v3147_v3  ;;  %v6804_v23 = vpop.f32.mrb[101].mxu0  ;;  %v6816_v24 = vpop.f32.mrb[109].mxu1  ;;  %v7228_v12 = vld [vmem:[%s8930_s5 + $0x80] sm:$0xff]  }
 0x3f7   : > { %v3231_v25 = vpop.f32.mrb[102].mxu0  ;;  %v3274_v26 = vpop.f32.mrb[110].mxu1  ;;  %v7229_v20 = vld [vmem:[%s8930_s5 + $0xa0] sm:$0xff]   ;;  %v7230_v23 = vld [vmem:[%s8930_s5 + $0x88] sm:$0xff]  }
 0x3f8   : > { %v6805_v27 = vpop.f32.mrb[103].mxu0  ;;  %v6817_v28 = vpop.f32.mrb[111].mxu1  ;;  %v7231_v24 = vld [vmem:[%s8930_s5 + $0xa8] sm:$0xff]   ;;  %v7232_v25 = vld [vmem:[%s8930_s5 + $0x90] sm:$0xff]  }
 0x3f9   : > { %v7233_v26 = vld [vmem:[%s8930_s5 + $0xb0] sm:$0xff]   ;;  %v7234_v27 = vld [vmem:[%s8930_s5 + $0x98] sm:$0xff]  }
 0x3fa   : > { %v7235_v28 = vld [vmem:[%s8930_s5 + $0xb8] sm:$0xff]  }
 0x405   : > { %v3314_v29 = vpop.f32.mrb[104].mxu0  ;;  %v3357_v30 = vpop.f32.mrb[112].mxu1 }
 0x406   : > { %v3365_v31 = vadd.f32 %v3314_v29, %v3148_v15  ;;  %v3366_v32 = vadd.f32 %v3357_v30, %v3149_v16  ;;  %v6828_v33 = vpop.f32.mrb[105].mxu0  ;;  %v6840_v34 = vpop.f32.mrb[113].mxu1 }
 0x407   : > { %v3317_v35 = vpop.f32.mrb[106].mxu0  ;;  %v3360_v36 = vpop.f32.mrb[114].mxu1 }
 0x408   : > { %v6829_v37 = vpop.f32.mrb[107].mxu0  ;;  %v6841_v38 = vpop.f32.mrb[115].mxu1  ;;  %v7238_v35 = vld [vmem:[%s8930_s5 + $0xc8] sm:$0xff]  }
 0x409   : > { %v7239_v36 = vld [vmem:[%s8930_s5 + $0xe8] sm:$0xff]   ;;  %v7240_v37 = vld [vmem:[%s8930_s5 + $0xd0] sm:$0xff]  }
 0x40a   : > { %v7241_v38 = vld [vmem:[%s8930_s5 + $0xf0] sm:$0xff]  }
 0x415   : > { %v3445_v39 = vpop.f32.mrb[108].mxu0  ;;  %v3488_v41 = vpop.f32.mrb[116].mxu1 }
 0x416   : > { %v3580_v42 = vadd.f32 %v3445_v39, %v3363_v21  ;;  %v3581_v43 = vadd.f32 %v3488_v41, %v3364_v22  ;;  %v6852_v44 = vpop.f32.mrb[109].mxu0  ;;  %v6864_v45 = vpop.f32.mrb[117].mxu1  ;;  %v7242_v39 = vld [vmem:[%s8930_s5 + $0xd8] sm:$0xff]  }
 0x417   : > { %v3448_v46 = vpop.f32.mrb[110].mxu0  ;;  %v3491_v47 = vpop.f32.mrb[118].mxu1  ;;  %v7245_v44 = vld [vmem:[%s8930_s5 + $0x120] sm:$0xff]  }
 0x418   : > { %v3591_v48 = vadd.f32 %v5281_v40, %v3580_v42  ;;  %v3592_v49 = vadd.f32 %v5281_v40, %v3581_v43  ;;  %v6853_v50 = vpop.f32.mrb[111].mxu0  ;;  %v6865_v51 = vpop.f32.mrb[119].mxu1  ;;  %v7244_v43 = vld [vmem:[%s8930_s5 + $0x100] sm:$0xff]   ;;  %v7246_v47 = vld [vmem:[%s8930_s5 + $0x108] sm:$0xff]  }
 0x419   : > { %v7249_v50 = vld [vmem:[%s8930_s5 + $0x130] sm:$0xff]   ;;  %v7250_v51 = vld [vmem:[%s8930_s5 + $0x118] sm:$0xff]  }
 0x41a   : > { %v3595_v52 = vmax.f32 %v3591_v48, 0.0  ;;  %v3596_v53 = vmax.f32 %v3592_v49, 0.0  ;;  %v7247_v48 = vld [vmem:[%s8930_s5 + $0x128] sm:$0xff]   ;;  %v7248_v49 = vld [vmem:[%s8930_s5 + $0x110] sm:$0xff]  }
 0x41c   : > { %3600 = vst.msk [vmem:[#allocation3] sm:$0xf] %vm3599_vm3, %v3595_v52  ;;  %3601 = vst.msk [vmem:[#allocation3 + $0x4] sm:$0xf] %vm3599_vm3, %v3596_v53  ;;  %v7251_v52 = vld [vmem:[%s8930_s5 + $0x138] sm:$0xff]  }
 0x423   : > { %v3614_v55 = vld [vmem:[#allocation3 + $0x1] sm:$0x1]  ;;  %v3604_v56 = vld [vmem:[#allocation3] sm:$0x1]  ;;  %v3759_v19 = vld [vmem:[#allocation3 + $0x2] sm:$0x1] }
 0x424   : > { %v3615_v58 = vpack.c.bf16 %v3614_v55, %v3614_v55  ;;  %v3605_v59 = vpack.c.bf16 %v3604_v56, %v3604_v56  ;;  %v3838_v11 = vld [vmem:[#allocation3 + $0x3] sm:$0x1]  ;;  %v3760_v21 = vpack.c.bf16 %v3759_v19, %v3759_v19  ;;  %v3918_v29 = vld [vmem:[#allocation3 + $0x4] sm:$0x1]  ;;  %v3997_v30 = vld [vmem:[#allocation3 + $0x5] sm:$0x1] }
 0x425   : > { %v3531_v60 = vpop.f32.mrb[112].mxu0  ;;  %v3574_v61 = vpop.f32.mrb[120].mxu1  ;;  %v3839_v22 = vpack.c.bf16 %v3838_v11, %v3838_v11  ;;  %v3919_v33 = vpack.c.bf16 %v3918_v29, %v3918_v29  ;;  %v3998_v34 = vpack.c.bf16 %v3997_v30, %v3997_v30  ;;  %v4076_v41 = vld [vmem:[#allocation3 + $0x6] sm:$0x1]  ;;  %v4155_v42 = vld [vmem:[#allocation3 + $0x7] sm:$0x1] }
 0x426   : > { %v3582_v63 = vadd.f32 %v3531_v60, %v3365_v31  ;;  %v3583_v0 = vadd.f32 %v3574_v61, %v3366_v32  ;;  %v6876_v2 = vpop.f32.mrb[113].mxu0  ;;  %v6888_v3 = vpop.f32.mrb[121].mxu1  ;;  %6899 = vmatmul.mubr.msk.bf16.vlgmr.msra.gmra.mrb[116].mxu0 %vm1694_vm2, %v3615_v58  ;;  %6911 = vmatmul.mubr.msk.bf16.vlgmr.msra.gmra.mrb[124].mxu1 %vm1694_vm2, %v3605_v59  ;;  %v7236_v31 = vld [vmem:[%s8930_s5 + $0xc0] sm:$0xff]   ;;  %v4077_v45 = vpack.c.bf16 %v4076_v41, %v4076_v41  ;;  %v7254_v59 = vld [vmem:[%s8930_s5 + $0x148] sm:$0xff]   ;;  %v7256_v61 = vld [vmem:[%s8930_s5 + $0x150] sm:$0xff]  }
 0x427   : > { %6915 = vmatpush3.bf16.msra.mxu0 %v7220_v54  ;;  %6927 = vmatpush3.bf16.msra.mxu1 %v7221_v57  ;;  %v3534_v4 = vpop.f32.mrb[114].mxu0  ;;  %v3577_v5 = vpop.f32.mrb[122].mxu1  ;;  %v7237_v32 = vld [vmem:[%s8930_s5 + $0xe0] sm:$0xff]   ;;  %v4156_v46 = vpack.c.bf16 %v4155_v42, %v4155_v42  ;;  %v7255_v60 = vld [vmem:[%s8930_s5 + $0x168] sm:$0xff]   ;;  %v7259_v2 = vld [vmem:[%s8930_s5 + $0x178] sm:$0xff]  }
 0x428   : > { %v3593_v8 = vadd.f32 %v5281_v40, %v3582_v63  ;;  %v3594_v9 = vadd.f32 %v5281_v40, %v3583_v0  ;;  %v6877_v13 = vpop.f32.mrb[115].mxu0  ;;  %v6889_v14 = vpop.f32.mrb[123].mxu1  ;;  %6916 = vmatprep.subr.bf16.mxu0 %v7348_v1  ;;  %6928 = vmatprep.subr.bf16.mxu1 %v7348_v1  ;;  %v7243_v40 = vld [vmem:[%s8930_s5 + $0xf8] sm:$0xff]   ;;  %v7252_v55 = vld [vmem:[%s8930_s5 + $0x140] sm:$0xff]   ;;  %v7257_v63 = vld [vmem:[%s8930_s5 + $0x170] sm:$0xff]  }
 0x429   : > { %6922 = vmatprep.mubr.msk.bf16.mxu0 %vm7349_vm0, %v7348_v1  ;;  %6934 = vmatprep.mubr.msk.bf16.mxu1 %vm7349_vm0, %v7348_v1  ;;  %v7253_v56 = vld [vmem:[%s8930_s5 + $0x160] sm:$0xff]   ;;  %v7258_v0 = vld [vmem:[%s8930_s5 + $0x158] sm:$0xff]   ;;  %v7263_v13 = vld [vmem:[%s8930_s5 + $0x1a8] sm:$0xff]  }
 0x42a   : > { %v3597_v15 = vmax.f32 %v3593_v8, 0.0  ;;  %v3598_v16 = vmax.f32 %v3594_v9, 0.0  ;;  %v7260_v5 = vld [vmem:[%s8930_s5 + $0x180] sm:$0xff]   ;;  %v7262_v9 = vld [vmem:[%s8930_s5 + $0x188] sm:$0xff]   ;;  %v7264_v14 = vld [vmem:[%s8930_s5 + $0x190] sm:$0xff]  }
 0x42b   : > { %6917 = vmatpush3.bf16.msra.mxu0 %v7222_v6  ;;  %6929 = vmatpush3.bf16.msra.mxu1 %v7223_v7  ;;  %v7261_v6 = vld [vmem:[%s8930_s5 + $0x1a0] sm:$0xff]  }
 0x42c   : > { %3602 = vst.msk [vmem:[#allocation3 + $0x8] sm:$0xf] %vm3599_vm3, %v3597_v15  ;;  %3603 = vst.msk [vmem:[#allocation3 + $0xc] sm:$0xf] %vm3599_vm3, %v3598_v16  ;;  %6918 = vmatprep.subr.bf16.mxu0 %v7348_v1  ;;  %6930 = vmatprep.subr.bf16.mxu1 %v7348_v1  ;;  %v7265_v15 = vld [vmem:[%s8930_s5 + $0x1b0] sm:$0xff]   ;;  %v7266_v16 = vld [vmem:[%s8930_s5 + $0x198] sm:$0xff]  }
 0x42d   : > { %v7269_v19 = vld [vmem:[%s8930_s5 + $0x1e0] sm:$0xff]  }
 0x42e   : > { %v7276_v30 = vld [vmem:[%s8932_s7] sm:$0xff]  }
 0x42f   : > { %6919 = vmatpush3.bf16.msra.mxu0 %v7224_v62  ;;  %6931 = vmatpush3.bf16.msra.mxu1 %v7225_v17  ;;  %v7267_v62 = vld [vmem:[%s8930_s5 + $0x1b8] sm:$0xff]  }
 0x430   : > { %6920 = vmatprep.subr.bf16.mxu0 %v7348_v1  ;;  %6932 = vmatprep.subr.bf16.mxu1 %v7348_v1 }
 0x433   : > { %6921 = vmatpush3.bf16.msra.mxu0 %v7226_v18  ;;  %6933 = vmatpush3.bf16.msra.mxu1 %v7227_v10  ;;  %v4235_v53 = vld [vmem:[#allocation3 + $0x8] sm:$0x1]  ;;  %v4314_v54 = vld [vmem:[#allocation3 + $0x9] sm:$0x1]  ;;  %v4393_v3 = vld [vmem:[#allocation3 + $0xa] sm:$0x1] }
 0x434   : > { %6938 = vmatprep.subr.bf16.mxu0 %v7348_v1  ;;  %6950 = vmatprep.subr.bf16.mxu1 %v7348_v1  ;;  %v4236_v57 = vpack.c.bf16 %v4235_v53, %v4235_v53  ;;  %v4315_v58 = vpack.c.bf16 %v4314_v54, %v4314_v54  ;;  %v4472_v4 = vld [vmem:[#allocation3 + $0xb] sm:$0x1]  ;;  %v4394_v7 = vpack.c.bf16 %v4393_v3, %v4393_v3  ;;  %v4552_v17 = vld [vmem:[#allocation3 + $0xc] sm:$0x1]  ;;  %v4631_v18 = vld [vmem:[#allocation3 + $0xd] sm:$0x1] }
 0x435   : > { %v4473_v8 = vpack.c.bf16 %v4472_v4, %v4472_v4  ;;  %v7268_v10 = vld [vmem:[%s8930_s5 + $0x1c0] sm:$0xff]   ;;  %v4553_v11 = vpack.c.bf16 %v4552_v17, %v4552_v17 }
 0x436   : > { %6923 = vmatmul.mubr.msk.bf16.vlgmr.msra.gmra.mrb[120].mxu0 %vm1694_vm2, %v3760_v21  ;;  %6935 = vmatmul.mubr.msk.bf16.vlgmr.msra.gmra.mrb[128].mxu1 %vm1694_vm2, %v3839_v22  ;;  %v7271_v21 = vld [vmem:[%s8930_s5 + $0x1e8] sm:$0xff]   ;;  %v7272_v22 = vld [vmem:[%s8930_s5 + $0x1d0] sm:$0xff]  }
 0x437   : > { %6939 = vmatpush3.bf16.msra.mxu0 %v7228_v12  ;;  %6951 = vmatpush3.bf16.msra.mxu1 %v7229_v20  ;;  %v4632_v12 = vpack.c.bf16 %v4631_v18, %v4631_v18  ;;  %v7270_v20 = vld [vmem:[%s8930_s5 + $0x1c8] sm:$0xff]  }
 0x438   : > { %6940 = vmatprep.subr.bf16.mxu0 %v7348_v1  ;;  %6952 = vmatprep.subr.bf16.mxu1 %v7348_v1 }
 0x439   : > { %6946 = vmatprep.mubr.msk.bf16.mxu0 %vm7349_vm0, %v7348_v1  ;;  %6958 = vmatprep.mubr.msk.bf16.mxu1 %vm7349_vm0, %v7348_v1 }
 0x43b   : > { %6941 = vmatpush3.bf16.msra.mxu0 %v7230_v23  ;;  %6953 = vmatpush3.bf16.msra.mxu1 %v7231_v24  ;;  %v7273_v23 = vld [vmem:[%s8930_s5 + $0x1f0] sm:$0xff]   ;;  %v7274_v24 = vld [vmem:[%s8930_s5 + $0x1d8] sm:$0xff]  }
 0x43c   : > { %6942 = vmatprep.subr.bf16.mxu0 %v7348_v1  ;;  %6954 = vmatprep.subr.bf16.mxu1 %v7348_v1 }
 0x43f   : > { %6943 = vmatpush3.bf16.msra.mxu0 %v7232_v25  ;;  %6955 = vmatpush3.bf16.msra.mxu1 %v7233_v26  ;;  %v7275_v25 = vld [vmem:[%s8930_s5 + $0x1f8] sm:$0xff]  }
 0x440   : > { %6944 = vmatprep.subr.bf16.mxu0 %v7348_v1  ;;  %6956 = vmatprep.subr.bf16.mxu1 %v7348_v1  ;;  %v4710_v26 = vld [vmem:[#allocation3 + $0xe] sm:$0x1] }
 0x443   : > { %6945 = vmatpush3.bf16.msra.mxu0 %v7234_v27  ;;  %6957 = vmatpush3.bf16.msra.mxu1 %v7235_v28  ;;  %v4789_v27 = vld [vmem:[#allocation3 + $0xf] sm:$0x1]  ;;  %v4711_v28 = vpack.c.bf16 %v4710_v26, %v4710_v26 }
 0x444   : > { %6962 = vmatprep.subr.bf16.mxu0 %v7348_v1  ;;  %6974 = vmatprep.subr.bf16.mxu1 %v7348_v1  ;;  %v4790_v29 = vpack.c.bf16 %v4789_v27, %v4789_v27 }
 0x446   : > { %6947 = vmatmul.mubr.msk.bf16.vlgmr.msra.gmra.mrb[124].mxu0 %vm1694_vm2, %v3919_v33  ;;  %6959 = vmatmul.mubr.msk.bf16.vlgmr.msra.gmra.mrb[132].mxu1 %vm1694_vm2, %v3998_v34  ;;  %v7279_v33 = vld [vmem:[%s8932_s7 + $0x18] sm:$0xff]   ;;  %v7280_v34 = vld [vmem:[%s8932_s7 + $0x20] sm:$0xff]  }
 0x447   : > { %6963 = vmatpush3.bf16.msra.mxu0 %v7236_v31  ;;  %6975 = vmatpush3.bf16.msra.mxu1 %v7237_v32  ;;  %v7277_v31 = vld [vmem:[%s8932_s7 + $0x8] sm:$0xff]   ;;  %v7278_v32 = vld [vmem:[%s8932_s7 + $0x10] sm:$0xff]  }
 0x448   : > { %6964 = vmatprep.subr.bf16.mxu0 %v7348_v1  ;;  %6976 = vmatprep.subr.bf16.mxu1 %v7348_v1 }
 0x449   : > { %6970 = vmatprep.mubr.msk.bf16.mxu0 %vm7349_vm0, %v7348_v1  ;;  %6982 = vmatprep.mubr.msk.bf16.mxu1 %vm7349_vm0, %v7348_v1 }
 0x44b   : > { %6965 = vmatpush3.bf16.msra.mxu0 %v7238_v35  ;;  %6977 = vmatpush3.bf16.msra.mxu1 %v7239_v36  ;;  %v7281_v35 = vld [vmem:[%s8932_s7 + $0x28] sm:$0xff]   ;;  %v7282_v36 = vld [vmem:[%s8932_s7 + $0x30] sm:$0xff]  }
 0x44c   : > { %6966 = vmatprep.subr.bf16.mxu0 %v7348_v1  ;;  %6978 = vmatprep.subr.bf16.mxu1 %v7348_v1 }
 0x44f   : > { %6967 = vmatpush3.bf16.msra.mxu0 %v7240_v37  ;;  %6979 = vmatpush3.bf16.msra.mxu1 %v7241_v38  ;;  %v7283_v37 = vld [vmem:[%s8932_s7 + $0x38] sm:$0xff]  }
 0x450   : > { %6968 = vmatprep.subr.bf16.mxu0 %v7348_v1  ;;  %6980 = vmatprep.subr.bf16.mxu1 %v7348_v1 }
 0x453   : > { %6969 = vmatpush3.bf16.msra.mxu0 %v7242_v39  ;;  %6981 = vmatpush3.bf16.msra.mxu1 %v7243_v40 }
 0x454   : > { %6986 = vmatprep.subr.bf16.mxu0 %v7348_v1  ;;  %6998 = vmatprep.subr.bf16.mxu1 %v7348_v1 }
 0x456   : > { %6971 = vmatmul.mubr.msk.bf16.vlgmr.msra.gmra.mrb[128].mxu0 %vm1694_vm2, %v4077_v45  ;;  %6983 = vmatmul.mubr.msk.bf16.vlgmr.msra.gmra.mrb[136].mxu1 %vm1694_vm2, %v4156_v46 }
 0x457   : > { %6987 = vmatpush3.bf16.msra.mxu0 %v7244_v43  ;;  %6999 = vmatpush3.bf16.msra.mxu1 %v7245_v44 }
 0x458   : > { %6988 = vmatprep.subr.bf16.mxu0 %v7348_v1  ;;  %7000 = vmatprep.subr.bf16.mxu1 %v7348_v1 }
 0x459   : > { %6994 = vmatprep.mubr.msk.bf16.mxu0 %vm7349_vm0, %v7348_v1  ;;  %7006 = vmatprep.mubr.msk.bf16.mxu1 %vm7349_vm0, %v7348_v1 }
 0x45b   : > { %6989 = vmatpush3.bf16.msra.mxu0 %v7246_v47  ;;  %7001 = vmatpush3.bf16.msra.mxu1 %v7247_v48 }
 0x45c   : > { %6990 = vmatprep.subr.bf16.mxu0 %v7348_v1  ;;  %7002 = vmatprep.subr.bf16.mxu1 %v7348_v1 }
 0x45f   : > { %6991 = vmatpush3.bf16.msra.mxu0 %v7248_v49  ;;  %7003 = vmatpush3.bf16.msra.mxu1 %v7249_v50 }
 0x460   : > { %6992 = vmatprep.subr.bf16.mxu0 %v7348_v1  ;;  %7004 = vmatprep.subr.bf16.mxu1 %v7348_v1 }
 0x463   : > { %6993 = vmatpush3.bf16.msra.mxu0 %v7250_v51  ;;  %7005 = vmatpush3.bf16.msra.mxu1 %v7251_v52 }
 0x464   : > { %7010 = vmatprep.subr.bf16.mxu0 %v7348_v1  ;;  %7022 = vmatprep.subr.bf16.mxu1 %v7348_v1 }
 0x466   : > { %6995 = vmatmul.mubr.msk.bf16.vlgmr.msra.gmra.mrb[132].mxu0 %vm1694_vm2, %v4236_v57  ;;  %7007 = vmatmul.mubr.msk.bf16.vlgmr.msra.gmra.mrb[140].mxu1 %vm1694_vm2, %v4315_v58 }
 0x467   : > { %7011 = vmatpush3.bf16.msra.mxu0 %v7252_v55  ;;  %7023 = vmatpush3.bf16.msra.mxu1 %v7253_v56 }
 0x468   : > { %7012 = vmatprep.subr.bf16.mxu0 %v7348_v1  ;;  %7024 = vmatprep.subr.bf16.mxu1 %v7348_v1 }
 0x469   : > { %7018 = vmatprep.mubr.msk.bf16.mxu0 %vm7349_vm0, %v7348_v1  ;;  %7030 = vmatprep.mubr.msk.bf16.mxu1 %vm7349_vm0, %v7348_v1 }
 0x46b   : > { %7013 = vmatpush3.bf16.msra.mxu0 %v7254_v59  ;;  %7025 = vmatpush3.bf16.msra.mxu1 %v7255_v60 }
 0x46c   : > { %7014 = vmatprep.subr.bf16.mxu0 %v7348_v1  ;;  %7026 = vmatprep.subr.bf16.mxu1 %v7348_v1 }
 0x46f   : > { %7015 = vmatpush3.bf16.msra.mxu0 %v7256_v61  ;;  %7027 = vmatpush3.bf16.msra.mxu1 %v7257_v63 }
 0x470   : > { %7016 = vmatprep.subr.bf16.mxu0 %v7348_v1  ;;  %7028 = vmatprep.subr.bf16.mxu1 %v7348_v1 }
 0x473   : > { %7017 = vmatpush3.bf16.msra.mxu0 %v7258_v0  ;;  %7029 = vmatpush3.bf16.msra.mxu1 %v7259_v2 }
 0x474   : > { %7034 = vmatprep.subr.bf16.mxu0 %v7348_v1  ;;  %7046 = vmatprep.subr.bf16.mxu1 %v7348_v1 }
 0x476   : > { %7019 = vmatmul.mubr.msk.bf16.vlgmr.msra.gmra.mrb[136].mxu0 %vm1694_vm2, %v4394_v7  ;;  %7031 = vmatmul.mubr.msk.bf16.vlgmr.msra.gmra.mrb[144].mxu1 %vm1694_vm2, %v4473_v8 }
 0x477   : > { %7035 = vmatpush3.bf16.msra.mxu0 %v7260_v5  ;;  %7047 = vmatpush3.bf16.msra.mxu1 %v7261_v6 }
 0x478   : > { %7036 = vmatprep.subr.bf16.mxu0 %v7348_v1  ;;  %7048 = vmatprep.subr.bf16.mxu1 %v7348_v1 }
 0x479   : > { %7042 = vmatprep.mubr.msk.bf16.mxu0 %vm7349_vm0, %v7348_v1  ;;  %7054 = vmatprep.mubr.msk.bf16.mxu1 %vm7349_vm0, %v7348_v1 }
 0x47b   : > { %7037 = vmatpush3.bf16.msra.mxu0 %v7262_v9  ;;  %7049 = vmatpush3.bf16.msra.mxu1 %v7263_v13 }
 0x47c   : > { %7038 = vmatprep.subr.bf16.mxu0 %v7348_v1  ;;  %7050 = vmatprep.subr.bf16.mxu1 %v7348_v1 }
 0x47f   : > { %7039 = vmatpush3.bf16.msra.mxu0 %v7264_v14  ;;  %7051 = vmatpush3.bf16.msra.mxu1 %v7265_v15 }
 0x480   : > { %7040 = vmatprep.subr.bf16.mxu0 %v7348_v1  ;;  %7052 = vmatprep.subr.bf16.mxu1 %v7348_v1 }
 0x483   : > { %7041 = vmatpush3.bf16.msra.mxu0 %v7266_v16  ;;  %7053 = vmatpush3.bf16.msra.mxu1 %v7267_v62 }
 0x484   : > { %7058 = vmatprep.subr.bf16.mxu0 %v7348_v1  ;;  %7070 = vmatprep.subr.bf16.mxu1 %v7348_v1 }
 0x486   : > { %7043 = vmatmul.mubr.msk.bf16.vlgmr.msra.gmra.mrb[140].mxu0 %vm1694_vm2, %v4553_v11  ;;  %7055 = vmatmul.mubr.msk.bf16.vlgmr.msra.gmra.mrb[148].mxu1 %vm1694_vm2, %v4632_v12 }
 0x487   : > { %7059 = vmatpush3.bf16.msra.mxu0 %v7268_v10  ;;  %7071 = vmatpush3.bf16.msra.mxu1 %v7269_v19 }
 0x488   : > { %7060 = vmatprep.subr.bf16.mxu0 %v7348_v1  ;;  %7072 = vmatprep.subr.bf16.mxu1 %v7348_v1 }
 0x489   : > { %7066 = vmatprep.mubr.msk.bf16.mxu0 %vm7349_vm0, %v7348_v1  ;;  %7078 = vmatprep.mubr.msk.bf16.mxu1 %vm7349_vm0, %v7348_v1 }
 0x48b   : > { %7061 = vmatpush3.bf16.msra.mxu0 %v7270_v20  ;;  %7073 = vmatpush3.bf16.msra.mxu1 %v7271_v21 }
 0x48c   : > { %7062 = vmatprep.subr.bf16.mxu0 %v7348_v1  ;;  %7074 = vmatprep.subr.bf16.mxu1 %v7348_v1 }
 0x48f   : > { %7063 = vmatpush3.bf16.msra.mxu0 %v7272_v22  ;;  %7075 = vmatpush3.bf16.msra.mxu1 %v7273_v23 }
 0x490   : > { %7064 = vmatprep.subr.bf16.mxu0 %v7348_v1  ;;  %7076 = vmatprep.subr.bf16.mxu1 %v7348_v1 }
 0x493   : > { %7065 = vmatpush3.bf16.msra.mxu0 %v7274_v24  ;;  %7077 = vmatpush3.bf16.msra.mxu1 %v7275_v25 }
 0x494   : > { %7082 = vmatprep.subr.bf16.mxu0 %v7348_v1 }
 0x496   : > { %7067 = vmatmul.mubr.msk.bf16.vlgmr.msra.gmra.mrb[144].mxu0 %vm1694_vm2, %v4711_v28  ;;  %7079 = vmatmul.mubr.msk.bf16.vlgmr.msra.gmra.mrb[152].mxu1 %vm1694_vm2, %v4790_v29 }
 0x497   : > { %7098 = vmatprep.mubr.msk.bf16.mxu0 %vm7349_vm0, %v7348_v1  ;;  %7083 = vmatpush3.bf16.msra.mxu0 %v7276_v30 }
 0x498   : > { %7084 = vmatprep.subr.bf16.mxu0 %v7348_v1 }
 0x49b   : > { %7085 = vmatpush3.bf16.msra.mxu0 %v7277_v31 }
 0x49c   : > { %7086 = vmatprep.subr.bf16.mxu0 %v7348_v1 }
 0x49f   : > { %7087 = vmatpush3.bf16.msra.mxu0 %v7278_v32 }
 0x4a0   : > { %7088 = vmatprep.subr.bf16.mxu0 %v7348_v1 }
 0x4a3   : > { %7089 = vmatpush3.bf16.msra.mxu0 %v7279_v33 }
 0x4a4   : > { %7090 = vmatprep.subr.bf16.mxu0 %v7348_v1 }
 0x4a7   : > { %7091 = vmatpush3.bf16.msra.mxu0 %v7280_v34 }
 0x4a8   : > { %7092 = vmatprep.subr.bf16.mxu0 %v7348_v1 }
 0x4ab   : > { %7093 = vmatpush3.bf16.msra.mxu0 %v7281_v35 }
 0x4ac   : > { %7094 = vmatprep.subr.bf16.mxu0 %v7348_v1 }
 0x4af   : > { %7095 = vmatpush3.bf16.msra.mxu0 %v7282_v36 }
 0x4b0   : > { %7096 = vmatprep.subr.bf16.mxu0 %v7348_v1 }
 0x4b3   : > { %7097 = vmatpush3.bf16.msra.mxu0 %v7283_v37 }
 0x4f9   : > { %v3686_v38 = vpop.f32.mrb[116].mxu0  ;;  %v3753_v39 = vpop.f32.mrb[124].mxu1 }
 0x4fa   : > { %v3754_v40 = vadd.f32 %v3753_v39, %v3686_v38  ;;  %v6900_v41 = vpop.f32.mrb[117].mxu0  ;;  %v6912_v42 = vpop.f32.mrb[125].mxu1 }
 0x4fb   : > { %v3689_v43 = vpop.f32.mrb[118].mxu0  ;;  %v3756_v44 = vpop.f32.mrb[126].mxu1 }
 0x4fc   : > { %v6901_v45 = vpop.f32.mrb[119].mxu0  ;;  %v6913_v46 = vpop.f32.mrb[127].mxu1 }
 0x509   : > { %v3831_v47 = vpop.f32.mrb[120].mxu0  ;;  %v3910_v48 = vpop.f32.mrb[128].mxu1 }
 0x50a   : > { %v3837_v49 = vadd.f32 %v3831_v47, %v3754_v40  ;;  %v6924_v50 = vpop.f32.mrb[121].mxu0  ;;  %v6936_v51 = vpop.f32.mrb[129].mxu1 }
 0x50b   : > { %v3834_v1 = vpop.f32.mrb[122].mxu0  ;;  %v3913_v52 = vpop.f32.mrb[130].mxu1 }
 0x50c   : > { %v3916_v53 = vadd.f32 %v3910_v48, %v3837_v49  ;;  %v6925_v54 = vpop.f32.mrb[123].mxu0  ;;  %v6937_v55 = vpop.f32.mrb[131].mxu1  ;;  %v4868_v48 = vld [vmem:[%s8931_s6] sm:$0x1] }
 0x519   : > { %v3990_v56 = vpop.f32.mrb[124].mxu0  ;;  %v4069_v57 = vpop.f32.mrb[132].mxu1 }
 0x51a   : > { %v3996_v58 = vadd.f32 %v3990_v56, %v3916_v53  ;;  %v6948_v59 = vpop.f32.mrb[125].mxu0  ;;  %v6960_v60 = vpop.f32.mrb[133].mxu1  ;;  %v4888_v56 = vld [vmem:[%s8933_s8] sm:$0x1] }
 0x51b   : > { %v3993_v61 = vpop.f32.mrb[126].mxu0  ;;  %v4072_v63 = vpop.f32.mrb[134].mxu1 }
 0x51c   : > { %v4075_v0 = vadd.f32 %v4069_v57, %v3996_v58  ;;  %v6949_v2 = vpop.f32.mrb[127].mxu0  ;;  %v6961_v3 = vpop.f32.mrb[135].mxu1 }
 0x529   : > { %v4148_v4 = vpop.f32.mrb[128].mxu0  ;;  %v4227_v5 = vpop.f32.mrb[136].mxu1 }
 0x52a   : > { %v4154_v6 = vadd.f32 %v4148_v4, %v4075_v0  ;;  %v6972_v7 = vpop.f32.mrb[129].mxu0  ;;  %v6984_v8 = vpop.f32.mrb[137].mxu1 }
 0x52b   : > { %v4151_v9 = vpop.f32.mrb[130].mxu0  ;;  %v4230_v13 = vpop.f32.mrb[138].mxu1 }
 0x52c   : > { %v4233_v14 = vadd.f32 %v4227_v5, %v4154_v6  ;;  %v6973_v15 = vpop.f32.mrb[131].mxu0  ;;  %v6985_v16 = vpop.f32.mrb[139].mxu1 }
 0x539   : > { %v4307_v62 = vpop.f32.mrb[132].mxu0  ;;  %v4386_v17 = vpop.f32.mrb[140].mxu1 }
 0x53a   : > { %v4313_v18 = vadd.f32 %v4307_v62, %v4233_v14  ;;  %v6996_v10 = vpop.f32.mrb[133].mxu0  ;;  %v7008_v19 = vpop.f32.mrb[141].mxu1 }
 0x53b   : > { %v4310_v11 = vpop.f32.mrb[134].mxu0  ;;  %v4389_v12 = vpop.f32.mrb[142].mxu1 }
 0x53c   : > { %v4392_v20 = vadd.f32 %v4386_v17, %v4313_v18  ;;  %v6997_v21 = vpop.f32.mrb[135].mxu0  ;;  %v7009_v22 = vpop.f32.mrb[143].mxu1 }
 0x549   : > { %v4465_v23 = vpop.f32.mrb[136].mxu0  ;;  %v4544_v24 = vpop.f32.mrb[144].mxu1 }
 0x54a   : > { %v4471_v25 = vadd.f32 %v4465_v23, %v4392_v20  ;;  %v7020_v26 = vpop.f32.mrb[137].mxu0  ;;  %v7032_v27 = vpop.f32.mrb[145].mxu1 }
 0x54b   : > { %v4468_v28 = vpop.f32.mrb[138].mxu0  ;;  %v4547_v29 = vpop.f32.mrb[146].mxu1 }
 0x54c   : > { %v4550_v30 = vadd.f32 %v4544_v24, %v4471_v25  ;;  %v7021_v31 = vpop.f32.mrb[139].mxu0  ;;  %v7033_v32 = vpop.f32.mrb[147].mxu1 }
 0x559   : > { %v4624_v33 = vpop.f32.mrb[140].mxu0  ;;  %v4703_v34 = vpop.f32.mrb[148].mxu1 }
 0x55a   : > { %v4630_v35 = vadd.f32 %v4624_v33, %v4550_v30  ;;  %v7044_v36 = vpop.f32.mrb[141].mxu0  ;;  %v7056_v37 = vpop.f32.mrb[149].mxu1 }
 0x55b   : > { %v4627_v38 = vpop.f32.mrb[142].mxu0  ;;  %v4706_v39 = vpop.f32.mrb[150].mxu1 }
 0x55c   : > { %v4709_v40 = vadd.f32 %v4703_v34, %v4630_v35  ;;  %v7045_v41 = vpop.f32.mrb[143].mxu0  ;;  %v7057_v42 = vpop.f32.mrb[151].mxu1 }
 0x569   : > { %v4782_v43 = vpop.f32.mrb[144].mxu0  ;;  %v4861_v44 = vpop.f32.mrb[152].mxu1 }
 0x56a   : > { %v4788_v45 = vadd.f32 %v4782_v43, %v4709_v40  ;;  %v7068_v46 = vpop.f32.mrb[145].mxu0  ;;  %v7080_v47 = vpop.f32.mrb[153].mxu1 }
 0x56b   : > { %v4785_v49 = vpop.f32.mrb[146].mxu0  ;;  %v4864_v50 = vpop.f32.mrb[154].mxu1 }
 0x56c   : > { %v4867_v51 = vadd.f32 %v4861_v44, %v4788_v45  ;;  %v7069_v1 = vpop.f32.mrb[147].mxu0  ;;  %v7081_v52 = vpop.f32.mrb[155].mxu1 }
 0x56e   : > { %v4869_v53 = vadd.f32 %v4868_v48, %v4867_v51 }
 0x570   : > { %v4870_v54 = vmax.f32 %v4869_v53, 0.0 }
 0x572   : > { %v4871_v55 = vpack.c.bf16 %v4870_v54, %v4870_v54 }
 0x574   : > { %7099 = vmatmul.mubr.bf16.vlgmr.msra.gmra.mrb[148].mxu0 %v4871_v55 }
 0x647   : > { %v4971_v57 = vpop.f32.mrb[148].mxu0 }
 0x648   : > { %v4972_v58 = vadd.f32 %v4971_v57, %v4888_v56  ;;  %v7100_v59 = vpop.f32.mrb[149].mxu0 }
 0x649   : > { %v4974_v60 = vpop.f32.mrb[150].mxu0 }
 0x64a   : > { %v7101_v61 = vpop.f32.mrb[151].mxu0  ;;  %4978 = vst.msk [vmem:[%s324_s17] sm:$0x1] %vm4977_vm4, %v4972_v58 }
 0x64b   : > { %7297 = shalt.err (!%p7294_p3)
}
 0x64c   : > { %s7298_s28 = scalar_lea.hbm %s8883_s23, 16  ;;  %s7302_s17 = scalar_lea.hbm %s8934_s9, 32 }
 0x64d   : > { %p7299_p4 = scmp.ne.s32.totalorder %s8883_s23, %s7298_s28  ;;  %p7303_p9 = scmp.lt.u32.totalorder %s8883_s23, %s8934_s9 }
 0x64e   : > { %p7304_p10 = scmp.lt.u32.totalorder %s7302_s17, %s7298_s28  ;;  %p7306_p12 = scmp.lt.u32.totalorder %s7298_s28, %s8883_s23 }
 0x64f   : > { %p7300_p7 = pnand %p7299_p4, %p7439_p5 }
 0x650   : > { %p7305_p11 = por %p7304_p10, %p7303_p9 }
 0x651   : > { %p7301_p8 = pneg %p7300_p7 }
 0x652   : > { %p7307_p13 = por %p7306_p12, %p7305_p11 }
 0x654   : > { %p7308_p0 = pnand %p7307_p13, %p7301_p8 }
 0x656   : > { %7311 = shalt.err (!%p7308_p0)
}
 0x657   : > { %7103 = dma.vmem_to_hbm [thread:$0]  (%p7439_p5), %s8885_s21, 16, %s8883_s23, %s4980_s13  }
 0x658 PF: > { %p7109_p1 = scmp.ge.s32.totalorder %s7346_s12, 2  ;;  %s5004_s24 = sand.u32 1, %s7334_s30  }
 0x659   : > { %s5005_s25 = scalar_lea.sflag [#allocation5], %s5004_s24 }
 0x65a   : > { %p7106_p2 = pnand %p7109_p1, %p7443_p6 }
 0x65c   : > { %7329 = dma.done.wait (!%p7106_p2), %s5005_s25, 16  }
 0x65d   : > { %7331 = vsyncadd (!%p7106_p2), %s5005_s25, 4294967280  ;;  %p19_p3 = scmp.ge.s32.totalorder %s7426_s15, 4   ;;  %s8937_s30 = smov %s7338_s10 }
 0x65e   : > { %s8938_s10 = smov %s7342_s11  ;;  %s8939_s11 = smov %s7437_s18 }
 0x65f   : > { %s8940_s12 = smov %s7426_s15  ;;  %21 = sbr.rel (!%p19_p3) target bundleno = 3 (0x3), region = 123 }
 0x666   :  { %5009 = vsyncpa [#allocation5], 1 }
 0x667   :  { %5011 = vsyncpa [#allocation5 + $0x1], 1 }

</bundles_post_ra>
